<compile_context>
chip_gen: v5e
topology: v5e:2x2
jax: 0.10.0
libtpu: 0.0.40
codegen_flags: <defaults>
</compile_context>

<pallas_src>
import jax
import jax.numpy as jnp
from jax.experimental import pallas as pl
from jax.experimental.pallas import tpu as pltpu

# ----------------------------- config -------------------------------------
EMBED_DIM = 32
NHEAD = 4
NUM_LAYERS = 2
NUM_CLASSES = 5
PATCH = 4
IMG = 16
IN_CH = 3
FFN_DIM = 4 * EMBED_DIM          # 128
EPS = 1e-5
HEAD_PAD = 128                   # lane-dense padded class dim for decoder output
QKV_PAD = 128                    # lane-dense padded 3*D qkv width

K_DIM = IN_CH * PATCH * PATCH    # 48  (flattened patch length)
N_TOK = (IMG // PATCH) ** 2      # 16  (tokens per image)
HEAD_DIM = EMBED_DIM // NHEAD    # 8

# --- row offsets inside the packed 32-column slab (W32) ---------------------
WE_OFF = 0                                     # (K_DIM, D)  patch-embed weight
POS_OFF = WE_OFF + K_DIM                       # (N_TOK, D)  pos emb (+ embed bias folded)
WO_OFF = POS_OFF + N_TOK                       # L x (D, D)  attention out-proj
W2_OFF = WO_OFF + NUM_LAYERS * EMBED_DIM       # L x (F, D)  FFN 2nd matmul
BV32_OFF = W2_OFF + NUM_LAYERS * FFN_DIM       # 6L x (1,D)  [bo,g1,be1,b2,g2,be2] per layer
W32_ROWS = BV32_OFF + 6 * NUM_LAYERS           # 396

# --- row offsets inside the packed 128-column slab (W128) -------------------
WQKV_OFF = 0                                   # L x (D,128)  fused QKV weight (96->128 pad)
W1_OFF = WQKV_OFF + NUM_LAYERS * EMBED_DIM     # L x (D, F)   FFN 1st matmul
WH_OFF = W1_OFF + NUM_LAYERS * EMBED_DIM       # (D, 128)     decoder 1x1 conv (class-padded)
BV128_OFF = WH_OFF + EMBED_DIM                 # rows: [bqkv_l]*L, [b1_l]*L, bh
W128_ROWS = BV128_OFF + 2 * NUM_LAYERS + 1     # 165


# ----------------------------- fused kernel --------------------------------
def setr_fused_kernel(tok_ref, w32_ref, w128_ref, o_ref):
    # tok_ref : (B, N_TOK, K_DIM)   w32_ref : (W32_ROWS, D)
    # w128_ref: (W128_ROWS, 128)    o_ref   : (B, N_TOK, HEAD_PAD)
    tok = tok_ref[...]
    B, N, K = tok.shape
    D, H, L, F, dh = EMBED_DIM, NHEAD, NUM_LAYERS, FFN_DIM, HEAD_DIM
    scale = 1.0 / (dh ** 0.5)

    def vec32(row):                      # one (1, D) bias / affine vector
        return w32_ref[BV32_OFF + row:BV32_OFF + row + 1, :]

    def vec128(row):                     # one (1, 128) bias vector
        return w128_ref[BV128_OFF + row:BV128_OFF + row + 1, :]

    def layernorm(y, g, b):
        # E[y^2] - mean^2: the two cross-lane reductions are independent
        mu = jnp.mean(y, axis=-1, keepdims=True)
        var = jnp.mean(y * y, axis=-1, keepdims=True) - mu * mu
        return (y - mu) * jax.lax.rsqrt(var + EPS) * g + b

    # ---- SETREmbedding: patch projection + positional embedding -----------
    we = w32_ref[WE_OFF:WE_OFF + K_DIM, :]             # (K, D)
    pos = w32_ref[POS_OFF:POS_OFF + N_TOK, :]          # (N, D) (embed bias folded in)
    f = jnp.dot(tok.reshape(B * N, K), we, preferred_element_type=jnp.float32)
    x = (f.reshape(B, N, D) + pos).reshape(B * N, D)   # (B*N, D)

    # ---- SETRTransformer: post-norm encoder layers -------------------------
    for l in range(L):
        # fused QKV projection: ONE (D, 128) matmul (cols 96:128 are zero pad)
        wqkv = w128_ref[WQKV_OFF + l * D:WQKV_OFF + (l + 1) * D, :]
        qkv = jnp.dot(x, wqkv, preferred_element_type=jnp.float32) + vec128(l)
        qkv = qkv.reshape(B, N, QKV_PAD)

        # all-head attention scores, issued back-to-back (no softmax in between)
        s_list = []
        for h in range(H):
            qh = qkv[:, :, h * dh:(h + 1) * dh]
            kh = qkv[:, :, D + h * dh:D + (h + 1) * dh]
            s_list.append(jnp.einsum('bne,bme->bnm', qh, kh,
                                     preferred_element_type=jnp.float32))
        s = jnp.concatenate(s_list, axis=1) * scale            # (B, H*N, N)

        # ONE vectorized softmax over every (head, query) row
        s = s - jnp.max(s, axis=-1, keepdims=True)
        prob = jnp.exp(s)
        prob = prob * pl.reciprocal(jnp.sum(prob, axis=-1, keepdims=True),
                                    approx=True)

        # all-head weighted sums, then a single (D, D) out-projection
        ctx_list = []
        for h in range(H):
            vh = qkv[:, :, 2 * D + h * dh:2 * D + (h + 1) * dh]
            ph = prob[:, h * N:(h + 1) * N, :]
            ctx_list.append(jnp.einsum('bnm,bme->bne', ph, vh,
                                       preferred_element_type=jnp.float32))
        ctx = jnp.concatenate(ctx_list, axis=-1).reshape(B * N, D)
        wo = w32_ref[WO_OFF + l * D:WO_OFF + (l + 1) * D, :]
        attn = jnp.dot(ctx, wo, preferred_element_type=jnp.float32) + vec32(6 * l)

        x = layernorm(x + attn, vec32(6 * l + 1), vec32(6 * l + 2))

        # FFN: (D,F) -> relu -> (F,D)
        w1 = w128_ref[W1_OFF + l * D:W1_OFF + (l + 1) * D, :]
        w2 = w32_ref[W2_OFF + l * F:W2_OFF + (l + 1) * F, :]
        hdn = jnp.maximum(
            jnp.dot(x, w1, preferred_element_type=jnp.float32) + vec128(L + l), 0.0)
        ffn = jnp.dot(hdn, w2, preferred_element_type=jnp.float32) + vec32(6 * l + 3)

        x = layernorm(x + ffn, vec32(6 * l + 4), vec32(6 * l + 5))

    # ---- SETRNaiveDecoder head (1x1 conv), lane-padded classes --------------
    wh = w128_ref[WH_OFF:WH_OFF + D, :]
    logits = jnp.dot(x, wh, preferred_element_type=jnp.float32) + vec128(2 * L)
    o_ref[...] = logits.reshape(B, N, HEAD_PAD)


# --------------------------- pallas wrapper --------------------------------
def _full_spec(shape):
    nd = len(shape)
    return pl.BlockSpec(shape, lambda i, _nd=nd: (0,) * _nd)


def setr_fused_call(tokens, w32, w128):
    B, N, _ = tokens.shape
    args = (tokens, w32, w128)
    # TODO(synk): on v7x split the grid over batch with "parallel" semantics once
    # B grows (second TensorCore); at B=2 per-core work is too small to pay off.
    return pl.pallas_call(
        setr_fused_kernel,
        out_shape=jax.ShapeDtypeStruct((B, N, HEAD_PAD), jnp.float32),
        grid=(1,),
        in_specs=[_full_spec(a.shape) for a in args],
        out_specs=_full_spec((B, N, HEAD_PAD)),
        compiler_params=pltpu.CompilerParams(dimension_semantics=("arbitrary",)),
    )(*args)


# ------------------------------ host-side glue ------------------------------
def extract_patches(img):
    # (B, C, H, W) -> (B, N, C*p*p)   (same ordering as Conv2d(stride=patch))
    B, C, H, W = img.shape
    h, w = H // PATCH, W // PATCH
    x = img.reshape(B, C, h, PATCH, w, PATCH)
    x = jnp.transpose(x, (0, 2, 4, 1, 3, 5))          # (B, h, w, C, p, p)
    return x.reshape(B, h * w, C * PATCH * PATCH)


def pack_params(p):
    """One-time host-side packing of every weight into two lane-aligned slabs."""
    D, L, F = EMBED_DIM, NUM_LAYERS, FFN_DIM

    # ---- 32-column slab: [we; pos+embed_b; wo_l; w2_l; (1,D) vectors] ----
    pos_fused = p["pos"] + p["embed_b"]               # fold embed bias into pos emb
    rows32 = [p["embed_w"], pos_fused]
    rows32 += [p["layers"][l]["wo"] for l in range(L)]
    rows32 += [p["layers"][l]["w2"] for l in range(L)]
    for l in range(L):
        lp = p["layers"][l]
        rows32 += [lp["bo"], lp["g1"], lp["be1"], lp["b2"], lp["g2"], lp["be2"]]
    w32 = jnp.concatenate(rows32, axis=0)
    assert w32.shape == (W32_ROWS, D), w32.shape

    # ---- 128-column slab: [wqkv_l (96->128); w1_l; wh (class-pad); biases] ----
    pad_qkv = QKV_PAD - 3 * D
    rows128 = [jnp.pad(p["layers"][l]["wqkv"], ((0, 0), (0, pad_qkv))) for l in range(L)]
    rows128 += [p["layers"][l]["w1"] for l in range(L)]
    rows128 += [jnp.pad(p["head_w"], ((0, 0), (0, HEAD_PAD - NUM_CLASSES)))]
    rows128 += [jnp.pad(p["layers"][l]["bqkv"], ((0, 0), (0, pad_qkv))) for l in range(L)]
    rows128 += [p["layers"][l]["b1"] for l in range(L)]
    rows128 += [jnp.pad(p["head_b"], ((0, 0), (0, HEAD_PAD - NUM_CLASSES)))]
    w128 = jnp.concatenate(rows128, axis=0)
    assert w128.shape == (W128_ROWS, QKV_PAD), w128.shape
    return w32, w128


def init_params(key):
    keys = iter(jax.random.split(key, 64))
    s = 0.02

    def rnd(shape):
        return (jax.random.normal(next(keys), shape) * s).astype(jnp.float32)

    p = {}
    p["embed_w"] = rnd((K_DIM, EMBED_DIM))
    p["embed_b"] = rnd((1, EMBED_DIM))
    p["pos"] = rnd((N_TOK, EMBED_DIM))
    p["layers"] = []
    for _ in range(NUM_LAYERS):
        lp = dict(
            wqkv=rnd((EMBED_DIM, 3 * EMBED_DIM)), bqkv=rnd((1, 3 * EMBED_DIM)),
            wo=rnd((EMBED_DIM, EMBED_DIM)), bo=rnd((1, EMBED_DIM)),
            g1=1.0 + rnd((1, EMBED_DIM)), be1=rnd((1, EMBED_DIM)),
            w1=rnd((EMBED_DIM, FFN_DIM)), b1=rnd((1, FFN_DIM)),
            w2=rnd((FFN_DIM, EMBED_DIM)), b2=rnd((1, EMBED_DIM)),
            g2=1.0 + rnd((1, EMBED_DIM)), be2=rnd((1, EMBED_DIM)),
        )
        p["layers"].append(lp)
    p["head_w"] = rnd((EMBED_DIM, NUM_CLASSES))
    p["head_b"] = rnd((1, NUM_CLASSES))
    return p


@jax.jit
def setr_forward(img, w32, w128):
    B = img.shape[0]
    hh = ww = IMG // PATCH
    tokens = extract_patches(img)                      # (B, N, C*p*p)
    out = setr_fused_call(tokens, w32, w128)           # (B, N, HEAD_PAD)
    logits = out[:, :, :NUM_CLASSES].reshape(B, hh, ww, NUM_CLASSES)
    logits = jnp.transpose(logits, (0, 3, 1, 2))       # NCHW
    # TODO(synk): bilinear upsample kept as XLA glue (no Pallas interpolation op);
    # semantics ~ align_corners=False, some mmseg SETR configs use True.
    return jax.image.resize(logits, (B, NUM_CLASSES, IMG, IMG), method="bilinear")


# ----------------------- pure-JAX reference (for self-check) ----------------
def setr_reference(img, p):
    B = img.shape[0]
    hh = ww = IMG // PATCH
    D, H, dh = EMBED_DIM, NHEAD, HEAD_DIM

    def ln(y, g, b):
        mu = y.mean(-1, keepdims=True)
        var = ((y - mu) ** 2).mean(-1, keepdims=True)
        return (y - mu) / jnp.sqrt(var + EPS) * g + b

    x = extract_patches(img) @ p["embed_w"] + p["embed_b"] + p["pos"][None]
    for lp in p["layers"]:
        qkv = x @ lp["wqkv"] + lp["bqkv"]
        q, k, v = qkv[..., :D], qkv[..., D:2 * D], qkv[..., 2 * D:]
        sp = lambda t: t.reshape(B, N_TOK, H, dh).transpose(0, 2, 1, 3)
        s = jnp.einsum('bhne,bhme->bhnm', sp(q), sp(k)) / (dh ** 0.5)
        a = jax.nn.softmax(s, axis=-1)
        ctx = jnp.einsum('bhnm,bhme->bhne', a, sp(v))
        ctx = ctx.transpose(0, 2, 1, 3).reshape(B, N_TOK, D)
        x = ln(x + ctx @ lp["wo"] + lp["bo"], lp["g1"], lp["be1"])
        ffn = jnp.maximum(x @ lp["w1"] + lp["b1"], 0.0) @ lp["w2"] + lp["b2"]
        x = ln(x + ffn, lp["g2"], lp["be2"])
    logits = (x @ p["head_w"] + p["head_b"]).reshape(B, hh, ww, NUM_CLASSES)
    logits = jnp.transpose(logits, (0, 3, 1, 2))
    return jax.image.resize(logits, (B, NUM_CLASSES, IMG, IMG), method="bilinear")


# ------------------------------ main ---------------------------------------
if __name__ == "__main__":
    key = jax.random.PRNGKey(0)
    k_param, k_input = jax.random.split(key)
    params = init_params(k_param)
    # weight packing hoisted out of the jitted forward: runs once at init time.
    w32, w128 = pack_params(params)
    img = jax.random.normal(k_input, (2, IN_CH, IMG, IMG), dtype=jnp.float32)

    out = setr_forward(img, w32, w128)
    jax.block_until_ready(out)
    assert out.shape == (2, NUM_CLASSES, IMG, IMG), out.shape

    ref = setr_reference(img, params)
    assert jnp.allclose(out, ref, atol=5e-2, rtol=5e-2), \
        float(jnp.max(jnp.abs(out - ref)))
    print("KERNEL_OK")
</pallas_src>

<mosaic_0001>
module attributes {stable_mosaic.version = 11 : i64} {
  func.func @setr_fused_kernel(%arg0: i32, %arg1: memref<2x16x48xf32, #tpu.memory_space<vmem>>, %arg2: memref<396x32xf32, #tpu.memory_space<vmem>>, %arg3: memref<165x128xf32, #tpu.memory_space<vmem>>, %arg4: memref<2x16x128xf32, #tpu.memory_space<vmem>>) attributes {dimension_semantics = [#tpu.dimension_semantics<arbitrary>], iteration_bounds = array<i64: 1>, scalar_prefetch = 0 : i64, scratch_operands = 0 : i64, tpu.core_type = #tpu.core_type<tc>, window_params = [{pipeline_mode = #tpu.pipeline_mode<synchronous>, transform_indices = @transform_0, window_bounds = array<i64: 2, 16, 48>}, {pipeline_mode = #tpu.pipeline_mode<synchronous>, transform_indices = @transform_1, window_bounds = array<i64: 396, 32>}, {pipeline_mode = #tpu.pipeline_mode<synchronous>, transform_indices = @transform_2, window_bounds = array<i64: 165, 128>}, {pipeline_mode = #tpu.pipeline_mode<synchronous>, transform_indices = @transform_3, window_bounds = array<i64: 2, 16, 128>}]} {
    %c0 = arith.constant 0 : index
    %c0_0 = arith.constant 0 : index
    %c0_1 = arith.constant 0 : index
    %0 = vector.load %arg1[%c0, %c0_0, %c0_1] : memref<2x16x48xf32, #tpu.memory_space<vmem>>, vector<2x16x48xf32>
    %c0_2 = arith.constant 0 : index
    %c0_3 = arith.constant 0 : index
    %1 = vector.load %arg2[%c0_2, %c0_3] : memref<396x32xf32, #tpu.memory_space<vmem>>, vector<48x32xf32>
    %c48 = arith.constant 48 : index
    %c0_4 = arith.constant 0 : index
    %2 = vector.load %arg2[%c48, %c0_4] : memref<396x32xf32, #tpu.memory_space<vmem>>, vector<16x32xf32>
    %3 = vector.shape_cast %0 : vector<2x16x48xf32> to vector<32x48xf32>
    %cst = arith.constant dense<0.000000e+00> : vector<32x32xf32>
    %4 = tpu.matmul %3, %1, %cst {dimension_numbers = #tpu.dot_dimension_numbers<[1], [0], [0], [1], [0, 0, 1, 1], [], []>} : vector<32x48xf32>, vector<48x32xf32>, vector<32x32xf32> -> vector<32x32xf32>
    %5 = vector.shape_cast %4 : vector<32x32xf32> to vector<2x16x32xf32>
    %6 = vector.shape_cast %2 : vector<16x32xf32> to vector<1x16x32xf32>
    %7 = vector.broadcast %6 : vector<1x16x32xf32> to vector<2x16x32xf32>
    %8 = arith.addf %5, %7 : vector<2x16x32xf32>
    %9 = vector.shape_cast %8 : vector<2x16x32xf32> to vector<32x32xf32>
    %c0_5 = arith.constant 0 : index
    %c0_6 = arith.constant 0 : index
    %10 = vector.load %arg3[%c0_5, %c0_6] : memref<165x128xf32, #tpu.memory_space<vmem>>, vector<32x128xf32>
    %cst_7 = arith.constant dense<0.000000e+00> : vector<32x128xf32>
    %11 = tpu.matmul %9, %10, %cst_7 {dimension_numbers = #tpu.dot_dimension_numbers<[1], [0], [0], [1], [0, 0, 1, 1], [], []>} : vector<32x32xf32>, vector<32x128xf32>, vector<32x128xf32> -> vector<32x128xf32>
    %c160 = arith.constant 160 : index
    %c0_8 = arith.constant 0 : index
    %12 = vector.load %arg3[%c160, %c0_8] : memref<165x128xf32, #tpu.memory_space<vmem>>, vector<1x128xf32>
    %13 = vector.broadcast %12 : vector<1x128xf32> to vector<32x128xf32>
    %14 = arith.addf %11, %13 : vector<32x128xf32>
    %15 = vector.shape_cast %14 : vector<32x128xf32> to vector<2x16x128xf32>
    %16 = vector.extract_strided_slice %15 {offsets = [0, 0, 0], sizes = [2, 16, 8], strides = [1, 1, 1]} : vector<2x16x128xf32> to vector<2x16x8xf32>
    %17 = vector.extract_strided_slice %15 {offsets = [0, 0, 32], sizes = [2, 16, 8], strides = [1, 1, 1]} : vector<2x16x128xf32> to vector<2x16x8xf32>
    "tpu.trace_start"() <{level = 10 : i32, message = "bne,bme->bnm"}> : () -> ()
    %cst_9 = arith.constant dense<0.000000e+00> : vector<2x16x16xf32>
    %18 = tpu.matmul %16, %17, %cst_9 {dimension_numbers = #tpu.dot_dimension_numbers<[2], [2], [1], [1], [0, 0, 0, 1, 1, 1], [0], [0]>} : vector<2x16x8xf32>, vector<2x16x8xf32>, vector<2x16x16xf32> -> vector<2x16x16xf32>
    "tpu.trace_stop"() : () -> ()
    %19 = vector.extract_strided_slice %15 {offsets = [0, 0, 8], sizes = [2, 16, 8], strides = [1, 1, 1]} : vector<2x16x128xf32> to vector<2x16x8xf32>
    %20 = vector.extract_strided_slice %15 {offsets = [0, 0, 40], sizes = [2, 16, 8], strides = [1, 1, 1]} : vector<2x16x128xf32> to vector<2x16x8xf32>
    "tpu.trace_start"() <{level = 10 : i32, message = "bne,bme->bnm"}> : () -> ()
    %cst_10 = arith.constant dense<0.000000e+00> : vector<2x16x16xf32>
    %21 = tpu.matmul %19, %20, %cst_10 {dimension_numbers = #tpu.dot_dimension_numbers<[2], [2], [1], [1], [0, 0, 0, 1, 1, 1], [0], [0]>} : vector<2x16x8xf32>, vector<2x16x8xf32>, vector<2x16x16xf32> -> vector<2x16x16xf32>
    "tpu.trace_stop"() : () -> ()
    %22 = vector.extract_strided_slice %15 {offsets = [0, 0, 16], sizes = [2, 16, 8], strides = [1, 1, 1]} : vector<2x16x128xf32> to vector<2x16x8xf32>
    %23 = vector.extract_strided_slice %15 {offsets = [0, 0, 48], sizes = [2, 16, 8], strides = [1, 1, 1]} : vector<2x16x128xf32> to vector<2x16x8xf32>
    "tpu.trace_start"() <{level = 10 : i32, message = "bne,bme->bnm"}> : () -> ()
    %cst_11 = arith.constant dense<0.000000e+00> : vector<2x16x16xf32>
    %24 = tpu.matmul %22, %23, %cst_11 {dimension_numbers = #tpu.dot_dimension_numbers<[2], [2], [1], [1], [0, 0, 0, 1, 1, 1], [0], [0]>} : vector<2x16x8xf32>, vector<2x16x8xf32>, vector<2x16x16xf32> -> vector<2x16x16xf32>
    "tpu.trace_stop"() : () -> ()
    %25 = vector.extract_strided_slice %15 {offsets = [0, 0, 24], sizes = [2, 16, 8], strides = [1, 1, 1]} : vector<2x16x128xf32> to vector<2x16x8xf32>
    %26 = vector.extract_strided_slice %15 {offsets = [0, 0, 56], sizes = [2, 16, 8], strides = [1, 1, 1]} : vector<2x16x128xf32> to vector<2x16x8xf32>
    "tpu.trace_start"() <{level = 10 : i32, message = "bne,bme->bnm"}> : () -> ()
    %cst_12 = arith.constant dense<0.000000e+00> : vector<2x16x16xf32>
    %27 = tpu.matmul %25, %26, %cst_12 {dimension_numbers = #tpu.dot_dimension_numbers<[2], [2], [1], [1], [0, 0, 0, 1, 1, 1], [0], [0]>} : vector<2x16x8xf32>, vector<2x16x8xf32>, vector<2x16x16xf32> -> vector<2x16x16xf32>
    "tpu.trace_stop"() : () -> ()
    %28 = tpu.concatenate %18, %21, %24, %27 in 1 : vector<2x16x16xf32>, vector<2x16x16xf32>, vector<2x16x16xf32>, vector<2x16x16xf32> -> vector<2x64x16xf32>
    %cst_13 = arith.constant 0.353553385 : f32
    %29 = vector.broadcast %cst_13 : f32 to vector<2x64x16xf32>
    %30 = arith.mulf %28, %29 : vector<2x64x16xf32>
    %cst_14 = arith.constant dense<0xFF800000> : vector<2x64xf32>
    %31 = vector.multi_reduction <maximumf>, %30, %cst_14 [2] : vector<2x64x16xf32> to vector<2x64xf32>
    %32 = vector.shape_cast %31 : vector<2x64xf32> to vector<2x64x1xf32>
    %33 = vector.broadcast %32 : vector<2x64x1xf32> to vector<2x64x16xf32>
    %34 = arith.subf %30, %33 : vector<2x64x16xf32>
    %35 = math.exp %34 : vector<2x64x16xf32>
    %cst_15 = arith.constant dense<0.000000e+00> : vector<2x64xf32>
    %36 = vector.multi_reduction <add>, %35, %cst_15 [2] : vector<2x64x16xf32> to vector<2x64xf32>
    %37 = vector.shape_cast %36 : vector<2x64xf32> to vector<2x64x1xf32>
    %38 = tpu.reciprocal %37 {approx = true} : vector<2x64x1xf32> -> vector<2x64x1xf32>
    %39 = vector.broadcast %38 : vector<2x64x1xf32> to vector<2x64x16xf32>
    %40 = arith.mulf %35, %39 : vector<2x64x16xf32>
    %41 = vector.extract_strided_slice %15 {offsets = [0, 0, 64], sizes = [2, 16, 8], strides = [1, 1, 1]} : vector<2x16x128xf32> to vector<2x16x8xf32>
    %42 = vector.extract_strided_slice %40 {offsets = [0, 0, 0], sizes = [2, 16, 16], strides = [1, 1, 1]} : vector<2x64x16xf32> to vector<2x16x16xf32>
    "tpu.trace_start"() <{level = 10 : i32, message = "bnm,bme->bne"}> : () -> ()
    %cst_16 = arith.constant dense<0.000000e+00> : vector<2x16x8xf32>
    %43 = tpu.matmul %42, %41, %cst_16 {dimension_numbers = #tpu.dot_dimension_numbers<[2], [1], [1], [2], [0, 0, 0, 1, 1, 2], [0], [0]>} : vector<2x16x16xf32>, vector<2x16x8xf32>, vector<2x16x8xf32> -> vector<2x16x8xf32>
    "tpu.trace_stop"() : () -> ()
    %44 = vector.extract_strided_slice %15 {offsets = [0, 0, 72], sizes = [2, 16, 8], strides = [1, 1, 1]} : vector<2x16x128xf32> to vector<2x16x8xf32>
    %45 = vector.extract_strided_slice %40 {offsets = [0, 16, 0], sizes = [2, 16, 16], strides = [1, 1, 1]} : vector<2x64x16xf32> to vector<2x16x16xf32>
    "tpu.trace_start"() <{level = 10 : i32, message = "bnm,bme->bne"}> : () -> ()
    %cst_17 = arith.constant dense<0.000000e+00> : vector<2x16x8xf32>
    %46 = tpu.matmul %45, %44, %cst_17 {dimension_numbers = #tpu.dot_dimension_numbers<[2], [1], [1], [2], [0, 0, 0, 1, 1, 2], [0], [0]>} : vector<2x16x16xf32>, vector<2x16x8xf32>, vector<2x16x8xf32> -> vector<2x16x8xf32>
    "tpu.trace_stop"() : () -> ()
    %47 = vector.extract_strided_slice %15 {offsets = [0, 0, 80], sizes = [2, 16, 8], strides = [1, 1, 1]} : vector<2x16x128xf32> to vector<2x16x8xf32>
    %48 = vector.extract_strided_slice %40 {offsets = [0, 32, 0], sizes = [2, 16, 16], strides = [1, 1, 1]} : vector<2x64x16xf32> to vector<2x16x16xf32>
    "tpu.trace_start"() <{level = 10 : i32, message = "bnm,bme->bne"}> : () -> ()
    %cst_18 = arith.constant dense<0.000000e+00> : vector<2x16x8xf32>
    %49 = tpu.matmul %48, %47, %cst_18 {dimension_numbers = #tpu.dot_dimension_numbers<[2], [1], [1], [2], [0, 0, 0, 1, 1, 2], [0], [0]>} : vector<2x16x16xf32>, vector<2x16x8xf32>, vector<2x16x8xf32> -> vector<2x16x8xf32>
    "tpu.trace_stop"() : () -> ()
    %50 = vector.extract_strided_slice %15 {offsets = [0, 0, 88], sizes = [2, 16, 8], strides = [1, 1, 1]} : vector<2x16x128xf32> to vector<2x16x8xf32>
    %51 = vector.extract_strided_slice %40 {offsets = [0, 48, 0], sizes = [2, 16, 16], strides = [1, 1, 1]} : vector<2x64x16xf32> to vector<2x16x16xf32>
    "tpu.trace_start"() <{level = 10 : i32, message = "bnm,bme->bne"}> : () -> ()
    %cst_19 = arith.constant dense<0.000000e+00> : vector<2x16x8xf32>
    %52 = tpu.matmul %51, %50, %cst_19 {dimension_numbers = #tpu.dot_dimension_numbers<[2], [1], [1], [2], [0, 0, 0, 1, 1, 2], [0], [0]>} : vector<2x16x16xf32>, vector<2x16x8xf32>, vector<2x16x8xf32> -> vector<2x16x8xf32>
    "tpu.trace_stop"() : () -> ()
    %53 = tpu.concatenate %43, %46, %49, %52 in 2 : vector<2x16x8xf32>, vector<2x16x8xf32>, vector<2x16x8xf32>, vector<2x16x8xf32> -> vector<2x16x32xf32>
    %54 = vector.shape_cast %53 : vector<2x16x32xf32> to vector<32x32xf32>
    %c64 = arith.constant 64 : index
    %c0_20 = arith.constant 0 : index
    %55 = vector.load %arg2[%c64, %c0_20] : memref<396x32xf32, #tpu.memory_space<vmem>>, vector<32x32xf32>
    %cst_21 = arith.constant dense<0.000000e+00> : vector<32x32xf32>
    %56 = tpu.matmul %54, %55, %cst_21 {dimension_numbers = #tpu.dot_dimension_numbers<[1], [0], [0], [1], [0, 0, 1, 1], [], []>} : vector<32x32xf32>, vector<32x32xf32>, vector<32x32xf32> -> vector<32x32xf32>
    %c384 = arith.constant 384 : index
    %c0_22 = arith.constant 0 : index
    %57 = vector.load %arg2[%c384, %c0_22] : memref<396x32xf32, #tpu.memory_space<vmem>>, vector<1x32xf32>
    %58 = vector.broadcast %57 : vector<1x32xf32> to vector<32x32xf32>
    %59 = arith.addf %56, %58 : vector<32x32xf32>
    %60 = arith.addf %9, %59 : vector<32x32xf32>
    %c385 = arith.constant 385 : index
    %c0_23 = arith.constant 0 : index
    %61 = vector.load %arg2[%c385, %c0_23] : memref<396x32xf32, #tpu.memory_space<vmem>>, vector<1x32xf32>
    %c386 = arith.constant 386 : index
    %c0_24 = arith.constant 0 : index
    %62 = vector.load %arg2[%c386, %c0_24] : memref<396x32xf32, #tpu.memory_space<vmem>>, vector<1x32xf32>
    %cst_25 = arith.constant dense<0.000000e+00> : vector<32xf32>
    %63 = vector.multi_reduction <add>, %60, %cst_25 [1] : vector<32x32xf32> to vector<32xf32>
    %64 = vector.shape_cast %63 : vector<32xf32> to vector<32x1xf32>
    %cst_26 = arith.constant 3.200000e+01 : f32
    %65 = vector.broadcast %cst_26 : f32 to vector<32x1xf32>
    %66 = arith.divf %64, %65 : vector<32x1xf32>
    %67 = arith.mulf %60, %60 : vector<32x32xf32>
    %cst_27 = arith.constant dense<0.000000e+00> : vector<32xf32>
    %68 = vector.multi_reduction <add>, %67, %cst_27 [1] : vector<32x32xf32> to vector<32xf32>
    %69 = vector.shape_cast %68 : vector<32xf32> to vector<32x1xf32>
    %cst_28 = arith.constant 3.200000e+01 : f32
    %70 = vector.broadcast %cst_28 : f32 to vector<32x1xf32>
    %71 = arith.divf %69, %70 : vector<32x1xf32>
    %72 = arith.mulf %66, %66 : vector<32x1xf32>
    %73 = arith.subf %71, %72 : vector<32x1xf32>
    %74 = vector.broadcast %66 : vector<32x1xf32> to vector<32x32xf32>
    %75 = arith.subf %60, %74 : vector<32x32xf32>
    %cst_29 = arith.constant 9.99999974E-6 : f32
    %76 = vector.broadcast %cst_29 : f32 to vector<32x1xf32>
    %77 = arith.addf %73, %76 : vector<32x1xf32>
    %78 = math.rsqrt %77 : vector<32x1xf32>
    %79 = vector.broadcast %78 : vector<32x1xf32> to vector<32x32xf32>
    %80 = arith.mulf %75, %79 : vector<32x32xf32>
    %81 = vector.broadcast %61 : vector<1x32xf32> to vector<32x32xf32>
    %82 = arith.mulf %80, %81 : vector<32x32xf32>
    %83 = vector.broadcast %62 : vector<1x32xf32> to vector<32x32xf32>
    %84 = arith.addf %82, %83 : vector<32x32xf32>
    %c64_30 = arith.constant 64 : index
    %c0_31 = arith.constant 0 : index
    %85 = vector.load %arg3[%c64_30, %c0_31] : memref<165x128xf32, #tpu.memory_space<vmem>>, vector<32x128xf32>
    %c128 = arith.constant 128 : index
    %c0_32 = arith.constant 0 : index
    %86 = vector.load %arg2[%c128, %c0_32] : memref<396x32xf32, #tpu.memory_space<vmem>>, vector<128x32xf32>
    %cst_33 = arith.constant dense<0.000000e+00> : vector<32x128xf32>
    %87 = tpu.matmul %84, %85, %cst_33 {dimension_numbers = #tpu.dot_dimension_numbers<[1], [0], [0], [1], [0, 0, 1, 1], [], []>} : vector<32x32xf32>, vector<32x128xf32>, vector<32x128xf32> -> vector<32x128xf32>
    %c162 = arith.constant 162 : index
    %c0_34 = arith.constant 0 : index
    %88 = vector.load %arg3[%c162, %c0_34] : memref<165x128xf32, #tpu.memory_space<vmem>>, vector<1x128xf32>
    %89 = vector.broadcast %88 : vector<1x128xf32> to vector<32x128xf32>
    %90 = arith.addf %87, %89 : vector<32x128xf32>
    %cst_35 = arith.constant 0.000000e+00 : f32
    %91 = vector.broadcast %cst_35 : f32 to vector<32x128xf32>
    %92 = arith.maximumf %90, %91 : vector<32x128xf32>
    %cst_36 = arith.constant dense<0.000000e+00> : vector<32x32xf32>
    %93 = tpu.matmul %92, %86, %cst_36 {dimension_numbers = #tpu.dot_dimension_numbers<[1], [0], [0], [1], [0, 0, 1, 1], [], []>} : vector<32x128xf32>, vector<128x32xf32>, vector<32x32xf32> -> vector<32x32xf32>
    %c387 = arith.constant 387 : index
    %c0_37 = arith.constant 0 : index
    %94 = vector.load %arg2[%c387, %c0_37] : memref<396x32xf32, #tpu.memory_space<vmem>>, vector<1x32xf32>
    %95 = vector.broadcast %94 : vector<1x32xf32> to vector<32x32xf32>
    %96 = arith.addf %93, %95 : vector<32x32xf32>
    %97 = arith.addf %84, %96 : vector<32x32xf32>
    %c388 = arith.constant 388 : index
    %c0_38 = arith.constant 0 : index
    %98 = vector.load %arg2[%c388, %c0_38] : memref<396x32xf32, #tpu.memory_space<vmem>>, vector<1x32xf32>
    %c389 = arith.constant 389 : index
    %c0_39 = arith.constant 0 : index
    %99 = vector.load %arg2[%c389, %c0_39] : memref<396x32xf32, #tpu.memory_space<vmem>>, vector<1x32xf32>
    %cst_40 = arith.constant dense<0.000000e+00> : vector<32xf32>
    %100 = vector.multi_reduction <add>, %97, %cst_40 [1] : vector<32x32xf32> to vector<32xf32>
    %101 = vector.shape_cast %100 : vector<32xf32> to vector<32x1xf32>
    %cst_41 = arith.constant 3.200000e+01 : f32
    %102 = vector.broadcast %cst_41 : f32 to vector<32x1xf32>
    %103 = arith.divf %101, %102 : vector<32x1xf32>
    %104 = arith.mulf %97, %97 : vector<32x32xf32>
    %cst_42 = arith.constant dense<0.000000e+00> : vector<32xf32>
    %105 = vector.multi_reduction <add>, %104, %cst_42 [1] : vector<32x32xf32> to vector<32xf32>
    %106 = vector.shape_cast %105 : vector<32xf32> to vector<32x1xf32>
    %cst_43 = arith.constant 3.200000e+01 : f32
    %107 = vector.broadcast %cst_43 : f32 to vector<32x1xf32>
    %108 = arith.divf %106, %107 : vector<32x1xf32>
    %109 = arith.mulf %103, %103 : vector<32x1xf32>
    %110 = arith.subf %108, %109 : vector<32x1xf32>
    %111 = vector.broadcast %103 : vector<32x1xf32> to vector<32x32xf32>
    %112 = arith.subf %97, %111 : vector<32x32xf32>
    %cst_44 = arith.constant 9.99999974E-6 : f32
    %113 = vector.broadcast %cst_44 : f32 to vector<32x1xf32>
    %114 = arith.addf %110, %113 : vector<32x1xf32>
    %115 = math.rsqrt %114 : vector<32x1xf32>
    %116 = vector.broadcast %115 : vector<32x1xf32> to vector<32x32xf32>
    %117 = arith.mulf %112, %116 : vector<32x32xf32>
    %118 = vector.broadcast %98 : vector<1x32xf32> to vector<32x32xf32>
    %119 = arith.mulf %117, %118 : vector<32x32xf32>
    %120 = vector.broadcast %99 : vector<1x32xf32> to vector<32x32xf32>
    %121 = arith.addf %119, %120 : vector<32x32xf32>
    %c32 = arith.constant 32 : index
    %c0_45 = arith.constant 0 : index
    %122 = vector.load %arg3[%c32, %c0_45] : memref<165x128xf32, #tpu.memory_space<vmem>>, vector<32x128xf32>
    %cst_46 = arith.constant dense<0.000000e+00> : vector<32x128xf32>
    %123 = tpu.matmul %121, %122, %cst_46 {dimension_numbers = #tpu.dot_dimension_numbers<[1], [0], [0], [1], [0, 0, 1, 1], [], []>} : vector<32x32xf32>, vector<32x128xf32>, vector<32x128xf32> -> vector<32x128xf32>
    %c161 = arith.constant 161 : index
    %c0_47 = arith.constant 0 : index
    %124 = vector.load %arg3[%c161, %c0_47] : memref<165x128xf32, #tpu.memory_space<vmem>>, vector<1x128xf32>
    %125 = vector.broadcast %124 : vector<1x128xf32> to vector<32x128xf32>
    %126 = arith.addf %123, %125 : vector<32x128xf32>
    %127 = vector.shape_cast %126 : vector<32x128xf32> to vector<2x16x128xf32>
    %128 = vector.extract_strided_slice %127 {offsets = [0, 0, 0], sizes = [2, 16, 8], strides = [1, 1, 1]} : vector<2x16x128xf32> to vector<2x16x8xf32>
    %129 = vector.extract_strided_slice %127 {offsets = [0, 0, 32], sizes = [2, 16, 8], strides = [1, 1, 1]} : vector<2x16x128xf32> to vector<2x16x8xf32>
    "tpu.trace_start"() <{level = 10 : i32, message = "bne,bme->bnm"}> : () -> ()
    %cst_48 = arith.constant dense<0.000000e+00> : vector<2x16x16xf32>
    %130 = tpu.matmul %128, %129, %cst_48 {dimension_numbers = #tpu.dot_dimension_numbers<[2], [2], [1], [1], [0, 0, 0, 1, 1, 1], [0], [0]>} : vector<2x16x8xf32>, vector<2x16x8xf32>, vector<2x16x16xf32> -> vector<2x16x16xf32>
    "tpu.trace_stop"() : () -> ()
    %131 = vector.extract_strided_slice %127 {offsets = [0, 0, 8], sizes = [2, 16, 8], strides = [1, 1, 1]} : vector<2x16x128xf32> to vector<2x16x8xf32>
    %132 = vector.extract_strided_slice %127 {offsets = [0, 0, 40], sizes = [2, 16, 8], strides = [1, 1, 1]} : vector<2x16x128xf32> to vector<2x16x8xf32>
    "tpu.trace_start"() <{level = 10 : i32, message = "bne,bme->bnm"}> : () -> ()
    %cst_49 = arith.constant dense<0.000000e+00> : vector<2x16x16xf32>
    %133 = tpu.matmul %131, %132, %cst_49 {dimension_numbers = #tpu.dot_dimension_numbers<[2], [2], [1], [1], [0, 0, 0, 1, 1, 1], [0], [0]>} : vector<2x16x8xf32>, vector<2x16x8xf32>, vector<2x16x16xf32> -> vector<2x16x16xf32>
    "tpu.trace_stop"() : () -> ()
    %134 = vector.extract_strided_slice %127 {offsets = [0, 0, 16], sizes = [2, 16, 8], strides = [1, 1, 1]} : vector<2x16x128xf32> to vector<2x16x8xf32>
    %135 = vector.extract_strided_slice %127 {offsets = [0, 0, 48], sizes = [2, 16, 8], strides = [1, 1, 1]} : vector<2x16x128xf32> to vector<2x16x8xf32>
    "tpu.trace_start"() <{level = 10 : i32, message = "bne,bme->bnm"}> : () -> ()
    %cst_50 = arith.constant dense<0.000000e+00> : vector<2x16x16xf32>
    %136 = tpu.matmul %134, %135, %cst_50 {dimension_numbers = #tpu.dot_dimension_numbers<[2], [2], [1], [1], [0, 0, 0, 1, 1, 1], [0], [0]>} : vector<2x16x8xf32>, vector<2x16x8xf32>, vector<2x16x16xf32> -> vector<2x16x16xf32>
    "tpu.trace_stop"() : () -> ()
    %137 = vector.extract_strided_slice %127 {offsets = [0, 0, 24], sizes = [2, 16, 8], strides = [1, 1, 1]} : vector<2x16x128xf32> to vector<2x16x8xf32>
    %138 = vector.extract_strided_slice %127 {offsets = [0, 0, 56], sizes = [2, 16, 8], strides = [1, 1, 1]} : vector<2x16x128xf32> to vector<2x16x8xf32>
    "tpu.trace_start"() <{level = 10 : i32, message = "bne,bme->bnm"}> : () -> ()
    %cst_51 = arith.constant dense<0.000000e+00> : vector<2x16x16xf32>
    %139 = tpu.matmul %137, %138, %cst_51 {dimension_numbers = #tpu.dot_dimension_numbers<[2], [2], [1], [1], [0, 0, 0, 1, 1, 1], [0], [0]>} : vector<2x16x8xf32>, vector<2x16x8xf32>, vector<2x16x16xf32> -> vector<2x16x16xf32>
    "tpu.trace_stop"() : () -> ()
    %140 = tpu.concatenate %130, %133, %136, %139 in 1 : vector<2x16x16xf32>, vector<2x16x16xf32>, vector<2x16x16xf32>, vector<2x16x16xf32> -> vector<2x64x16xf32>
    %cst_52 = arith.constant 0.353553385 : f32
    %141 = vector.broadcast %cst_52 : f32 to vector<2x64x16xf32>
    %142 = arith.mulf %140, %141 : vector<2x64x16xf32>
    %cst_53 = arith.constant dense<0xFF800000> : vector<2x64xf32>
    %143 = vector.multi_reduction <maximumf>, %142, %cst_53 [2] : vector<2x64x16xf32> to vector<2x64xf32>
    %144 = vector.shape_cast %143 : vector<2x64xf32> to vector<2x64x1xf32>
    %145 = vector.broadcast %144 : vector<2x64x1xf32> to vector<2x64x16xf32>
    %146 = arith.subf %142, %145 : vector<2x64x16xf32>
    %147 = math.exp %146 : vector<2x64x16xf32>
    %cst_54 = arith.constant dense<0.000000e+00> : vector<2x64xf32>
    %148 = vector.multi_reduction <add>, %147, %cst_54 [2] : vector<2x64x16xf32> to vector<2x64xf32>
    %149 = vector.shape_cast %148 : vector<2x64xf32> to vector<2x64x1xf32>
    %150 = tpu.reciprocal %149 {approx = true} : vector<2x64x1xf32> -> vector<2x64x1xf32>
    %151 = vector.broadcast %150 : vector<2x64x1xf32> to vector<2x64x16xf32>
    %152 = arith.mulf %147, %151 : vector<2x64x16xf32>
    %153 = vector.extract_strided_slice %127 {offsets = [0, 0, 64], sizes = [2, 16, 8], strides = [1, 1, 1]} : vector<2x16x128xf32> to vector<2x16x8xf32>
    %154 = vector.extract_strided_slice %152 {offsets = [0, 0, 0], sizes = [2, 16, 16], strides = [1, 1, 1]} : vector<2x64x16xf32> to vector<2x16x16xf32>
    "tpu.trace_start"() <{level = 10 : i32, message = "bnm,bme->bne"}> : () -> ()
    %cst_55 = arith.constant dense<0.000000e+00> : vector<2x16x8xf32>
    %155 = tpu.matmul %154, %153, %cst_55 {dimension_numbers = #tpu.dot_dimension_numbers<[2], [1], [1], [2], [0, 0, 0, 1, 1, 2], [0], [0]>} : vector<2x16x16xf32>, vector<2x16x8xf32>, vector<2x16x8xf32> -> vector<2x16x8xf32>
    "tpu.trace_stop"() : () -> ()
    %156 = vector.extract_strided_slice %127 {offsets = [0, 0, 72], sizes = [2, 16, 8], strides = [1, 1, 1]} : vector<2x16x128xf32> to vector<2x16x8xf32>
    %157 = vector.extract_strided_slice %152 {offsets = [0, 16, 0], sizes = [2, 16, 16], strides = [1, 1, 1]} : vector<2x64x16xf32> to vector<2x16x16xf32>
    "tpu.trace_start"() <{level = 10 : i32, message = "bnm,bme->bne"}> : () -> ()
    %cst_56 = arith.constant dense<0.000000e+00> : vector<2x16x8xf32>
    %158 = tpu.matmul %157, %156, %cst_56 {dimension_numbers = #tpu.dot_dimension_numbers<[2], [1], [1], [2], [0, 0, 0, 1, 1, 2], [0], [0]>} : vector<2x16x16xf32>, vector<2x16x8xf32>, vector<2x16x8xf32> -> vector<2x16x8xf32>
    "tpu.trace_stop"() : () -> ()
    %159 = vector.extract_strided_slice %127 {offsets = [0, 0, 80], sizes = [2, 16, 8], strides = [1, 1, 1]} : vector<2x16x128xf32> to vector<2x16x8xf32>
    %160 = vector.extract_strided_slice %152 {offsets = [0, 32, 0], sizes = [2, 16, 16], strides = [1, 1, 1]} : vector<2x64x16xf32> to vector<2x16x16xf32>
    "tpu.trace_start"() <{level = 10 : i32, message = "bnm,bme->bne"}> : () -> ()
    %cst_57 = arith.constant dense<0.000000e+00> : vector<2x16x8xf32>
    %161 = tpu.matmul %160, %159, %cst_57 {dimension_numbers = #tpu.dot_dimension_numbers<[2], [1], [1], [2], [0, 0, 0, 1, 1, 2], [0], [0]>} : vector<2x16x16xf32>, vector<2x16x8xf32>, vector<2x16x8xf32> -> vector<2x16x8xf32>
    "tpu.trace_stop"() : () -> ()
    %162 = vector.extract_strided_slice %127 {offsets = [0, 0, 88], sizes = [2, 16, 8], strides = [1, 1, 1]} : vector<2x16x128xf32> to vector<2x16x8xf32>
    %163 = vector.extract_strided_slice %152 {offsets = [0, 48, 0], sizes = [2, 16, 16], strides = [1, 1, 1]} : vector<2x64x16xf32> to vector<2x16x16xf32>
    "tpu.trace_start"() <{level = 10 : i32, message = "bnm,bme->bne"}> : () -> ()
    %cst_58 = arith.constant dense<0.000000e+00> : vector<2x16x8xf32>
    %164 = tpu.matmul %163, %162, %cst_58 {dimension_numbers = #tpu.dot_dimension_numbers<[2], [1], [1], [2], [0, 0, 0, 1, 1, 2], [0], [0]>} : vector<2x16x16xf32>, vector<2x16x8xf32>, vector<2x16x8xf32> -> vector<2x16x8xf32>
    "tpu.trace_stop"() : () -> ()
    %165 = tpu.concatenate %155, %158, %161, %164 in 2 : vector<2x16x8xf32>, vector<2x16x8xf32>, vector<2x16x8xf32>, vector<2x16x8xf32> -> vector<2x16x32xf32>
    %166 = vector.shape_cast %165 : vector<2x16x32xf32> to vector<32x32xf32>
    %c96 = arith.constant 96 : index
    %c0_59 = arith.constant 0 : index
    %167 = vector.load %arg2[%c96, %c0_59] : memref<396x32xf32, #tpu.memory_space<vmem>>, vector<32x32xf32>
    %cst_60 = arith.constant dense<0.000000e+00> : vector<32x32xf32>
    %168 = tpu.matmul %166, %167, %cst_60 {dimension_numbers = #tpu.dot_dimension_numbers<[1], [0], [0], [1], [0, 0, 1, 1], [], []>} : vector<32x32xf32>, vector<32x32xf32>, vector<32x32xf32> -> vector<32x32xf32>
    %c390 = arith.constant 390 : index
    %c0_61 = arith.constant 0 : index
    %169 = vector.load %arg2[%c390, %c0_61] : memref<396x32xf32, #tpu.memory_space<vmem>>, vector<1x32xf32>
    %170 = vector.broadcast %169 : vector<1x32xf32> to vector<32x32xf32>
    %171 = arith.addf %168, %170 : vector<32x32xf32>
    %172 = arith.addf %121, %171 : vector<32x32xf32>
    %c391 = arith.constant 391 : index
    %c0_62 = arith.constant 0 : index
    %173 = vector.load %arg2[%c391, %c0_62] : memref<396x32xf32, #tpu.memory_space<vmem>>, vector<1x32xf32>
    %c392 = arith.constant 392 : index
    %c0_63 = arith.constant 0 : index
    %174 = vector.load %arg2[%c392, %c0_63] : memref<396x32xf32, #tpu.memory_space<vmem>>, vector<1x32xf32>
    %cst_64 = arith.constant dense<0.000000e+00> : vector<32xf32>
    %175 = vector.multi_reduction <add>, %172, %cst_64 [1] : vector<32x32xf32> to vector<32xf32>
    %176 = vector.shape_cast %175 : vector<32xf32> to vector<32x1xf32>
    %cst_65 = arith.constant 3.200000e+01 : f32
    %177 = vector.broadcast %cst_65 : f32 to vector<32x1xf32>
    %178 = arith.divf %176, %177 : vector<32x1xf32>
    %179 = arith.mulf %172, %172 : vector<32x32xf32>
    %cst_66 = arith.constant dense<0.000000e+00> : vector<32xf32>
    %180 = vector.multi_reduction <add>, %179, %cst_66 [1] : vector<32x32xf32> to vector<32xf32>
    %181 = vector.shape_cast %180 : vector<32xf32> to vector<32x1xf32>
    %cst_67 = arith.constant 3.200000e+01 : f32
    %182 = vector.broadcast %cst_67 : f32 to vector<32x1xf32>
    %183 = arith.divf %181, %182 : vector<32x1xf32>
    %184 = arith.mulf %178, %178 : vector<32x1xf32>
    %185 = arith.subf %183, %184 : vector<32x1xf32>
    %186 = vector.broadcast %178 : vector<32x1xf32> to vector<32x32xf32>
    %187 = arith.subf %172, %186 : vector<32x32xf32>
    %cst_68 = arith.constant 9.99999974E-6 : f32
    %188 = vector.broadcast %cst_68 : f32 to vector<32x1xf32>
    %189 = arith.addf %185, %188 : vector<32x1xf32>
    %190 = math.rsqrt %189 : vector<32x1xf32>
    %191 = vector.broadcast %190 : vector<32x1xf32> to vector<32x32xf32>
    %192 = arith.mulf %187, %191 : vector<32x32xf32>
    %193 = vector.broadcast %173 : vector<1x32xf32> to vector<32x32xf32>
    %194 = arith.mulf %192, %193 : vector<32x32xf32>
    %195 = vector.broadcast %174 : vector<1x32xf32> to vector<32x32xf32>
    %196 = arith.addf %194, %195 : vector<32x32xf32>
    %c96_69 = arith.constant 96 : index
    %c0_70 = arith.constant 0 : index
    %197 = vector.load %arg3[%c96_69, %c0_70] : memref<165x128xf32, #tpu.memory_space<vmem>>, vector<32x128xf32>
    %c256 = arith.constant 256 : index
    %c0_71 = arith.constant 0 : index
    %198 = vector.load %arg2[%c256, %c0_71] : memref<396x32xf32, #tpu.memory_space<vmem>>, vector<128x32xf32>
    %cst_72 = arith.constant dense<0.000000e+00> : vector<32x128xf32>
    %199 = tpu.matmul %196, %197, %cst_72 {dimension_numbers = #tpu.dot_dimension_numbers<[1], [0], [0], [1], [0, 0, 1, 1], [], []>} : vector<32x32xf32>, vector<32x128xf32>, vector<32x128xf32> -> vector<32x128xf32>
    %c163 = arith.constant 163 : index
    %c0_73 = arith.constant 0 : index
    %200 = vector.load %arg3[%c163, %c0_73] : memref<165x128xf32, #tpu.memory_space<vmem>>, vector<1x128xf32>
    %201 = vector.broadcast %200 : vector<1x128xf32> to vector<32x128xf32>
    %202 = arith.addf %199, %201 : vector<32x128xf32>
    %cst_74 = arith.constant 0.000000e+00 : f32
    %203 = vector.broadcast %cst_74 : f32 to vector<32x128xf32>
    %204 = arith.maximumf %202, %203 : vector<32x128xf32>
    %cst_75 = arith.constant dense<0.000000e+00> : vector<32x32xf32>
    %205 = tpu.matmul %204, %198, %cst_75 {dimension_numbers = #tpu.dot_dimension_numbers<[1], [0], [0], [1], [0, 0, 1, 1], [], []>} : vector<32x128xf32>, vector<128x32xf32>, vector<32x32xf32> -> vector<32x32xf32>
    %c393 = arith.constant 393 : index
    %c0_76 = arith.constant 0 : index
    %206 = vector.load %arg2[%c393, %c0_76] : memref<396x32xf32, #tpu.memory_space<vmem>>, vector<1x32xf32>
    %207 = vector.broadcast %206 : vector<1x32xf32> to vector<32x32xf32>
    %208 = arith.addf %205, %207 : vector<32x32xf32>
    %209 = arith.addf %196, %208 : vector<32x32xf32>
    %c394 = arith.constant 394 : index
    %c0_77 = arith.constant 0 : index
    %210 = vector.load %arg2[%c394, %c0_77] : memref<396x32xf32, #tpu.memory_space<vmem>>, vector<1x32xf32>
    %c395 = arith.constant 395 : index
    %c0_78 = arith.constant 0 : index
    %211 = vector.load %arg2[%c395, %c0_78] : memref<396x32xf32, #tpu.memory_space<vmem>>, vector<1x32xf32>
    %cst_79 = arith.constant dense<0.000000e+00> : vector<32xf32>
    %212 = vector.multi_reduction <add>, %209, %cst_79 [1] : vector<32x32xf32> to vector<32xf32>
    %213 = vector.shape_cast %212 : vector<32xf32> to vector<32x1xf32>
    %cst_80 = arith.constant 3.200000e+01 : f32
    %214 = vector.broadcast %cst_80 : f32 to vector<32x1xf32>
    %215 = arith.divf %213, %214 : vector<32x1xf32>
    %216 = arith.mulf %209, %209 : vector<32x32xf32>
    %cst_81 = arith.constant dense<0.000000e+00> : vector<32xf32>
    %217 = vector.multi_reduction <add>, %216, %cst_81 [1] : vector<32x32xf32> to vector<32xf32>
    %218 = vector.shape_cast %217 : vector<32xf32> to vector<32x1xf32>
    %cst_82 = arith.constant 3.200000e+01 : f32
    %219 = vector.broadcast %cst_82 : f32 to vector<32x1xf32>
    %220 = arith.divf %218, %219 : vector<32x1xf32>
    %221 = arith.mulf %215, %215 : vector<32x1xf32>
    %222 = arith.subf %220, %221 : vector<32x1xf32>
    %223 = vector.broadcast %215 : vector<32x1xf32> to vector<32x32xf32>
    %224 = arith.subf %209, %223 : vector<32x32xf32>
    %cst_83 = arith.constant 9.99999974E-6 : f32
    %225 = vector.broadcast %cst_83 : f32 to vector<32x1xf32>
    %226 = arith.addf %222, %225 : vector<32x1xf32>
    %227 = math.rsqrt %226 : vector<32x1xf32>
    %228 = vector.broadcast %227 : vector<32x1xf32> to vector<32x32xf32>
    %229 = arith.mulf %224, %228 : vector<32x32xf32>
    %230 = vector.broadcast %210 : vector<1x32xf32> to vector<32x32xf32>
    %231 = arith.mulf %229, %230 : vector<32x32xf32>
    %232 = vector.broadcast %211 : vector<1x32xf32> to vector<32x32xf32>
    %233 = arith.addf %231, %232 : vector<32x32xf32>
    %c128_84 = arith.constant 128 : index
    %c0_85 = arith.constant 0 : index
    %234 = vector.load %arg3[%c128_84, %c0_85] : memref<165x128xf32, #tpu.memory_space<vmem>>, vector<32x128xf32>
    %cst_86 = arith.constant dense<0.000000e+00> : vector<32x128xf32>
    %235 = tpu.matmul %233, %234, %cst_86 {dimension_numbers = #tpu.dot_dimension_numbers<[1], [0], [0], [1], [0, 0, 1, 1], [], []>} : vector<32x32xf32>, vector<32x128xf32>, vector<32x128xf32> -> vector<32x128xf32>
    %c164 = arith.constant 164 : index
    %c0_87 = arith.constant 0 : index
    %236 = vector.load %arg3[%c164, %c0_87] : memref<165x128xf32, #tpu.memory_space<vmem>>, vector<1x128xf32>
    %237 = vector.broadcast %236 : vector<1x128xf32> to vector<32x128xf32>
    %238 = arith.addf %235, %237 : vector<32x128xf32>
    %239 = vector.shape_cast %238 : vector<32x128xf32> to vector<2x16x128xf32>
    %c0_88 = arith.constant 0 : index
    %c0_89 = arith.constant 0 : index
    %c0_90 = arith.constant 0 : index
    %240 = vector.load %arg4[%c0_88, %c0_89, %c0_90] : memref<2x16x128xf32, #tpu.memory_space<vmem>>, vector<2x16x128xf32>
    tpu.vector_store %arg4[%c0_88, %c0_89, %c0_90], %239 {strides = array<i32>} : memref<2x16x128xf32, #tpu.memory_space<vmem>>, vector<2x16x128xf32>,
    return
  }
  func.func @transform_0(%arg0: i32) -> (i32, i32, i32) {
    %c0_i32 = arith.constant 0 : i32
    %c0_i32_0 = arith.constant 0 : i32
    %c0_i32_1 = arith.constant 0 : i32
    %c0_i32_2 = arith.constant 0 : i32
    return %c0_i32, %c0_i32_0, %c0_i32_1 : i32, i32, i32
  }
  func.func @transform_1(%arg0: i32) -> (i32, i32) {
    %c0_i32 = arith.constant 0 : i32
    %c0_i32_0 = arith.constant 0 : i32
    %c0_i32_1 = arith.constant 0 : i32
    return %c0_i32, %c0_i32_0 : i32, i32
  }
  func.func @transform_2(%arg0: i32) -> (i32, i32) {
    %c0_i32 = arith.constant 0 : i32
    %c0_i32_0 = arith.constant 0 : i32
    %c0_i32_1 = arith.constant 0 : i32
    return %c0_i32, %c0_i32_0 : i32, i32
  }
  func.func @transform_3(%arg0: i32) -> (i32, i32, i32) {
    %c0_i32 = arith.constant 0 : i32
    %c0_i32_0 = arith.constant 0 : i32
    %c0_i32_1 = arith.constant 0 : i32
    %c0_i32_2 = arith.constant 0 : i32
    return %c0_i32, %c0_i32_0, %c0_i32_1 : i32, i32, i32
  }
}

</mosaic_0001>

<bundles_post_ra>
// kernel: setr_forward.1
= control target key start
LH: loop header
LB: loop body
LE: loop exit
PB: predicated region body
PF: predicated region fallthrough
CT: control target
= control target key end

     0   :  { %vm26_vm0 = vcmask 392192   ;;  %vm78_vm1 = vcmask 261120   ;;  %s3060_s18 = smov 96   ;;  %s3061_s19 = smov 88   ;;  %vm126_vm2 = vcmask 64512   ;;  %vm445_vm3 = vcmask 130048   ;;  %s4266_s1 = inlined_call_operand.vmem [shape: f32[396,32], index: 1, kind: input, shape index: {}]   ;;  %s4267_s2 = inlined_call_operand.vmem [shape: f32[165,128], index: 2, kind: input, shape index: {}]   ;;  %s4268_s0 = inlined_call_operand.vmem [shape: f32[2,16,48], index: 0, kind: input, shape index: {}]   ;;  %s4269_s3 = inlined_call_operand.vmem [shape: f32[2,16,128], index: 3, kind: output, shape index: {}]  }
   0x1   :  { %v23_v0 = vld [vmem:[%s4266_s1 + $0x28] sm:$0xff]  ;;  %v22_v1 = vld [vmem:[%s4266_s1 + $0x20] sm:$0xff]  ;;  %v21_v2 = vld [vmem:[%s4266_s1 + $0x18] sm:$0xff]  ;;  %s3062_s20 = smov 120   ;;  %s3063_s21 = smov 80   ;;  %vm958_vm4 = vcmask 195584  }
   0x2   :  { %49 = vmatpush.msra.mxu0 %v23_v0  ;;  %2778 = vmatpush.msra.mxu2 %v23_v0  ;;  %v20_v3 = vld [vmem:[%s4266_s1 + $0x10] sm:$0xff]  ;;  %v75_v4 = vld [vmem:[%s4267_s2 + $0x18] sm:$0xff]  ;;  %v19_v6 = vld [vmem:[%s4266_s1 + $0x8] sm:$0xff]  ;;  %s3064_s22 = smov 72   ;;  %s3065_s23 = smov 112  }
   0x3   :  { %v74_v5 = vld [vmem:[%s4267_s2 + $0x10] sm:$0xff]  ;;  %103 = vmatpush.msra.mxu1 %v75_v4  ;;  %v18_v7 = vld [vmem:[%s4266_s1] sm:$0xff]  ;;  %v17_v9 = vld [vmem:[%s4268_s0 + $0x18] sm:$0xff]  ;;  %s3066_s24 = smov 104   ;;  %s3067_s25 = smov 64  }
   0x4   :  { %50 = vmatpush.msra.mxu0 %v22_v1  ;;  %2779 = vmatpush.msra.mxu2 %v22_v1  ;;  %v14_v8 = vld [vmem:[%s4268_s0] sm:$0xff]  ;;  %v15_v10 = vld [vmem:[%s4268_s0 + $0x8] sm:$0xff]  ;;  %v16_v11 = vld [vmem:[%s4268_s0 + $0x10] sm:$0xff]  ;;  %s3068_s26 = smov 56   ;;  %s3069_s27 = smov 40  }
   0x5   :  { %104 = vmatpush.msra.mxu1 %v74_v5  ;;  %v73_v12 = vld [vmem:[%s4267_s2 + $0x8] sm:$0xff]  ;;  %v72_v13 = vld [vmem:[%s4267_s2] sm:$0xff]  ;;  %v24_v14 = vld [vmem:[%s4266_s1 + $0x30] sm:$0xff]  ;;  %s3070_s28 = smov 48   ;;  %s3071_s29 = smov 16  }
   0x6   :  { %51 = vmatpush.msra.mxu0 %v21_v2  ;;  %2780 = vmatpush.msra.mxu2 %v21_v2  ;;  %v25_v17 = vld [vmem:[%s4266_s1 + $0x38] sm:$0xff]  ;;  %v2881_v25 = vld [vmem:[%s4267_s2 + $0xa0] ss:$0 sm:$0xff]  ;;  %s3072_s30 = smov 8   ;;  %s3073_s4 = smov 24  }
   0x7   :  { %105 = vmatpush.msra.mxu1 %v73_v12 }
   0x8   :  { %52 = vmatpush.msra.mxu0 %v20_v3  ;;  %2781 = vmatpush.msra.mxu2 %v20_v3 }
   0x9   :  { %106 = vmatpush.msra.mxu1 %v72_v13 }
   0xa   :  { %53 = vmatpush.msra.mxu0 %v19_v6  ;;  %2782 = vmatpush.msra.mxu2 %v19_v6 }
   0xc   :  { %54 = vmatpush.msra.mxu0 %v18_v7  ;;  %2783 = vmatpush.msra.mxu2 %v18_v7 }
   0xd   :  { %2650 = vmatmul.msk.f32.vlgmr.msra.gmra.mxu0 %vm26_vm0, %v14_v8  ;;  %2653 = vmatmul.msk.f32.vlgmr.msra.gmra.mxu2 %vm26_vm0, %v17_v9 }
  0x15   :  { %2651 = vmatmul.msk.f32.gmra.mxu0 %vm26_vm0, %v15_v10 }
  0x1d   :  { %2652 = vmatmul.msk.f32.gmra.mxu0 %vm26_vm0, %v16_v11 }
  0x8a   :  { %v56_v15 = vpop.f32.mrf.mxu0 }
  0x8b   :  { %v3144_v16 = vadd.f32 %v56_v15, %v24_v14 }
  0x8d   :  { %2654 = vmatmul.msk.f32.vlgmr.msra.gmra.mxu1 %vm78_vm1, %v3144_v16 }
  0x90   :  { %v65_v22 = vpop.f32.mrf.mxu2 }
  0x91   :  { %v3159_v23 = vadd.f32 %v65_v22, %v25_v17 }
  0x92   :  { %v59_v18 = vpop.f32.mrf.mxu0 }
  0x93   :  { %v3151_v19 = vadd.f32 %v59_v18, %v25_v17 }
  0x95   :  { %2655 = vmatmul.msk.f32.gmra.mxu1 %vm78_vm1, %v3151_v19 }
  0x9a   :  { %v62_v20 = vpop.f32.mrf.mxu0 }
  0x9b   :  { %v3155_v21 = vadd.f32 %v62_v20, %v24_v14 }
  0x9d   :  { %2656 = vmatmul.msk.f32.gmra.mxu1 %vm78_vm1, %v3155_v21 }
  0xa5   :  { %2657 = vmatmul.msk.f32.gmra.mxu1 %vm78_vm1, %v3159_v23 }
 0x10a   :  { %v108_v24 = vpop.f32.mrf.mxu1 }
 0x10b   :  { %v109_v29 = vadd.f32 %v2881_v25, %v108_v24 }
 0x112   :  { %v111_v26 = vpop.f32.mrf.mxu1 }
 0x113   :  { %v3166_v27 = vadd.f32 %v2881_v25, %v111_v26 }
 0x115   :  { %124 = vrot.lane.b32.xlu1 %v3166_v27, %s3060_s18  ;;  %v3224_v34 = vpack.i.bf16 %v109_v29, %v3166_v27 }
 0x11a   :  { %v114_v28 = vpop.f32.mrf.mxu1 }
 0x11b   :  { %v3170_v30 = vadd.f32 %v2881_v25, %v114_v28 }
 0x11d   :  { %122 = vrot.lane.b32.xlu1 %v109_v29, %s3060_s18  ;;  %238 = vrot.lane.b32.xlu2 %v3170_v30, %s3061_s19 }
 0x122   :  { %v117_v31 = vpop.f32.mrf.mxu1 }
 0x123   :  { %v3175_v32 = vadd.f32 %v2881_v25, %v117_v31 }
 0x125   :  { %201 = vrot.lane.b32.xlu1 %v3166_v27, %s3061_s19  ;;  %162 = vrot.lane.b32.xlu0 %v3175_v32, %s3060_s18  ;;  %v3215_v33 = vpack.i.bf16 %v3170_v30, %v3175_v32 }
 0x126   :  { %240 = vrot.lane.b32.xlu2 %v3175_v32, %s3061_s19 }
 0x12d   :  { %236 = vrot.lane.b32.xlu1 %v3175_v32, %s3062_s20  ;;  %160 = vrot.lane.b32.xlu0 %v3170_v30, %s3060_s18 }
 0x12e   :  { %199 = vrot.lane.b32.xlu2 %v109_v29, %s3061_s19 }
 0x135   :  { %197 = vrot.lane.b32.xlu1 %v3166_v27, %s3062_s20  ;;  %234 = vrot.lane.b32.xlu0 %v3170_v30, %s3062_s20 }
 0x136   :  { %279 = vrot.lane.b32.xlu2 %v3166_v27, %s3063_s21 }
 0x13d   :  { %355 = vrot.lane.b32.xlu1 %v109_v29, %s3064_s22  ;;  %195 = vrot.lane.b32.xlu0 %v109_v29, %s3062_s20 }
 0x13e   :  { %275 = vrot.lane.b32.xlu2 %v3166_v27, %s3065_s23 }
 0x145   :  { %353 = vrot.lane.b32.xlu1 %v3166_v27, %s3066_s24  ;;  %277 = vrot.lane.b32.xlu0 %v109_v29, %s3063_s21 }
 0x146   :  { %351 = vrot.lane.b32.xlu2 %v109_v29, %s3066_s24 }
 0x14d   :  { %312 = vrot.lane.b32.xlu1 %v3170_v30, %s3065_s23  ;;  %357 = vrot.lane.b32.xlu0 %v3166_v27, %s3064_s22 }
 0x14e   :  { %273 = vrot.lane.b32.xlu2 %v109_v29, %s3065_s23 }
 0x155   :  { %394 = vrot.lane.b32.xlu1 %v3170_v30, %s3064_s22  ;;  %318 = vrot.lane.b32.xlu0 %v3175_v32, %s3063_s21 }
 0x156   :  { %396 = vrot.lane.b32.xlu2 %v3175_v32, %s3064_s22 }
 0x15d   :  { %2817 = vrot.lane.b32.xlu1 %v3215_v33, %s3067_s25  ;;  %316 = vrot.lane.b32.xlu0 %v3170_v30, %s3063_s21 }
 0x15e   :  { %390 = vrot.lane.b32.xlu2 %v3170_v30, %s3066_s24 }
 0x165   :  { %314 = vrot.lane.b32.xlu0 %v3175_v32, %s3065_s23 }
 0x166   :  { %2807 = vrot.lane.b32.xlu2 %v3224_v34, %s3067_s25 }
 0x16d   :  { %392 = vrot.lane.b32.xlu0 %v3175_v32, %s3066_s24 }
 0x175   :  { %2802 = vrot.lane.b32.xlu0 %v3224_v34, %s3068_s26 }
 0x177   :  { %v239_v35 = vpop.permute.xlu2 %238 }
 0x17d   :  { %2812 = vrot.lane.b32.xlu0 %v3224_v34, %s3069_s27 }
 0x180   :  { %v241_v36 = vpop.permute.xlu2 %240 }
 0x187   :  { %v125_v37 = vpop.permute.xlu1 %124 }
 0x188   :  { %v200_v38 = vpop.permute.xlu2 %199  ;;  %2658 = vmatpush.xpose.msk.msrb.mxu2 %vm126_vm2, %v125_v37 }
 0x18f   :  { %v123_v39 = vpop.permute.xlu1 %122 }
 0x190   :  { %v280_v40 = vpop.permute.xlu2 %279  ;;  %2659 = vmatpush.xpose.msk.msrb.mxu2 %vm126_vm2, %v123_v39 }
 0x191   :  { %2674 = vmatpush.xpose.msk.msrb.mxu1 %vm126_vm2, %v280_v40 }
 0x193   :  { %2660 = vmatmul.msk.f32.vlgmr.msrb.gmra.mxu2 %vm126_vm2, %v109_v29 }
 0x197   :  { %v202_v41 = vpop.permute.xlu1 %201  ;;  %v163_v42 = vpop.permute.xlu0 %162 }
 0x198   :  { %v276_v43 = vpop.permute.xlu2 %275  ;;  %2662 = vmatpush.xpose.msk.msra.mxu3 %vm126_vm2, %v163_v42  ;;  %2666 = vmatpush.xpose.msk.msra.mxu2 %vm126_vm2, %v202_v41 }
 0x19b   :  { %2661 = vmatmul.msk.f32.gmra.mxu2 %vm126_vm2, %v3166_v27 }
 0x19c   :  { %2667 = vmatpush.xpose.msk.msra.mxu2 %vm126_vm2, %v200_v38 }
 0x19f   :  { %v237_v44 = vpop.permute.xlu1 %236  ;;  %v161_v45 = vpop.permute.xlu0 %160 }
 0x1a0   :  { %v352_v46 = vpop.permute.xlu2 %351  ;;  %2663 = vmatpush.xpose.msk.msra.mxu3 %vm126_vm2, %v161_v45 }
 0x1a3   :  { %2664 = vmatmul.msk.f32.vlgmr.msra.gmra.mxu3 %vm126_vm2, %v3170_v30 }
 0x1a4   :  { %2670 = vmatpush.xpose.msk.msrb.mxu3 %vm126_vm2, %v241_v36 }
 0x1a7   :  { %v198_v47 = vpop.permute.xlu1 %197  ;;  %v235_v48 = vpop.permute.xlu0 %234 }
 0x1a8   :  { %2671 = vmatpush.xpose.msk.msrb.mxu3 %vm126_vm2, %v239_v35  ;;  %v274_v49 = vpop.permute.xlu2 %273 }
 0x1ab   :  { %2665 = vmatmul.msk.f32.gmra.mxu3 %vm126_vm2, %v3175_v32 }
 0x1ac   :  { %2784 = vmatpush.xpose.msk.msra.mxu3 %vm126_vm2, %v280_v40 }
 0x1af   :  { %v356_v50 = vpop.permute.xlu1 %355  ;;  %v196_v51 = vpop.permute.xlu0 %195 }
 0x1b0   :  { %v397_v52 = vpop.permute.xlu2 %396  ;;  %2668 = vmatmul.msk.f32.vlgmr.msra.gmra.mxu2 %vm126_vm2, %v196_v51 }
 0x1b1   :  { %2686 = vmatpush.xpose.msk.msrb.mxu0 %vm126_vm2, %v397_v52 }
 0x1b3   :  { %2672 = vmatmul.msk.f32.vlgmr.msrb.gmra.mxu3 %vm126_vm2, %v235_v48 }
 0x1b7   :  { %v354_v53 = vpop.permute.xlu1 %353  ;;  %v278_v54 = vpop.permute.xlu0 %277 }
 0x1b8   :  { %v391_v55 = vpop.permute.xlu2 %390  ;;  %2669 = vmatmul.msk.f32.gmra.mxu2 %vm126_vm2, %v198_v47  ;;  %2675 = vmatpush.xpose.msk.msrb.mxu1 %vm126_vm2, %v278_v54 }
 0x1b9   :  { %2785 = vmatpush.xpose.msk.msra.mxu3 %vm126_vm2, %v278_v54 }
 0x1bb   :  { %2673 = vmatmul.msk.f32.gmra.mxu3 %vm126_vm2, %v237_v44  ;;  %2676 = vmatmul.msk.f32.vlgmr.msrb.gmra.mxu1 %vm126_vm2, %v274_v49 }
 0x1bf   :  { %v313_v56 = vpop.permute.xlu1 %312  ;;  %v358_v57 = vpop.permute.xlu0 %357 }
 0x1c0   :  { %v2808_v58 = vpop.permute.xlu2 %2807  ;;  %2682 = vmatpush.xpose.msk.msrb.mxu3 %vm126_vm2, %v358_v57 }
 0x1c1   :  { %v2809_v59 = vunpack.i.l.bf16 %v2808_v58  ;;  %v2810_v60 = vunpack.i.h.bf16 %v2808_v58 }
 0x1c3   :  { %648 = vmatpush.msra.mxu1 %v2809_v59  ;;  %2677 = vmatmul.msk.f32.vlgmr.msra.gmra.mxu3 %vm126_vm2, %v276_v43 }
 0x1c4   :  { %2683 = vmatpush.xpose.msk.msrb.mxu3 %vm126_vm2, %v356_v50 }
 0x1c5   :  { %649 = vmatpush.msra.mxu1 %v2810_v60 }
 0x1c7   :  { %v395_v61 = vpop.permute.xlu1 %394  ;;  %v319_v62 = vpop.permute.xlu0 %318 }
 0x1c8   :  { %2678 = vmatpush.xpose.msk.msrb.mxu2 %vm126_vm2, %v319_v62  ;;  %2687 = vmatpush.xpose.msk.msrb.mxu0 %vm126_vm2, %v395_v61 }
 0x1cb   :  { %2684 = vmatmul.msk.f32.vlgmr.msrb.gmra.mxu3 %vm126_vm2, %v352_v46  ;;  %2688 = vmatmul.msk.f32.vlgmr.msrb.gmra.mxu0 %vm126_vm2, %v391_v55 }
 0x1cf   :  { %v2818_v63 = vpop.permute.xlu1 %2817  ;;  %v317_v0 = vpop.permute.xlu0 %316 }
 0x1d0   :  { %v2819_v1 = vunpack.i.l.bf16 %v2818_v63  ;;  %2679 = vmatpush.xpose.msk.msrb.mxu2 %vm126_vm2, %v317_v0  ;;  %v2820_v2 = vunpack.i.h.bf16 %v2818_v63 }
 0x1d3   :  { %2680 = vmatmul.msk.f32.vlgmr.msrb.gmra.mxu2 %vm126_vm2, %v313_v56  ;;  %2685 = vmatmul.msk.f32.gmra.mxu3 %vm126_vm2, %v354_v53 }
 0x1d4   :  { %683 = vmatpush.msra.mxu2 %v2819_v1 }
 0x1d6   :  { %684 = vmatpush.msra.mxu2 %v2820_v2 }
 0x1d7   :  { %v315_v3 = vpop.permute.xlu0 %314 }
 0x1db   :  { %2681 = vmatmul.msk.f32.gmra.mxu2 %vm126_vm2, %v315_v3 }
 0x1df   :  { %v393_v4 = vpop.permute.xlu0 %392 }
 0x1e0   :  { %2689 = vmatmul.msk.f32.gmra.mxu0 %vm126_vm2, %v393_v4 }
 0x1e7   :  { %v2803_v5 = vpop.permute.xlu0 %2802 }
 0x1e8   :  { %v2804_v6 = vunpack.i.l.bf16 %v2803_v5  ;;  %v2805_v7 = vunpack.i.h.bf16 %v2803_v5 }
 0x1ea   :  { %718 = vmatpush.msra.mxu3 %v2804_v6 }
 0x1ec   :  { %719 = vmatpush.msra.mxu3 %v2805_v7 }
 0x1ef   :  { %v2813_v8 = vpop.permute.xlu0 %2812 }
 0x1f0   :  { %v2814_v9 = vunpack.i.l.bf16 %v2813_v8  ;;  %v2815_v10 = vunpack.i.h.bf16 %v2813_v8 }
 0x1f2   :  { %858 = vmatpush.msrb.mxu3 %v2814_v9 }
 0x1f4   :  { %859 = vmatpush.msrb.mxu3 %v2815_v10 }
 0x216   :  { %v152_v11 = vpop.f32.mrf.mxu2 }
 0x217   :  { %v3273_v12 = vmul.f32 0.35355338, %v152_v11 }
 0x219   :  { %v446_v13 = vsel %vm445_vm3, %v3273_v12, -inf }
 0x21a   :  { %447 = vmax.xlane.f32.xlu2 %v446_v13 }
 0x21e   :  { %v155_v14 = vpop.f32.mrf.mxu2 }
 0x21f   :  { %v3277_v15 = vmul.f32 0.35355338, %v155_v14 }
 0x221   :  { %v449_v17 = vsel %vm445_vm3, %v3277_v15, -inf }
 0x222   :  { %450 = vmax.xlane.f32.xlu2 %v449_v17 }
 0x226   :  { %v189_v18 = vpop.f32.mrf.mxu3 }
 0x227   :  { %v3298_v42 = vmul.f32 0.35355338, %v189_v18 }
 0x229   :  { %v470_v44 = vsel %vm445_vm3, %v3298_v42, -inf }
 0x22e   :  { %v192_v20 = vpop.f32.mrf.mxu3 }
 0x22f   :  { %v3281_v22 = vmul.f32 0.35355338, %v192_v20 }
 0x231   :  { %v473_v24 = vsel %vm445_vm3, %v3281_v22, -inf }
 0x232   :  { %474 = vmax.xlane.f32.xlu2 %v473_v24 }
 0x233   :  { %v228_v32 = vpop.f32.mrf.mxu2 }
 0x234   :  { %v3294_v39 = vmul.f32 0.35355338, %v228_v32 }
 0x236   :  { %v267_v25 = vpop.f32.mrf.mxu3  ;;  %v452_v40 = vsel %vm445_vm3, %v3294_v39, -inf }
 0x237   :  { %v3304_v48 = vmul.f32 0.35355338, %v267_v25 }
 0x238   :  { %v306_v26 = vpop.f32.mrf.mxu1 }
 0x239   :  { %v433_v27 = vmul.f32 0.35355338, %v306_v26  ;;  %v476_v53 = vsel %vm445_vm3, %v3304_v48, -inf }
 0x23b   :  { %v458_v28 = vsel %vm445_vm3, %v433_v27, -inf  ;;  %v231_v38 = vpop.f32.mrf.mxu2 }
 0x23c   :  { %459 = vmax.xlane.f32.xlu0 %v458_v28  ;;  %v3314_v54 = vmul.f32 0.35355338, %v231_v38 }
 0x23e   :  { %v270_v29 = vpop.f32.mrf.mxu3  ;;  %v455_v57 = vsel %vm445_vm3, %v3314_v54, -inf }
 0x23f   :  { %v3286_v30 = vmul.f32 0.35355338, %v270_v29 }
 0x241   :  { %v479_v31 = vsel %vm445_vm3, %v3286_v30, -inf }
 0x242   :  { %480 = vmax.xlane.f32.xlu2 %v479_v31 }
 0x246   :  { %v309_v43 = vpop.f32.mrf.mxu3 }
 0x247   :  { %v3318_v56 = vmul.f32 0.35355338, %v309_v43 }
 0x248   :  { %v423_v35 = vpop.f32.mrf.mxu0 }
 0x249   :  { %v3290_v36 = vmul.f32 0.35355338, %v423_v35  ;;  %v461_v59 = vsel %vm445_vm3, %v3318_v56, -inf }
 0x24b   :  { %v488_v37 = vsel %vm445_vm3, %v3290_v36, -inf }
 0x24c   :  { %489 = vmax.xlane.f32.xlu1 %v488_v37 }
 0x24e   :  { %v384_v52 = vpop.f32.mrf.mxu3 }
 0x24f   :  { %v3316_v55 = vmul.f32 0.35355338, %v384_v52 }
 0x251   :  { %v464_v58 = vsel %vm445_vm3, %v3316_v55, -inf }
 0x254   :  { %453 = vmax.xlane.f32.xlu1 %v452_v40 }
 0x256   :  { %v345_v41 = vpop.f32.mrf.mxu2  ;;  %v387_v62 = vpop.f32.mrf.mxu3 }
 0x257   :  { %v3326_v60 = vmul.f32 0.35355338, %v345_v41  ;;  %v3330_v63 = vmul.f32 0.35355338, %v387_v62 }
 0x259   :  { %v482_v61 = vsel %vm445_vm3, %v3326_v60, -inf  ;;  %v467_v0 = vsel %vm445_vm3, %v3330_v63, -inf }
 0x25c   :  { %471 = vmax.xlane.f32.xlu1 %v470_v44 }
 0x25d   :  { %v426_v45 = vpop.f32.mrf.mxu0 }
 0x25e   :  { %v3302_v46 = vmul.f32 0.35355338, %v426_v45  ;;  %v348_v47 = vpop.f32.mrf.mxu2 }
 0x25f   :  { %v3306_v49 = vmul.f32 0.35355338, %v348_v47 }
 0x260   :  { %v491_v50 = vsel %vm445_vm3, %v3302_v46, -inf }
 0x261   :  { %492 = vmax.xlane.f32.xlu0 %v491_v50  ;;  %v485_v51 = vsel %vm445_vm3, %v3306_v49, -inf }
 0x262   :  { %486 = vmax.xlane.f32.xlu2 %v485_v51 }
 0x264   :  { %477 = vmax.xlane.f32.xlu1 %v476_v53 }
 0x269   :  { %456 = vmax.xlane.f32.xlu0 %v455_v57 }
 0x26a   :  { %465 = vmax.xlane.f32.xlu2 %v464_v58 }
 0x26c   :  { %462 = vmax.xlane.f32.xlu1 %v461_v59 }
 0x271   :  { %483 = vmax.xlane.f32.xlu0 %v482_v61 }
 0x279   :  { %468 = vmax.xlane.f32.xlu0 %v467_v0 }
 0x28d   :  { %v448_v1 = vpop.xlane.xlu2 %447 }
 0x28e   :  { %v494_v2 = vsub.f32 %v3273_v12, %v448_v1 }
 0x290   :  { %v510_v3 = vmul.f32 1.442695, %v494_v2 }
 0x292   :  { %2898 = vpow2.f32 %v510_v3 }
 0x295   :  { %v451_v6 = vpop.xlane.xlu2 %450 }
 0x296   :  { %v495_v9 = vsub.f32 %v3277_v15, %v451_v6 }
 0x298   :  { %v3335_v4 = vpop.eup %2898  ;;  %v512_v11 = vmul.f32 1.442695, %v495_v9 }
 0x299   :  { %v542_v5 = vsel %vm445_vm3, %v3335_v4, 0.0 }
 0x29a   :  { %543 = vadd.xlane.f32.xlu2 %v542_v5 }
 0x2a5   :  { %v475_v18 = vpop.xlane.xlu2 %474 }
 0x2a6   :  { %v503_v44 = vsub.f32 %v3281_v22, %v475_v18 }
 0x2a8   :  { %v528_v57 = vmul.f32 1.442695, %v503_v44 }
 0x2af   :  { %v460_v7 = vpop.xlane.xlu0 %459 }
 0x2b0   :  { %v498_v8 = vsub.f32 %v433_v27, %v460_v7 }
 0x2b2   :  { %v518_v10 = vmul.f32 1.442695, %v498_v8  ;;  %2822 = vrot.lane.b32.xlu2 %v3224_v34, %s3070_s28 }
 0x2b4   :  { %2900 = vpow2.f32 %v518_v10 }
 0x2b5   :  { %2902 = vpow2.f32 %v512_v11  ;;  %v481_v25 = vpop.xlane.xlu2 %480 }
 0x2b6   :  { %v505_v5 = vsub.f32 %v3286_v30, %v481_v25 }
 0x2ba   :  { %v3342_v12 = vpop.eup %2900 }
 0x2bb   :  { %v554_v13 = vsel %vm445_vm3, %v3342_v12, 0.0  ;;  %v3348_v17 = vpop.eup %2902 }
 0x2bc   :  { %555 = vadd.xlane.f32.xlu1 %v554_v13  ;;  %v545_v15 = vsel %vm445_vm3, %v3348_v17, 0.0 }
 0x2bf   :  { %v3346_v14 = vpop.xlane.xlu1 %489 }
 0x2c4   :  { %546 = vadd.xlane.f32.xlu1 %v545_v15 }
 0x2c7   :  { %v454_v20 = vpop.xlane.xlu1 %453 }
 0x2c8   :  { %v496_v34 = vsub.f32 %v3294_v39, %v454_v20 }
 0x2ca   :  { %v514_v24 = vmul.f32 1.442695, %v496_v34 }
 0x2cc   :  { %2904 = vpow2.f32 %v514_v24 }
 0x2cf   :  { %v472_v26 = vpop.xlane.xlu1 %471 }
 0x2d0   :  { %v502_v27 = vsub.f32 %v3298_v42, %v472_v26 }
 0x2d2   :  { %v3354_v28 = vpop.eup %2904  ;;  %v526_v29 = vmul.f32 1.442695, %v502_v27 }
 0x2d3   :  { %v548_v31 = vsel %vm445_vm3, %v3354_v28, 0.0 }
 0x2d4   :  { %2906 = vpow2.f32 %v526_v29  ;;  %549 = vadd.xlane.f32.xlu1 %v548_v31  ;;  %v3358_v32 = vpop.xlane.xlu0 %492 }
 0x2d5   :  { %v487_v35 = vpop.xlane.xlu2 %486  ;;  %v509_v20 = vsub.f32 %v3302_v46, %v3358_v32 }
 0x2d7   :  { %v478_v37 = vpop.xlane.xlu1 %477  ;;  %v540_v34 = vmul.f32 1.442695, %v509_v20 }
 0x2d8   :  { %v504_v38 = vsub.f32 %v3304_v48, %v478_v37 }
 0x2da   :  { %v3361_v39 = vpop.eup %2906  ;;  %v530_v40 = vmul.f32 1.442695, %v504_v38  ;;  %v508_v38 = vsub.f32 %v3290_v36, %v3346_v14 }
 0x2db   :  { %v566_v41 = vsel %vm445_vm3, %v3361_v39, 0.0 }
 0x2dc   :  { %2908 = vpow2.f32 %v530_v40  ;;  %567 = vadd.xlane.f32.xlu1 %v566_v41  ;;  %v457_v42 = vpop.xlane.xlu0 %456  ;;  %v538_v40 = vmul.f32 1.442695, %v508_v38 }
 0x2dd   :  { %v497_v43 = vsub.f32 %v3314_v54, %v457_v42  ;;  %v466_v47 = vpop.xlane.xlu2 %465 }
 0x2de   :  { %v500_v52 = vsub.f32 %v3316_v55, %v466_v47 }
 0x2df   :  { %v516_v45 = vmul.f32 1.442695, %v497_v43  ;;  %v463_v50 = vpop.xlane.xlu1 %462 }
 0x2e0   :  { %v499_v51 = vsub.f32 %v3318_v56, %v463_v50  ;;  %v522_v59 = vmul.f32 1.442695, %v500_v52 }
 0x2e1   :  { %2910 = vpow2.f32 %v516_v45 }
 0x2e2   :  { %v3368_v48 = vpop.eup %2908  ;;  %v520_v53 = vmul.f32 1.442695, %v499_v51 }
 0x2e3   :  { %v572_v58 = vsel %vm445_vm3, %v3368_v48, 0.0 }
 0x2e4   :  { %2912 = vpow2.f32 %v520_v53  ;;  %573 = vadd.xlane.f32.xlu2 %v572_v58  ;;  %v484_v54 = vpop.xlane.xlu0 %483 }
 0x2e5   :  { %2914 = vpow2.f32 %v528_v57  ;;  %v506_v55 = vsub.f32 %v3326_v60, %v484_v54  ;;  %v532_v60 = vmul.f32 1.442695, %v505_v5 }
 0x2e6   :  { %2916 = vpow2.f32 %v522_v59 }
 0x2e7   :  { %v3373_v22 = vpop.eup %2910  ;;  %v534_v3 = vmul.f32 1.442695, %v506_v55 }
 0x2e8   :  { %v551_v56 = vsel %vm445_vm3, %v3373_v22, 0.0 }
 0x2e9   :  { %552 = vadd.xlane.f32.xlu1 %v551_v56 }
 0x2ea   :  { %v3377_v61 = vpop.eup %2912 }
 0x2eb   :  { %v557_v62 = vsel %vm445_vm3, %v3377_v61, 0.0  ;;  %v3382_v1 = vpop.eup %2914 }
 0x2ec   :  { %558 = vadd.xlane.f32.xlu0 %v557_v62  ;;  %v469_v0 = vpop.xlane.xlu0 %468  ;;  %v3386_v7 = vpop.eup %2916  ;;  %v569_v8 = vsel %vm445_vm3, %v3382_v1, 0.0 }
 0x2ed   :  { %v501_v2 = vsub.f32 %v3330_v63, %v469_v0  ;;  %v560_v9 = vsel %vm445_vm3, %v3386_v7, 0.0  ;;  %v507_v63 = vsub.f32 %v3306_v49, %v487_v35 }
 0x2ef   :  { %v524_v6 = vmul.f32 1.442695, %v501_v2  ;;  %v536_v13 = vmul.f32 1.442695, %v507_v63 }
 0x2f1   :  { %2918 = vpow2.f32 %v524_v6  ;;  %570 = vadd.xlane.f32.xlu1 %v569_v8 }
 0x2f2   :  { %2920 = vpow2.f32 %v534_v3 }
 0x2f3   :  { %2922 = vpow2.f32 %v532_v60 }
 0x2f4   :  { %561 = vadd.xlane.f32.xlu0 %v560_v9  ;;  %2924 = vpow2.f32 %v536_v13 }
 0x2f5   :  { %2926 = vpow2.f32 %v540_v34 }
 0x2f7   :  { %v3392_v10 = vpop.eup %2918 }
 0x2f8   :  { %v3395_v30 = vpop.eup %2920  ;;  %v563_v11 = vsel %vm445_vm3, %v3392_v10, 0.0 }
 0x2f9   :  { %564 = vadd.xlane.f32.xlu2 %v563_v11  ;;  %v578_v15 = vsel %vm445_vm3, %v3395_v30, 0.0  ;;  %v3401_v18 = vpop.eup %2922 }
 0x2fa   :  { %v575_v49 = vsel %vm445_vm3, %v3401_v18, 0.0  ;;  %v3407_v24 = vpop.eup %2924 }
 0x2fb   :  { %v581_v25 = vsel %vm445_vm3, %v3407_v24, 0.0  ;;  %v3413_v26 = vpop.eup %2926 }
 0x2fc   :  { %579 = vadd.xlane.f32.xlu0 %v578_v15  ;;  %v587_v46 = vsel %vm445_vm3, %v3413_v26, 0.0 }
 0x301   :  { %576 = vadd.xlane.f32.xlu2 %v575_v49 }
 0x309   :  { %582 = vadd.xlane.f32.xlu2 %v581_v25 }
 0x30a   :  { %2827 = vrot.lane.b32.xlu1 %v3215_v33, %s3068_s26 }
 0x30d   :  { %v544_v27 = vpop.xlane.xlu2 %543 }
 0x30e   :  { %2928 = vrcp.f32 %v544_v27 }
 0x30f   :  { %2930 = vpow2.f32 %v538_v40 }
 0x310   :  { %2832 = vrot.lane.b32.xlu0 %v3215_v33, %s3070_s28 }
 0x311   :  { %588 = vadd.xlane.f32.xlu2 %v587_v46 }
 0x314   :  { %v2929_v29 = vpop.eup %2928 }
 0x315   :  { %v606_v31 = vmul.f32 %v2929_v29, %v3335_v4  ;;  %v2823_v32 = vpop.permute.xlu2 %2822  ;;  %v3425_v42 = vpop.eup %2930 }
 0x316   :  { %v2824_v35 = vunpack.i.l.bf16 %v2823_v32  ;;  %v2825_v37 = vunpack.i.h.bf16 %v2823_v32  ;;  %v584_v4 = vsel %vm445_vm3, %v3425_v42, 0.0 }
 0x317   :  { %2690 = vmatmul.msk.f32.vlgmr.msra.gmra.mxu1 %vm445_vm3, %v606_v31 }
 0x318   :  { %788 = vmatpush.msrb.mxu1 %v2824_v35  ;;  %2837 = vrot.lane.b32.xlu0 %v3215_v33, %s3069_s27 }
 0x31a   :  { %789 = vmatpush.msrb.mxu1 %v2825_v37 }
 0x32f   :  { %v556_v41 = vpop.xlane.xlu1 %555 }
 0x334   :  { %585 = vadd.xlane.f32.xlu1 %v584_v4 }
 0x337   :  { %v547_v43 = vpop.xlane.xlu1 %546 }
 0x338   :  { %2932 = vrcp.f32 %v547_v43 }
 0x339   :  { %2934 = vrcp.f32 %v556_v41 }
 0x33e   :  { %v2933_v44 = vpop.eup %2932 }
 0x33f   :  { %v607_v45 = vmul.f32 %v2933_v44, %v3348_v17  ;;  %v2935_v33 = vpop.eup %2934 }
 0x340   :  { %v610_v36 = vmul.f32 %v2935_v33, %v3342_v12 }
 0x341   :  { %2691 = vmatmul.msk.f32.gmra.mxu1 %vm445_vm3, %v607_v45 }
 0x347   :  { %v550_v14 = vpop.xlane.xlu1 %549 }
 0x348   :  { %2936 = vrcp.f32 %v550_v14 }
 0x349   :  { %2698 = vmatmul.msk.f32.vlgmr.msrb.gmra.mxu1 %vm445_vm3, %v610_v36 }
 0x34e   :  { %v2937_v47 = vpop.eup %2936 }
 0x34f   :  { %v608_v50 = vmul.f32 %v2937_v47, %v3354_v28  ;;  %v568_v51 = vpop.xlane.xlu1 %567 }
 0x350   :  { %2938 = vrcp.f32 %v568_v51 }
 0x351   :  { %2694 = vmatmul.msk.f32.vlgmr.msra.gmra.mxu3 %vm445_vm3, %v608_v50 }
 0x356   :  { %v2939_v52 = vpop.eup %2938 }
 0x357   :  { %v614_v53 = vmul.f32 %v2939_v52, %v3361_v39  ;;  %v574_v58 = vpop.xlane.xlu2 %573  ;;  %v966_v52 = vld [vmem:[%s4266_s1 + $0x58] sm:$0xff] }
 0x358   :  { %993 = vmatpush.msra.mxu1 %v966_v52  ;;  %v1129_v52 = vld [vmem:[%s4267_s2 + $0x40] sm:$0xff] }
 0x359   :  { %2692 = vmatmul.msk.f32.vlgmr.msra.gmra.mxu2 %vm445_vm3, %v614_v53  ;;  %v965_v53 = vld [vmem:[%s4266_s1 + $0x50] sm:$0xff] }
 0x35a   :  { %994 = vmatpush.msra.mxu1 %v965_v53 }
 0x35c   :  { %v553_v17 = vpop.xlane.xlu1 %552 }
 0x35d   :  { %2940 = vrcp.f32 %v553_v17  ;;  %v964_v17 = vld [vmem:[%s4266_s1 + $0x48] sm:$0xff] }
 0x35e   :  { %995 = vmatpush.msra.mxu1 %v964_v17 }
 0x35f   :  { %v559_v57 = vpop.xlane.xlu0 %558 }
 0x360   :  { %2942 = vrcp.f32 %v559_v57  ;;  %v963_v57 = vld [vmem:[%s4266_s1 + $0x40] sm:$0xff] }
 0x361   :  { %996 = vmatpush.msra.mxu1 %v963_v57 }
 0x363   :  { %v2941_v12 = vpop.eup %2940 }
 0x364   :  { %v571_v54 = vpop.xlane.xlu1 %570  ;;  %v609_v59 = vmul.f32 %v2941_v12, %v3373_v22 }
 0x365   :  { %2944 = vrcp.f32 %v571_v54 }
 0x366   :  { %v2943_v28 = vpop.eup %2942  ;;  %2695 = vmatmul.msk.f32.gmra.mxu3 %vm445_vm3, %v609_v59 }
 0x367   :  { %v562_v56 = vpop.xlane.xlu0 %561  ;;  %v611_v55 = vmul.f32 %v2943_v28, %v3377_v61 }
 0x368   :  { %2946 = vrcp.f32 %v562_v56 }
 0x369   :  { %2699 = vmatmul.msk.f32.gmra.mxu1 %vm445_vm3, %v611_v55 }
 0x36b   :  { %v2945_v39 = vpop.eup %2944 }
 0x36c   :  { %v565_v62 = vpop.xlane.xlu2 %564  ;;  %v615_v0 = vmul.f32 %v2945_v39, %v3382_v1 }
 0x36d   :  { %2948 = vrcp.f32 %v565_v62 }
 0x36e   :  { %v2947_v2 = vpop.eup %2946  ;;  %2693 = vmatmul.msk.f32.gmra.mxu2 %vm445_vm3, %v615_v0  ;;  %2950 = vrcp.f32 %v574_v58 }
 0x36f   :  { %v612_v22 = vmul.f32 %v2947_v2, %v3386_v7  ;;  %v580_v6 = vpop.xlane.xlu0 %579 }
 0x370   :  { %2952 = vrcp.f32 %v580_v6 }
 0x371   :  { %2702 = vmatmul.msk.f32.vlgmr.msrb.gmra.mxu3 %vm445_vm3, %v612_v22 }
 0x373   :  { %v2949_v3 = vpop.eup %2948 }
 0x374   :  { %v613_v5 = vmul.f32 %v2949_v3, %v3392_v10  ;;  %v577_v61 = vpop.xlane.xlu2 %576  ;;  %v2951_v60 = vpop.eup %2950 }
 0x375   :  { %2954 = vrcp.f32 %v577_v61  ;;  %v616_v63 = vmul.f32 %v2951_v60, %v3368_v48 }
 0x376   :  { %v2953_v13 = vpop.eup %2952 }
 0x377   :  { %v618_v49 = vmul.f32 %v2953_v13, %v3395_v30 }
 0x379   :  { %2703 = vmatmul.msk.f32.gmra.mxu3 %vm445_vm3, %v613_v5 }
 0x37b   :  { %v2955_v15 = vpop.eup %2954 }
 0x37c   :  { %v2828_v8 = vpop.permute.xlu1 %2827  ;;  %v583_v7 = vpop.xlane.xlu2 %582  ;;  %v617_v34 = vmul.f32 %v2955_v15, %v3401_v18 }
 0x37d   :  { %v2829_v1 = vunpack.i.l.bf16 %v2828_v8  ;;  %v2830_v9 = vunpack.i.h.bf16 %v2828_v8  ;;  %2956 = vrcp.f32 %v583_v7 }
 0x37f   :  { %753 = vmatpush.msra.mxu0 %v2829_v1 }
 0x381   :  { %754 = vmatpush.msra.mxu0 %v2830_v9 }
 0x382   :  { %2696 = vmatmul.msk.f32.vlgmr.msra.gmra.mxu0 %vm445_vm3, %v616_v63  ;;  %v2833_v11 = vpop.permute.xlu0 %2832 }
 0x383   :  { %v2834_v10 = vunpack.i.l.bf16 %v2833_v11  ;;  %v2835_v20 = vunpack.i.h.bf16 %v2833_v11  ;;  %v2957_v25 = vpop.eup %2956 }
 0x384   :  { %v619_v29 = vmul.f32 %v2957_v25, %v3407_v24  ;;  %v589_v30 = vpop.xlane.xlu2 %588 }
 0x385   :  { %823 = vmatpush.msrb.mxu2 %v2834_v10  ;;  %v2882_v10 = vld [vmem:[%s4266_s1 + $0x180] ss:$0 sm:$0xff] }
 0x387   :  { %824 = vmatpush.msrb.mxu2 %v2835_v20 }
 0x388   :  { %2700 = vmatmul.msk.f32.vlgmr.msrb.gmra.mxu2 %vm445_vm3, %v618_v49 }
 0x38a   :  { %2697 = vmatmul.msk.f32.gmra.mxu0 %vm445_vm3, %v617_v34  ;;  %v2838_v48 = vpop.permute.xlu0 %2837 }
 0x38b   :  { %v2839_v27 = vunpack.i.l.bf16 %v2838_v48  ;;  %v2840_v46 = vunpack.i.h.bf16 %v2838_v48 }
 0x38d   :  { %893 = vmatpush.msrb.mxu0 %v2839_v27 }
 0x38f   :  { %894 = vmatpush.msrb.mxu0 %v2840_v46 }
 0x390   :  { %2701 = vmatmul.msk.f32.gmra.mxu2 %vm445_vm3, %v619_v29 }
 0x394   :  { %v651_v37 = vpop.f32.mrf.mxu1 }
 0x3a7   :  { %v586_v31 = vpop.xlane.xlu1 %585 }
 0x3a8   :  { %2958 = vrcp.f32 %v586_v31 }
 0x3a9   :  { %2960 = vrcp.f32 %v589_v30 }
 0x3ae   :  { %v2959_v32 = vpop.eup %2958 }
 0x3af   :  { %v620_v35 = vmul.f32 %v2959_v32, %v3425_v42  ;;  %v2961_v18 = vpop.eup %2960 }
 0x3b0   :  { %v621_v38 = vmul.f32 %v2961_v18, %v3413_v26 }
 0x3b1   :  { %2704 = vmatmul.msk.f32.vlgmr.msrb.gmra.mxu0 %vm445_vm3, %v620_v35 }
 0x3b9   :  { %2705 = vmatmul.msk.f32.gmra.mxu0 %vm445_vm3, %v621_v38 }
 0x3be   :  { %v654_v40 = vpop.f32.mrf.mxu1 }
 0x3c6   :  { %v791_v24 = vpop.f32.mrf.mxu1 }
 0x3c7   :  { %922 = vrot.lane.b32.xlu2 %v791_v24, %s3071_s29 }
 0x3d4   :  { %v721_v41 = vpop.f32.mrf.mxu3 }
 0x3d5   :  { %906 = vrot.lane.b32.xlu0 %v721_v41, %s3072_s30 }
 0x3dc   :  { %v686_v26 = vpop.f32.mrf.mxu2 }
 0x3e6   :  { %v794_v42 = vpop.f32.mrf.mxu1 }
 0x3e9   :  { %v724_v4 = vpop.f32.mrf.mxu3 }
 0x3ea   :  { %908 = vrot.lane.b32.xlu0 %v724_v4, %s3072_s30 }
 0x3f1   :  { %v689_v33 = vpop.f32.mrf.mxu2 }
 0x3f2   :  { %924 = vrot.lane.b32.xlu0 %v794_v42, %s3071_s29 }
 0x3f4   :  { %v861_v43 = vpop.f32.mrf.mxu3 }
 0x3f5   :  { %938 = vrot.lane.b32.xlu1 %v861_v43, %s3073_s4  ;;  %v3074_v43 = vmov 32.0  }
 0x3f6   :  { %2962 = vrcp.f32 %v3074_v43 }
 0x3fc   :  { %v864_v44 = vpop.f32.mrf.mxu3 }
 0x3fd   :  { %940 = vrot.lane.b32.xlu0 %v864_v44, %s3073_s4 }
 0x3ff   :  { %v756_v45 = vpop.f32.mrf.mxu0 }
 0x400   :  { %910 = vrot.lane.b32.xlu2 %v756_v45, %s3072_s30 }
 0x407   :  { %v759_v36 = vpop.f32.mrf.mxu0 }
 0x408   :  { %912 = vrot.lane.b32.xlu2 %v759_v36, %s3072_s30 }
 0x40b   :  { %v826_v14 = vpop.f32.mrf.mxu2 }
 0x40c   :  { %926 = vrot.lane.b32.xlu1 %v826_v14, %s3071_s29  ;;  %v1131_v14 = vld [vmem:[%s4267_s2 + $0x50] sm:$0xff] }
 0x413   :  { %v829_v47 = vpop.f32.mrf.mxu2 }
 0x414   :  { %928 = vrot.lane.b32.xlu1 %v829_v47, %s3071_s29 }
 0x421   :  { %v923_v59 = vpop.permute.xlu2 %922 }
 0x42e   :  { %v896_v50 = vpop.f32.mrf.mxu0 }
 0x42f   :  { %942 = vrot.lane.b32.xlu0 %v896_v50, %s3073_s4  ;;  %v1130_v50 = vld [vmem:[%s4267_s2 + $0x48] sm:$0xff] }
 0x436   :  { %v899_v51 = vpop.f32.mrf.mxu0 }
 0x437   :  { %944 = vrot.lane.b32.xlu0 %v899_v51, %s3073_s4 }
 0x447   :  { %v907_v12 = vpop.permute.xlu0 %906 }
 0x448   :  { %v950_v54 = vsel %vm126_vm2, %v651_v37, %v907_v12 }
 0x449   :  { %v954_v56 = vsel %vm445_vm3, %v950_v54, %v923_v59 }
 0x45a   :  { %v911_v3 = vpop.permute.xlu2 %910 }
 0x45b   :  { %v952_v61 = vsel %vm126_vm2, %v686_v26, %v911_v3  ;;  %v2963_v26 = vpop.eup %2962 }
 0x45c   :  { %v909_v58 = vpop.permute.xlu0 %908  ;;  %v1029_v44 = vmul.f32 32.0, %v2963_v26  ;;  %vm1033_vm5 = vweird.f32 %v2963_v26 }
 0x45d   :  { %v951_v62 = vsel %vm126_vm2, %v654_v40, %v909_v58 }
 0x45e   :  { %v1030_v45 = vsub.f32 1.0, %v1029_v44 }
 0x462   :  { %v913_v1 = vpop.permute.xlu2 %912 }
 0x463   :  { %v953_v63 = vsel %vm126_vm2, %v689_v33, %v913_v1  ;;  %v1031_v33 = vmul.f32 %v2963_v26, %v1030_v45  ;;  %v1145_v45 = vld [vmem:[%s4266_s1 + $0xe0] sm:$0xff] }
 0x464   :  { %v925_v28 = vpop.permute.xlu0 %924 }
 0x465   :  { %v955_v0 = vsel %vm445_vm3, %v951_v62, %v925_v28  ;;  %v1032_v36 = vadd.f32 %v2963_v26, %v1031_v33 }
 0x467   :  { %v939_v55 = vpop.permute.xlu1 %938  ;;  %v3540_v47 = vsel %vm1033_vm5, %v2963_v26, %v1032_v36  ;;  %v1146_v26 = vld [vmem:[%s4266_s1 + $0xe8] sm:$0xff] }
 0x468   :  { %v959_v39 = vsel %vm958_vm4, %v954_v56, %v939_v55 }
 0x469   :  { %2706 = vmatmul.msk.f32.vlgmr.msra.gmra.mxu1 %vm78_vm1, %v959_v39 }
 0x46f   :  { %v941_v2 = vpop.permute.xlu0 %940 }
 0x470   :  { %v960_v22 = vsel %vm958_vm4, %v955_v0, %v941_v2 }
 0x471   :  { %2707 = vmatmul.msk.f32.gmra.mxu1 %vm78_vm1, %v960_v22 }
 0x47e   :  { %v927_v5 = vpop.permute.xlu1 %926 }
 0x47f   :  { %v956_v6 = vsel %vm445_vm3, %v952_v61, %v927_v5 }
 0x486   :  { %v929_v9 = vpop.permute.xlu1 %928 }
 0x487   :  { %v957_v7 = vsel %vm445_vm3, %v953_v63, %v929_v9  ;;  %v3556_v9 = vld [vmem:[%s4266_s1 + $0x181] ss:$0 sm:$0xff] }
 0x4a1   :  { %v943_v8 = vpop.permute.xlu0 %942 }
 0x4a2   :  { %v961_v60 = vsel %vm958_vm4, %v956_v6, %v943_v8 }
 0x4a3   :  { %2708 = vmatmul.msk.f32.gmra.mxu1 %vm78_vm1, %v961_v60 }
 0x4a9   :  { %v945_v11 = vpop.permute.xlu0 %944 }
 0x4aa   :  { %v962_v13 = vsel %vm958_vm4, %v957_v7, %v945_v11 }
 0x4ab   :  { %2709 = vmatmul.msk.f32.gmra.mxu1 %vm78_vm1, %v962_v13  ;;  %v3561_v13 = vld [vmem:[%s4266_s1 + $0x182] ss:$0 sm:$0xff] }
 0x4e6   :  { %v998_v15 = vpop.f32.mrf.mxu1 }
 0x4e7   :  { %v999_v20 = vadd.f32 %v2882_v10, %v998_v15 }
 0x4e9   :  { %v3503_v49 = vadd.f32 %v999_v20, %v3144_v16 }
 0x4eb   :  { %v1016_v34 = vsel %vm78_vm1, %v3503_v49, 0.0  ;;  %v1039_v48 = vmul.f32 %v3503_v49, %v3503_v49 }
 0x4ec   :  { %1017 = vadd.xlane.f32.xlu2 %v1016_v34 }
 0x4ed   :  { %v1043_v25 = vsel %vm78_vm1, %v1039_v48, 0.0 }
 0x4ee   :  { %1044 = vadd.xlane.f32.xlu1 %v1043_v25  ;;  %v1001_v27 = vpop.f32.mrf.mxu1 }
 0x4ef   :  { %v1002_v46 = vadd.f32 %v2882_v10, %v1001_v27 }
 0x4f1   :  { %v3511_v29 = vadd.f32 %v1002_v46, %v3151_v19 }
 0x4f3   :  { %v1019_v31 = vsel %vm78_vm1, %v3511_v29, 0.0  ;;  %v1040_v16 = vmul.f32 %v3511_v29, %v3511_v29 }
 0x4f4   :  { %1020 = vadd.xlane.f32.xlu0 %v1019_v31 }
 0x4f5   :  { %v1046_v30 = vsel %vm78_vm1, %v1040_v16, 0.0 }
 0x4f6   :  { %1047 = vadd.xlane.f32.xlu2 %v1046_v30 }
 0x520   :  { %v1004_v32 = vpop.f32.mrf.mxu1 }
 0x521   :  { %v1005_v35 = vadd.f32 %v2882_v10, %v1004_v32 }
 0x523   :  { %v3519_v18 = vadd.f32 %v1005_v35, %v3155_v21 }
 0x525   :  { %v1022_v37 = vsel %vm78_vm1, %v3519_v18, 0.0  ;;  %v1041_v19 = vmul.f32 %v3519_v18, %v3519_v18 }
 0x526   :  { %1023 = vadd.xlane.f32.xlu1 %v1022_v37 }
 0x527   :  { %v1049_v38 = vsel %vm78_vm1, %v1041_v19, 0.0 }
 0x528   :  { %1050 = vadd.xlane.f32.xlu0 %v1049_v38  ;;  %v1007_v40 = vpop.f32.mrf.mxu1 }
 0x529   :  { %v1008_v24 = vadd.f32 %v2882_v10, %v1007_v40 }
 0x52b   :  { %v3527_v41 = vadd.f32 %v1008_v24, %v3159_v23  ;;  %v1132_v23 = vld [vmem:[%s4267_s2 + $0x58] sm:$0xff] }
 0x52c   :  { %1175 = vmatpush.msra.mxu2 %v1132_v23  ;;  %v1148_v24 = vld [vmem:[%s4266_s1 + $0xf8] sm:$0xff] }
 0x52d   :  { %v1025_v4 = vsel %vm78_vm1, %v3527_v41, 0.0  ;;  %v1042_v21 = vmul.f32 %v3527_v41, %v3527_v41  ;;  %1198 = vmatpush.msra.mxu3 %v1148_v24  ;;  %v1144_v23 = vld [vmem:[%s4266_s1 + $0xd8] sm:$0xff] }
 0x52e   :  { %1026 = vadd.xlane.f32.xlu2 %v1025_v4  ;;  %1176 = vmatpush.msra.mxu2 %v1131_v14  ;;  %v1147_v4 = vld [vmem:[%s4266_s1 + $0xf0] sm:$0xff] }
 0x52f   :  { %v1052_v42 = vsel %vm78_vm1, %v1042_v21, 0.0  ;;  %1199 = vmatpush.msra.mxu3 %v1147_v4 }
 0x530   :  { %1053 = vadd.xlane.f32.xlu1 %v1052_v42  ;;  %1177 = vmatpush.msra.mxu2 %v1130_v50  ;;  %v1143_v50 = vld [vmem:[%s4266_s1 + $0xd0] sm:$0xff] }
 0x531   :  { %1200 = vmatpush.msra.mxu3 %v1146_v26 }
 0x532   :  { %1178 = vmatpush.msra.mxu2 %v1129_v52  ;;  %v1142_v52 = vld [vmem:[%s4266_s1 + $0xc8] sm:$0xff] }
 0x533   :  { %1201 = vmatpush.msra.mxu3 %v1145_v45 }
 0x535   :  { %1202 = vmatpush.msra.mxu3 %v1144_v23 }
 0x537   :  { %1203 = vmatpush.msra.mxu3 %v1143_v50 }
 0x539   :  { %1204 = vmatpush.msra.mxu3 %v1142_v52 }
 0x55f   :  { %v1018_v51 = vpop.xlane.xlu2 %1017 }
 0x560   :  { %v1035_v53 = vmul.f32 %v3540_v47, %v1018_v51 }
 0x561   :  { %v1045_v17 = vpop.xlane.xlu1 %1044 }
 0x562   :  { %v1059_v57 = vmul.f32 %v1035_v53, %v1035_v53  ;;  %v1055_v12 = vmul.f32 %v1045_v17, %v3540_v47  ;;  %v1067_v1 = vsub.f32 %v3503_v49, %v1035_v53  ;;  %v1141_v17 = vld [vmem:[%s4266_s1 + $0xc0] sm:$0xff] }
 0x563   :  { %1205 = vmatpush.msra.mxu3 %v1141_v17 }
 0x564   :  { %v1063_v58 = vsub.f32 %v1055_v12, %v1059_v57 }
 0x566   :  { %v1071_v54 = vadd.f32 1e-05, %v1063_v58  ;;  %v1140_v58 = vld [vmem:[%s4266_s1 + $0xb8] sm:$0xff] }
 0x567   :  { %v1021_v59 = vpop.xlane.xlu0 %1020  ;;  %1206 = vmatpush.msra.mxu3 %v1140_v58  ;;  %v1341_v58 = vld [vmem:[%s4267_s2 + $0x30] sm:$0xff] }
 0x568   :  { %2964 = vrsqrt.f32 %v1071_v54  ;;  %v1036_v28 = vmul.f32 %v3540_v47, %v1021_v59  ;;  %vm1081_vm7 = vweird.f32 %v1071_v54 }
 0x569   :  { %v1048_v56 = vpop.xlane.xlu2 %1047 }
 0x56a   :  { %v1060_v55 = vmul.f32 %v1036_v28, %v1036_v28  ;;  %v1056_v39 = vmul.f32 %v1048_v56, %v3540_v47  ;;  %v1068_v48 = vsub.f32 %v3511_v29, %v1036_v28  ;;  %v1139_v56 = vld [vmem:[%s4266_s1 + $0xb0] sm:$0xff] }
 0x56b   :  { %1207 = vmatpush.msra.mxu3 %v1139_v56 }
 0x56c   :  { %v1064_v62 = vsub.f32 %v1056_v39, %v1060_v55 }
 0x56e   :  { %v2965_v0 = vpop.eup %2964  ;;  %v1072_v2 = vadd.f32 1e-05, %v1064_v62 }
 0x56f   :  { %v1076_v22 = vmul.f32 %v2965_v0, %v1071_v54  ;;  %vm1082_vm6 = vweird.f32 %v2965_v0 }
 0x570   :  { %2966 = vrsqrt.f32 %v1072_v2  ;;  %vm1083_vm8 = vmor %vm1081_vm7, %vm1082_vm6  ;;  %vm1091_vm10 = vweird.f32 %v1072_v2 }
 0x571   :  { %v1077_v3 = vmul.f32 %v2965_v0, %v1076_v22 }
 0x573   :  { %v1078_v5 = vmul.f32 0.5, %v1077_v3 }
 0x575   :  { %v1079_v61 = vsub.f32 1.5, %v1078_v5 }
 0x576   :  { %v2967_v6 = vpop.eup %2966 }
 0x577   :  { %v1080_v8 = vmul.f32 %v2965_v0, %v1079_v61  ;;  %v1086_v60 = vmul.f32 %v2967_v6, %v1072_v2  ;;  %vm1092_vm9 = vweird.f32 %v2967_v6  ;;  %v1136_v61 = vld [vmem:[%s4266_s1 + $0x98] sm:$0xff] }
 0x578   :  { %vm1093_vm11 = vmor %vm1091_vm10, %vm1092_vm9 }
 0x579   :  { %v1084_v63 = vsel %vm1083_vm8, %v2965_v0, %v1080_v8  ;;  %v1087_v7 = vmul.f32 %v2967_v6, %v1086_v60  ;;  %v1138_v0 = vld [vmem:[%s4266_s1 + $0xa8] sm:$0xff] }
 0x57a   :  { %v1115_v11 = vmul.f32 %v1084_v63, %v1067_v1  ;;  %1208 = vmatpush.msra.mxu3 %v1138_v0 }
 0x57b   :  { %v1088_v10 = vmul.f32 0.5, %v1087_v7 }
 0x57c   :  { %v1120_v15 = vmul.f32 %v3556_v9, %v1115_v11  ;;  %v1135_v11 = vld [vmem:[%s4266_s1 + $0x90] sm:$0xff] }
 0x57d   :  { %v1089_v20 = vsub.f32 1.5, %v1088_v10  ;;  %v1133_v10 = vld [vmem:[%s4266_s1 + $0x80] sm:$0xff] }
 0x57e   :  { %v3565_v49 = vadd.f32 %v3561_v13, %v1120_v15 }
 0x57f   :  { %v1090_v34 = vmul.f32 %v2967_v6, %v1089_v20 }
 0x580   :  { %2710 = vmatmul.msk.f32.vlgmr.msra.gmra.mxu2 %vm78_vm1, %v3565_v49 }
 0x581   :  { %v1094_v25 = vsel %vm1093_vm11, %v2967_v6, %v1090_v34 }
 0x582   :  { %v1116_v27 = vmul.f32 %v1094_v25, %v1068_v48 }
 0x584   :  { %v1121_v46 = vmul.f32 %v3556_v9, %v1116_v27 }
 0x586   :  { %v3572_v31 = vadd.f32 %v3561_v13, %v1121_v46 }
 0x588   :  { %2711 = vmatmul.msk.f32.gmra.mxu2 %vm78_vm1, %v3572_v31 }
 0x599   :  { %v1024_v16 = vpop.xlane.xlu1 %1023 }
 0x59a   :  { %v1037_v30 = vmul.f32 %v3540_v47, %v1024_v16 }
 0x59b   :  { %v1051_v32 = vpop.xlane.xlu0 %1050 }
 0x59c   :  { %v1061_v35 = vmul.f32 %v1037_v30, %v1037_v30  ;;  %v1057_v29 = vmul.f32 %v1051_v32, %v3540_v47  ;;  %v1069_v28 = vsub.f32 %v3519_v18, %v1037_v30  ;;  %v1137_v18 = vld [vmem:[%s4266_s1 + $0xa0] sm:$0xff] }
 0x59d   :  { %1209 = vmatpush.msra.mxu3 %v1137_v18 }
 0x59e   :  { %v1065_v37 = vsub.f32 %v1057_v29, %v1061_v35  ;;  %v2886_v29 = vld [vmem:[%s4266_s1 + $0x183] ss:$0 sm:$0xff] }
 0x59f   :  { %1210 = vmatpush.msra.mxu3 %v1136_v61 }
 0x5a0   :  { %v1073_v19 = vadd.f32 1e-05, %v1065_v37 }
 0x5a1   :  { %v1027_v38 = vpop.xlane.xlu2 %1026  ;;  %1211 = vmatpush.msra.mxu3 %v1135_v11 }
 0x5a2   :  { %2968 = vrsqrt.f32 %v1073_v19  ;;  %v1038_v40 = vmul.f32 %v3540_v47, %v1027_v38  ;;  %vm1101_vm13 = vweird.f32 %v1073_v19 }
 0x5a3   :  { %v1054_v21 = vpop.xlane.xlu1 %1053 }
 0x5a4   :  { %v1062_v42 = vmul.f32 %v1038_v40, %v1038_v40  ;;  %v1058_v43 = vmul.f32 %v1054_v21, %v3540_v47  ;;  %v1070_v8 = vsub.f32 %v3527_v41, %v1038_v40  ;;  %v1134_v41 = vld [vmem:[%s4266_s1 + $0x88] sm:$0xff] }
 0x5a5   :  { %1212 = vmatpush.msra.mxu3 %v1134_v41 }
 0x5a6   :  { %v1066_v44 = vsub.f32 %v1058_v43, %v1062_v42 }
 0x5a7   :  { %1213 = vmatpush.msra.mxu3 %v1133_v10 }
 0x5a8   :  { %v2969_v33 = vpop.eup %2968  ;;  %v1074_v36 = vadd.f32 1e-05, %v1066_v44 }
 0x5a9   :  { %v1096_v14 = vmul.f32 %v2969_v33, %v1073_v19  ;;  %vm1102_vm12 = vweird.f32 %v2969_v33 }
 0x5aa   :  { %2970 = vrsqrt.f32 %v1074_v36  ;;  %vm1103_vm14 = vmor %vm1101_vm13, %vm1102_vm12  ;;  %vm1111_vm0 = vweird.f32 %v1074_v36 }
 0x5ab   :  { %v1097_v51 = vmul.f32 %v2969_v33, %v1096_v14 }
 0x5ad   :  { %v1098_v53 = vmul.f32 0.5, %v1097_v51 }
 0x5af   :  { %v1099_v57 = vsub.f32 1.5, %v1098_v53 }
 0x5b0   :  { %v2971_v12 = vpop.eup %2970 }
 0x5b1   :  { %v1100_v54 = vmul.f32 %v2969_v33, %v1099_v57  ;;  %v1106_v59 = vmul.f32 %v2971_v12, %v1074_v36  ;;  %vm1112_vm15 = vweird.f32 %v2971_v12 }
 0x5b2   :  { %vm1113_vm5 = vmor %vm1111_vm0, %vm1112_vm15 }
 0x5b3   :  { %v1107_v55 = vmul.f32 %v2971_v12, %v1106_v59  ;;  %v1104_v39 = vsel %vm1103_vm14, %v2969_v33, %v1100_v54  ;;  %v1340_v54 = vld [vmem:[%s4267_s2 + $0x28] sm:$0xff] }
 0x5b4   :  { %v1117_v62 = vmul.f32 %v1104_v39, %v1069_v28  ;;  %v1339_v28 = vld [vmem:[%s4267_s2 + $0x20] sm:$0xff] }
 0x5b5   :  { %v1108_v2 = vmul.f32 0.5, %v1107_v55 }
 0x5b6   :  { %v1122_v22 = vmul.f32 %v3556_v9, %v1117_v62 }
 0x5b7   :  { %v1109_v3 = vsub.f32 1.5, %v1108_v2 }
 0x5b8   :  { %v1127_v5 = vadd.f32 %v3561_v13, %v1122_v22 }
 0x5b9   :  { %v1110_v6 = vmul.f32 %v2971_v12, %v1109_v3 }
 0x5ba   :  { %2712 = vmatmul.msk.f32.gmra.mxu2 %vm78_vm1, %v1127_v5 }
 0x5bb   :  { %v1114_v60 = vsel %vm1113_vm5, %v2971_v12, %v1110_v6  ;;  %v1342_v12 = vld [vmem:[%s4267_s2 + $0x38] sm:$0xff] }
 0x5bc   :  { %v1118_v1 = vmul.f32 %v1114_v60, %v1070_v8  ;;  %1369 = vmatpush.msra.mxu0 %v1342_v12 }
 0x5be   :  { %v1123_v63 = vmul.f32 %v3556_v9, %v1118_v1  ;;  %v2885_v9 = vld [vmem:[%s4267_s2 + $0xa2] ss:$0 sm:$0xff]  ;;  %1370 = vmatpush.msra.mxu0 %v1341_v58 }
 0x5c0   :  { %v1128_v7 = vadd.f32 %v3561_v13, %v1123_v63  ;;  %1371 = vmatpush.msra.mxu0 %v1340_v54 }
 0x5c2   :  { %2713 = vmatmul.msk.f32.gmra.mxu2 %vm78_vm1, %v1128_v7  ;;  %1372 = vmatpush.msra.mxu0 %v1339_v28 }
 0x603   :  { %v1180_v13 = vpop.f32.mrf.mxu2 }
 0x604   :  { %v1181_v15 = vadd.f32 %v2885_v9, %v1180_v13 }
 0x606   :  { %v1192_v20 = vmax.f32 %v1181_v15, 0.0  ;;  %v3692_v15 = vld [vmem:[%s4266_s1 + $0x184] ss:$0 sm:$0xff] }
 0x608   :  { %1214 = vmatmul.f32.vlgmr.msra.gmra.mxu3 %v1192_v20 }
 0x60b   :  { %v1183_v34 = vpop.f32.mrf.mxu2 }
 0x60c   :  { %v1184_v48 = vadd.f32 %v2885_v9, %v1183_v34 }
 0x60e   :  { %v1193_v25 = vmax.f32 %v1184_v48, 0.0 }
 0x610   :  { %1217 = vmatmul.f32.gmra.mxu3 %v1193_v25  ;;  %v2888_v25 = vld [vmem:[%s4266_s1 + $0x185] ss:$0 sm:$0xff] }
 0x63d   :  { %v1186_v27 = vpop.f32.mrf.mxu2 }
 0x63e   :  { %v1187_v46 = vadd.f32 %v2885_v9, %v1186_v27 }
 0x640   :  { %v1194_v16 = vmax.f32 %v1187_v46, 0.0 }
 0x642   :  { %1220 = vmatmul.f32.gmra.mxu3 %v1194_v16 }
 0x645   :  { %v1189_v30 = vpop.f32.mrf.mxu2 }
 0x646   :  { %v1190_v32 = vadd.f32 %v2885_v9, %v1189_v30 }
 0x648   :  { %v1195_v35 = vmax.f32 %v1190_v32, 0.0 }
 0x64a   :  { %1223 = vmatmul.f32.gmra.mxu3 %v1195_v35 }
 0x68b   :  { %v1215_v37 = vpop.f32.mrf.mxu3 }
 0x68c   :  { %v1216_v19 = vadd.f32 %v2886_v29, %v1215_v37 }
 0x68e   :  { %v3643_v38 = vadd.f32 %v1216_v19, %v3565_v49 }
 0x690   :  { %v1233_v40 = vsel %vm78_vm1, %v3643_v38, 0.0  ;;  %v1249_v24 = vmul.f32 %v3643_v38, %v3643_v38 }
 0x691   :  { %1234 = vadd.xlane.f32.xlu0 %v1233_v40 }
 0x692   :  { %v1253_v4 = vsel %vm78_vm1, %v1249_v24, 0.0 }
 0x693   :  { %v1218_v21 = vpop.f32.mrf.mxu3  ;;  %1254 = vadd.xlane.f32.xlu2 %v1253_v4 }
 0x694   :  { %v1219_v42 = vadd.f32 %v2886_v29, %v1218_v21 }
 0x696   :  { %v3651_v43 = vadd.f32 %v1219_v42, %v3572_v31 }
 0x698   :  { %v1236_v26 = vsel %vm78_vm1, %v3651_v43, 0.0  ;;  %v1250_v49 = vmul.f32 %v3651_v43, %v3651_v43 }
 0x699   :  { %1237 = vadd.xlane.f32.xlu1 %v1236_v26 }
 0x69a   :  { %v1256_v44 = vsel %vm78_vm1, %v1250_v49, 0.0 }
 0x69b   :  { %1257 = vadd.xlane.f32.xlu0 %v1256_v44 }
 0x6c5   :  { %v1221_v45 = vpop.f32.mrf.mxu3 }
 0x6c6   :  { %v1222_v33 = vadd.f32 %v2886_v29, %v1221_v45 }
 0x6c8   :  { %v3658_v36 = vadd.f32 %v1222_v33, %v1127_v5 }
 0x6ca   :  { %v1239_v23 = vsel %vm78_vm1, %v3658_v36, 0.0  ;;  %v1251_v31 = vmul.f32 %v3658_v36, %v3658_v36 }
 0x6cb   :  { %1240 = vadd.xlane.f32.xlu2 %v1239_v23 }
 0x6cc   :  { %v1259_v14 = vsel %vm78_vm1, %v1251_v31, 0.0 }
 0x6cd   :  { %v1224_v50 = vpop.f32.mrf.mxu3  ;;  %1260 = vadd.xlane.f32.xlu1 %v1259_v14 }
 0x6ce   :  { %v1225_v51 = vadd.f32 %v2886_v29, %v1224_v50 }
 0x6d0   :  { %v3665_v52 = vadd.f32 %v1225_v51, %v1128_v7 }
 0x6d2   :  { %v1242_v53 = vsel %vm78_vm1, %v3665_v52, 0.0  ;;  %v1252_v17 = vmul.f32 %v3665_v52, %v3665_v52 }
 0x6d3   :  { %1243 = vadd.xlane.f32.xlu0 %v1242_v53 }
 0x6d4   :  { %v1262_v57 = vsel %vm78_vm1, %v1252_v17, 0.0 }
 0x6d5   :  { %1263 = vadd.xlane.f32.xlu2 %v1262_v57 }
 0x704   :  { %v1235_v59 = vpop.xlane.xlu0 %1234 }
 0x705   :  { %v1245_v56 = vmul.f32 %v1235_v59, %v3540_v47 }
 0x706   :  { %v1255_v55 = vpop.xlane.xlu2 %1254 }
 0x707   :  { %v1269_v39 = vmul.f32 %v1245_v56, %v1245_v56  ;;  %v1265_v62 = vmul.f32 %v1255_v55, %v3540_v47  ;;  %v1277_v13 = vsub.f32 %v3643_v38, %v1245_v56 }
 0x709   :  { %v1273_v0 = vsub.f32 %v1265_v62, %v1269_v39 }
 0x70b   :  { %v1281_v2 = vadd.f32 1e-05, %v1273_v0 }
 0x70c   :  { %v1238_v22 = vpop.xlane.xlu1 %1237 }
 0x70d   :  { %2972 = vrsqrt.f32 %v1281_v2  ;;  %v1246_v18 = vmul.f32 %v1238_v22, %v3540_v47  ;;  %vm1291_vm7 = vweird.f32 %v1281_v2 }
 0x70e   :  { %v1258_v3 = vpop.xlane.xlu0 %1257 }
 0x70f   :  { %v1270_v5 = vmul.f32 %v1246_v18, %v1246_v18  ;;  %v1266_v61 = vmul.f32 %v1258_v3, %v3540_v47  ;;  %v1278_v35 = vsub.f32 %v3651_v43, %v1246_v18 }
 0x711   :  { %v1274_v6 = vsub.f32 %v1266_v61, %v1270_v5 }
 0x713   :  { %v2973_v8 = vpop.eup %2972  ;;  %v1282_v60 = vadd.f32 1e-05, %v1274_v6  ;;  %v2889_v6 = vld [vmem:[%s4267_s2 + $0xa1] ss:$0 sm:$0xff] }
 0x714   :  { %v1286_v1 = vmul.f32 %v2973_v8, %v1281_v2  ;;  %vm1292_vm6 = vweird.f32 %v2973_v8 }
 0x715   :  { %2974 = vrsqrt.f32 %v1282_v60  ;;  %vm1293_vm8 = vmor %vm1291_vm7, %vm1292_vm6  ;;  %vm1301_vm10 = vweird.f32 %v1282_v60 }
 0x716   :  { %v1287_v63 = vmul.f32 %v2973_v8, %v1286_v1 }
 0x718   :  { %v1288_v7 = vmul.f32 0.5, %v1287_v63 }
 0x71a   :  { %v1289_v11 = vsub.f32 1.5, %v1288_v7 }
 0x71b   :  { %v2975_v41 = vpop.eup %2974 }
 0x71c   :  { %v1290_v10 = vmul.f32 %v2973_v8, %v1289_v11  ;;  %v1296_v9 = vmul.f32 %v2975_v41, %v1282_v60  ;;  %vm1302_vm9 = vweird.f32 %v2975_v41 }
 0x71d   :  { %vm1303_vm11 = vmor %vm1301_vm10, %vm1302_vm9 }
 0x71e   :  { %v1294_v20 = vsel %vm1293_vm8, %v2973_v8, %v1290_v10  ;;  %v1297_v34 = vmul.f32 %v2975_v41, %v1296_v9 }
 0x71f   :  { %v1325_v48 = vmul.f32 %v1294_v20, %v1277_v13 }
 0x720   :  { %v1298_v27 = vmul.f32 0.5, %v1297_v34 }
 0x721   :  { %v1330_v46 = vmul.f32 %v3692_v15, %v1325_v48 }
 0x722   :  { %v1299_v16 = vsub.f32 1.5, %v1298_v27 }
 0x723   :  { %v3698_v30 = vadd.f32 %v2888_v25, %v1330_v46 }
 0x724   :  { %v1300_v32 = vmul.f32 %v2975_v41, %v1299_v16 }
 0x725   :  { %2714 = vmatmul.msk.f32.vlgmr.msra.gmra.mxu0 %vm78_vm1, %v3698_v30 }
 0x726   :  { %v1304_v29 = vsel %vm1303_vm11, %v2975_v41, %v1300_v32 }
 0x727   :  { %v1326_v37 = vmul.f32 %v1304_v29, %v1278_v35 }
 0x729   :  { %v1331_v19 = vmul.f32 %v3692_v15, %v1326_v37 }
 0x72b   :  { %v3704_v38 = vadd.f32 %v2888_v25, %v1331_v19 }
 0x72d   :  { %2715 = vmatmul.msk.f32.gmra.mxu0 %vm78_vm1, %v3704_v38 }
 0x73e   :  { %v1241_v40 = vpop.xlane.xlu2 %1240 }
 0x73f   :  { %v1247_v24 = vmul.f32 %v1241_v40, %v3540_v47 }
 0x740   :  { %v1261_v4 = vpop.xlane.xlu1 %1260 }
 0x741   :  { %v1271_v21 = vmul.f32 %v1247_v24, %v1247_v24  ;;  %v1267_v42 = vmul.f32 %v1261_v4, %v3540_v47  ;;  %v1279_v59 = vsub.f32 %v3658_v36, %v1247_v24 }
 0x743   :  { %v1275_v43 = vsub.f32 %v1267_v42, %v1271_v21 }
 0x745   :  { %v1283_v26 = vadd.f32 1e-05, %v1275_v43 }
 0x746   :  { %v1244_v49 = vpop.xlane.xlu0 %1243 }
 0x747   :  { %2976 = vrsqrt.f32 %v1283_v26  ;;  %v1248_v44 = vmul.f32 %v1244_v49, %v3540_v47  ;;  %vm1311_vm13 = vweird.f32 %v1283_v26 }
 0x748   :  { %v1264_v45 = vpop.xlane.xlu2 %1263 }
 0x749   :  { %v1272_v33 = vmul.f32 %v1248_v44, %v1248_v44  ;;  %v1268_v23 = vmul.f32 %v1264_v45, %v3540_v47  ;;  %v1280_v18 = vsub.f32 %v3665_v52, %v1248_v44 }
 0x74b   :  { %v1276_v31 = vsub.f32 %v1268_v23, %v1272_v33 }
 0x74d   :  { %v2977_v14 = vpop.eup %2976  ;;  %v1284_v50 = vadd.f32 1e-05, %v1276_v31 }
 0x74e   :  { %v1306_v51 = vmul.f32 %v2977_v14, %v1283_v26  ;;  %vm1312_vm12 = vweird.f32 %v2977_v14 }
 0x74f   :  { %2978 = vrsqrt.f32 %v1284_v50  ;;  %vm1313_vm14 = vmor %vm1311_vm13, %vm1312_vm12  ;;  %vm1321_vm0 = vweird.f32 %v1284_v50 }
 0x750   :  { %v1307_v53 = vmul.f32 %v2977_v14, %v1306_v51 }
 0x752   :  { %v1308_v17 = vmul.f32 0.5, %v1307_v53 }
 0x754   :  { %v1309_v57 = vsub.f32 1.5, %v1308_v17 }
 0x755   :  { %v2979_v12 = vpop.eup %2978 }
 0x756   :  { %v1310_v58 = vmul.f32 %v2977_v14, %v1309_v57  ;;  %v1316_v54 = vmul.f32 %v2979_v12, %v1284_v50  ;;  %vm1322_vm15 = vweird.f32 %v2979_v12 }
 0x757   :  { %vm1323_vm5 = vmor %vm1321_vm0, %vm1322_vm15 }
 0x758   :  { %v1317_v28 = vmul.f32 %v2979_v12, %v1316_v54  ;;  %v1314_v56 = vsel %vm1313_vm14, %v2977_v14, %v1310_v58 }
 0x759   :  { %v1327_v55 = vmul.f32 %v1314_v56, %v1279_v59 }
 0x75a   :  { %v1318_v39 = vmul.f32 0.5, %v1317_v28 }
 0x75b   :  { %v1332_v62 = vmul.f32 %v3692_v15, %v1327_v55 }
 0x75c   :  { %v1319_v0 = vsub.f32 1.5, %v1318_v39 }
 0x75d   :  { %v3714_v2 = vadd.f32 %v2888_v25, %v1332_v62 }
 0x75e   :  { %v1320_v22 = vmul.f32 %v2979_v12, %v1319_v0 }
 0x75f   :  { %2716 = vmatmul.msk.f32.gmra.mxu0 %vm78_vm1, %v3714_v2 }
 0x760   :  { %v1324_v36 = vsel %vm1323_vm5, %v2979_v12, %v1320_v22 }
 0x761   :  { %v1328_v3 = vmul.f32 %v1324_v36, %v1280_v18 }
 0x763   :  { %v1333_v5 = vmul.f32 %v3692_v15, %v1328_v3 }
 0x765   :  { %v3720_v61 = vadd.f32 %v2888_v25, %v1333_v5 }
 0x767   :  { %2717 = vmatmul.msk.f32.gmra.mxu0 %vm78_vm1, %v3720_v61 }
 0x7a2   :  { %v1374_v8 = vpop.f32.mrf.mxu0 }
 0x7a3   :  { %v1375_v60 = vadd.f32 %v2889_v6, %v1374_v8 }
 0x7a5   :  { %1388 = vrot.lane.b32.xlu0 %v1375_v60, %s3060_s18 }
 0x7aa   :  { %v1377_v52 = vpop.f32.mrf.mxu0 }
 0x7ab   :  { %v1378_v1 = vadd.f32 %v2889_v6, %v1377_v52 }
 0x7ad   :  { %1464 = vrot.lane.b32.xlu0 %v1375_v60, %s3061_s19  ;;  %1466 = vrot.lane.b32.xlu1 %v1378_v1, %s3061_s19  ;;  %v3758_v9 = vpack.i.bf16 %v1375_v60, %v1378_v1 }
 0x7ae   :  { %1390 = vrot.lane.b32.xlu2 %v1378_v1, %s3060_s18 }
 0x7b6   :  { %1544 = vrot.lane.b32.xlu2 %v1378_v1, %s3063_s21 }
 0x7be   :  { %1542 = vrot.lane.b32.xlu2 %v1375_v60, %s3063_s21 }
 0x7dc   :  { %v1380_v63 = vpop.f32.mrf.mxu0 }
 0x7dd   :  { %v1381_v7 = vadd.f32 %v2889_v6, %v1380_v63 }
 0x7df   :  { %1425 = vrot.lane.b32.xlu0 %v1381_v7, %s3060_s18  ;;  %1499 = vrot.lane.b32.xlu2 %v1381_v7, %s3062_s20 }
 0x7e4   :  { %v1383_v11 = vpop.f32.mrf.mxu0 }
 0x7e5   :  { %v3735_v41 = vadd.f32 %v2889_v6, %v1383_v11 }
 0x7e7   :  { %1538 = vrot.lane.b32.xlu0 %v1375_v60, %s3065_s23  ;;  %1505 = vrot.lane.b32.xlu2 %v3735_v41, %s3061_s19  ;;  %v3777_v34 = vpack.i.bf16 %v1381_v7, %v3735_v41 }
 0x7e8   :  { %1427 = vrot.lane.b32.xlu1 %v3735_v41, %s3060_s18 }
 0x7ef   :  { %1622 = vrot.lane.b32.xlu0 %v1378_v1, %s3064_s22  ;;  %1583 = vrot.lane.b32.xlu2 %v3735_v41, %s3063_s21 }
 0x7f0   :  { %1460 = vrot.lane.b32.xlu1 %v1375_v60, %s3062_s20 }
 0x7f7   :  { %1503 = vrot.lane.b32.xlu0 %v1381_v7, %s3061_s19  ;;  %1577 = vrot.lane.b32.xlu2 %v1381_v7, %s3065_s23 }
 0x7f8   :  { %1462 = vrot.lane.b32.xlu1 %v1378_v1, %s3062_s20 }
 0x7ff   :  { %1581 = vrot.lane.b32.xlu0 %v1381_v7, %s3063_s21  ;;  %1661 = vrot.lane.b32.xlu2 %v3735_v41, %s3064_s22 }
 0x800   :  { %1540 = vrot.lane.b32.xlu1 %v1378_v1, %s3065_s23 }
 0x807   :  { %1501 = vrot.lane.b32.xlu0 %v3735_v41, %s3062_s20  ;;  %1655 = vrot.lane.b32.xlu2 %v1381_v7, %s3066_s24 }
 0x808   :  { %v1391_v10 = vpop.permute.xlu2 %1390  ;;  %1620 = vrot.lane.b32.xlu1 %v1375_v60, %s3064_s22 }
 0x809   :  { %2718 = vmatpush.xpose.msk.msrb.mxu1 %vm126_vm2, %v1391_v10 }
 0x80f   :  { %1579 = vrot.lane.b32.xlu0 %v3735_v41, %s3065_s23  ;;  %2842 = vrot.lane.b32.xlu2 %v3758_v9, %s3067_s25 }
 0x810   :  { %1616 = vrot.lane.b32.xlu1 %v1375_v60, %s3066_s24  ;;  %v1545_v48 = vpop.permute.xlu2 %1544 }
 0x817   :  { %1657 = vrot.lane.b32.xlu0 %v3735_v41, %s3066_s24  ;;  %v1389_v13 = vpop.permute.xlu0 %1388 }
 0x818   :  { %1618 = vrot.lane.b32.xlu1 %v1378_v1, %s3066_s24  ;;  %2719 = vmatpush.xpose.msk.msrb.mxu1 %vm126_vm2, %v1389_v13  ;;  %v1543_v25 = vpop.permute.xlu2 %1542 }
 0x81b   :  { %2720 = vmatmul.msk.f32.vlgmr.msrb.gmra.mxu1 %vm126_vm2, %v1375_v60 }
 0x81f   :  { %v1467_v15 = vpop.permute.xlu1 %1466  ;;  %2847 = vrot.lane.b32.xlu0 %v3758_v9, %s3068_s26  ;;  %v1465_v20 = vpop.permute.xlu0 %1464 }
 0x820   :  { %1659 = vrot.lane.b32.xlu1 %v1381_v7, %s3064_s22  ;;  %2726 = vmatpush.xpose.msk.msrb.mxu0 %vm126_vm2, %v1467_v15 }
 0x823   :  { %2721 = vmatmul.msk.f32.gmra.mxu1 %vm126_vm2, %v1378_v1 }
 0x824   :  { %2727 = vmatpush.xpose.msk.msrb.mxu0 %vm126_vm2, %v1465_v20 }
 0x827   :  { %2862 = vrot.lane.b32.xlu0 %v3777_v34, %s3068_s26 }
 0x828   :  { %2852 = vrot.lane.b32.xlu1 %v3758_v9, %s3070_s28 }
 0x830   :  { %2857 = vrot.lane.b32.xlu1 %v3777_v34, %s3067_s25 }
 0x839   :  { %v1500_v27 = vpop.permute.xlu2 %1499 }
 0x841   :  { %v1506_v46 = vpop.permute.xlu2 %1505 }
 0x842   :  { %2730 = vmatpush.xpose.msk.msra.mxu1 %vm126_vm2, %v1506_v46 }
 0x849   :  { %v1584_v16 = vpop.permute.xlu2 %1583 }
 0x84a   :  { %2738 = vmatpush.xpose.msk.msrb.mxu3 %vm126_vm2, %v1584_v16 }
 0x851   :  { %v1578_v32 = vpop.permute.xlu2 %1577  ;;  %v1426_v35 = vpop.permute.xlu0 %1425 }
 0x859   :  { %v1662_v29 = vpop.permute.xlu2 %1661  ;;  %v1539_v37 = vpop.permute.xlu0 %1538 }
 0x85a   :  { %v1428_v19 = vpop.permute.xlu1 %1427 }
 0x85b   :  { %2722 = vmatpush.xpose.msk.msrb.mxu2 %vm126_vm2, %v1428_v19 }
 0x85f   :  { %2723 = vmatpush.xpose.msk.msrb.mxu2 %vm126_vm2, %v1426_v35 }
 0x861   :  { %v1656_v40 = vpop.permute.xlu2 %1655  ;;  %v1623_v24 = vpop.permute.xlu0 %1622 }
 0x862   :  { %v1461_v4 = vpop.permute.xlu1 %1460  ;;  %2724 = vmatmul.msk.f32.vlgmr.msrb.gmra.mxu2 %vm126_vm2, %v1381_v7  ;;  %2742 = vmatpush.xpose.msk.msra.mxu0 %vm126_vm2, %v1623_v24 }
 0x863   :  { %2734 = vmatpush.xpose.msk.msra.mxu2 %vm126_vm2, %v1545_v48  ;;  %2728 = vmatmul.msk.f32.vlgmr.msrb.gmra.mxu0 %vm126_vm2, %v1461_v4 }
 0x867   :  { %2735 = vmatpush.xpose.msk.msra.mxu2 %vm126_vm2, %v1543_v25 }
 0x869   :  { %v2843_v21 = vpop.permute.xlu2 %2842  ;;  %v1504_v42 = vpop.permute.xlu0 %1503 }
 0x86a   :  { %v2844_v43 = vunpack.i.l.bf16 %v2843_v21  ;;  %v1463_v26 = vpop.permute.xlu1 %1462  ;;  %2725 = vmatmul.msk.f32.gmra.mxu2 %vm126_vm2, %v3735_v41  ;;  %2731 = vmatpush.xpose.msk.msra.mxu1 %vm126_vm2, %v1504_v42  ;;  %v2845_v49 = vunpack.i.h.bf16 %v2843_v21 }
 0x86b   :  { %2729 = vmatmul.msk.f32.gmra.mxu0 %vm126_vm2, %v1463_v26 }
 0x86c   :  { %1912 = vmatpush.msrb.mxu2 %v2844_v43 }
 0x86d   :  { %2732 = vmatmul.msk.f32.vlgmr.msra.gmra.mxu1 %vm126_vm2, %v1500_v27 }
 0x86e   :  { %2746 = vmatpush.xpose.msk.msrb.mxu1 %vm126_vm2, %v1662_v29  ;;  %1913 = vmatpush.msrb.mxu2 %v2845_v49 }
 0x871   :  { %v1582_v44 = vpop.permute.xlu0 %1581 }
 0x872   :  { %v1541_v45 = vpop.permute.xlu1 %1540  ;;  %2736 = vmatmul.msk.f32.vlgmr.msra.gmra.mxu2 %vm126_vm2, %v1539_v37  ;;  %2739 = vmatpush.xpose.msk.msrb.mxu3 %vm126_vm2, %v1582_v44 }
 0x875   :  { %2740 = vmatmul.msk.f32.vlgmr.msrb.gmra.mxu3 %vm126_vm2, %v1578_v32 }
 0x879   :  { %v1502_v33 = vpop.permute.xlu0 %1501 }
 0x87a   :  { %v1621_v23 = vpop.permute.xlu1 %1620  ;;  %2737 = vmatmul.msk.f32.gmra.mxu2 %vm126_vm2, %v1541_v45  ;;  %2733 = vmatmul.msk.f32.gmra.mxu1 %vm126_vm2, %v1502_v33 }
 0x87b   :  { %2743 = vmatpush.xpose.msk.msra.mxu0 %vm126_vm2, %v1621_v23 }
 0x881   :  { %v1580_v31 = vpop.permute.xlu0 %1579 }
 0x882   :  { %v1617_v14 = vpop.permute.xlu1 %1616  ;;  %2741 = vmatmul.msk.f32.gmra.mxu3 %vm126_vm2, %v1580_v31 }
 0x883   :  { %2744 = vmatmul.msk.f32.vlgmr.msra.gmra.mxu0 %vm126_vm2, %v1617_v14 }
 0x889   :  { %v1658_v50 = vpop.permute.xlu0 %1657 }
 0x88a   :  { %v1619_v51 = vpop.permute.xlu1 %1618 }
 0x88b   :  { %2745 = vmatmul.msk.f32.gmra.mxu0 %vm126_vm2, %v1619_v51 }
 0x891   :  { %v2848_v53 = vpop.permute.xlu0 %2847 }
 0x892   :  { %v1660_v17 = vpop.permute.xlu1 %1659  ;;  %v2849_v57 = vunpack.i.l.bf16 %v2848_v53  ;;  %v2850_v12 = vunpack.i.h.bf16 %v2848_v53 }
 0x893   :  { %2747 = vmatpush.xpose.msk.msrb.mxu1 %vm126_vm2, %v1660_v17 }
 0x894   :  { %1982 = vmatpush.msrb.mxu0 %v2849_v57 }
 0x896   :  { %2748 = vmatmul.msk.f32.vlgmr.msrb.gmra.mxu1 %vm126_vm2, %v1656_v40  ;;  %1983 = vmatpush.msrb.mxu0 %v2850_v12 }
 0x898   :  { %v1417_v58 = vpop.f32.mrf.mxu1 }
 0x899   :  { %v3811_v54 = vmul.f32 0.35355338, %v1417_v58  ;;  %v2863_v59 = vpop.permute.xlu0 %2862 }
 0x89a   :  { %v2853_v28 = vpop.permute.xlu1 %2852  ;;  %v2864_v56 = vunpack.i.l.bf16 %v2863_v59  ;;  %v2865_v0 = vunpack.i.h.bf16 %v2863_v59 }
 0x89b   :  { %v2854_v55 = vunpack.i.l.bf16 %v2853_v28  ;;  %v1710_v39 = vsel %vm445_vm3, %v3811_v54, -inf  ;;  %v2855_v62 = vunpack.i.h.bf16 %v2853_v28 }
 0x89c   :  { %1711 = vmax.xlane.f32.xlu1 %v1710_v39  ;;  %2017 = vmatpush.msra.mxu1 %v2864_v56 }
 0x89d   :  { %2052 = vmatpush.msra.mxu2 %v2854_v55 }
 0x89e   :  { %2749 = vmatmul.msk.f32.gmra.mxu1 %vm126_vm2, %v1658_v50 }
 0x89f   :  { %2018 = vmatpush.msra.mxu1 %v2865_v0  ;;  %2053 = vmatpush.msra.mxu2 %v2855_v62 }
 0x8a0   :  { %v1420_v22 = vpop.f32.mrf.mxu1 }
 0x8a1   :  { %v3816_v18 = vmul.f32 0.35355338, %v1420_v22 }
 0x8a2   :  { %v2858_v36 = vpop.permute.xlu1 %2857 }
 0x8a3   :  { %v2859_v3 = vunpack.i.l.bf16 %v2858_v36  ;;  %v1713_v5 = vsel %vm445_vm3, %v3816_v18, -inf  ;;  %v2860_v6 = vunpack.i.h.bf16 %v2858_v36 }
 0x8a4   :  { %1714 = vmax.xlane.f32.xlu0 %v1713_v5 }
 0x8a5   :  { %1947 = vmatpush.msra.mxu3 %v2859_v3 }
 0x8a7   :  { %1948 = vmatpush.msra.mxu3 %v2860_v6 }
 0x8e0   :  { %v1493_v8 = vpop.f32.mrf.mxu0 }
 0x8e1   :  { %v3820_v60 = vmul.f32 0.35355338, %v1493_v8 }
 0x8e3   :  { %v1716_v52 = vsel %vm445_vm3, %v3820_v60, -inf }
 0x8e4   :  { %1717 = vmax.xlane.f32.xlu2 %v1716_v52 }
 0x8e5   :  { %v1454_v1 = vpop.f32.mrf.mxu2 }
 0x8e6   :  { %v3824_v63 = vmul.f32 0.35355338, %v1454_v1 }
 0x8e8   :  { %v1496_v7 = vpop.f32.mrf.mxu0  ;;  %v1734_v11 = vsel %vm445_vm3, %v3824_v63, -inf }
 0x8e9   :  { %v3828_v41 = vmul.f32 0.35355338, %v1496_v7  ;;  %1735 = vmax.xlane.f32.xlu0 %v1734_v11 }
 0x8ea   :  { %v1532_v10 = vpop.f32.mrf.mxu1 }
 0x8eb   :  { %v3830_v13 = vmul.f32 0.35355338, %v1532_v10  ;;  %v1719_v15 = vsel %vm445_vm3, %v3828_v41, -inf }
 0x8ec   :  { %1720 = vmax.xlane.f32.xlu2 %v1719_v15 }
 0x8ed   :  { %v1740_v20 = vsel %vm445_vm3, %v3830_v13, -inf  ;;  %v1457_v48 = vpop.f32.mrf.mxu2 }
 0x8ee   :  { %1741 = vmax.xlane.f32.xlu1 %v1740_v20  ;;  %v3858_v45 = vmul.f32 0.35355338, %v1457_v48 }
 0x8f0   :  { %v1737_v14 = vsel %vm445_vm3, %v3858_v45, -inf }
 0x8f5   :  { %v1571_v32 = vpop.f32.mrf.mxu2 }
 0x8f6   :  { %v3869_v57 = vmul.f32 0.35355338, %v1571_v32 }
 0x8f7   :  { %v1535_v25 = vpop.f32.mrf.mxu1 }
 0x8f8   :  { %v3836_v27 = vmul.f32 0.35355338, %v1535_v25  ;;  %v1610_v16 = vpop.f32.mrf.mxu3  ;;  %v1722_v56 = vsel %vm445_vm3, %v3869_v57, -inf }
 0x8f9   :  { %v3846_v24 = vmul.f32 0.35355338, %v1610_v16 }
 0x8fa   :  { %v1743_v46 = vsel %vm445_vm3, %v3836_v27, -inf }
 0x8fb   :  { %1744 = vmax.xlane.f32.xlu0 %v1743_v46  ;;  %v1746_v49 = vsel %vm445_vm3, %v3846_v24, -inf }
 0x8fd   :  { %v1574_v42 = vpop.f32.mrf.mxu2 }
 0x8fe   :  { %v3856_v44 = vmul.f32 0.35355338, %v1574_v42 }
 0x900   :  { %v1649_v35 = vpop.f32.mrf.mxu0  ;;  %v1725_v33 = vsel %vm445_vm3, %v3856_v44, -inf }
 0x901   :  { %v3840_v29 = vmul.f32 0.35355338, %v1649_v35 }
 0x903   :  { %v1728_v37 = vsel %vm445_vm3, %v3840_v29, -inf }
 0x904   :  { %1729 = vmax.xlane.f32.xlu2 %v1728_v37 }
 0x905   :  { %v1613_v19 = vpop.f32.mrf.mxu3 }
 0x906   :  { %v3844_v40 = vmul.f32 0.35355338, %v1613_v19 }
 0x908   :  { %v1652_v4 = vpop.f32.mrf.mxu0  ;;  %v1749_v21 = vsel %vm445_vm3, %v3844_v40, -inf }
 0x909   :  { %v3850_v43 = vmul.f32 0.35355338, %v1652_v4  ;;  %1750 = vmax.xlane.f32.xlu0 %v1749_v21 }
 0x90b   :  { %v1731_v26 = vsel %vm445_vm3, %v3850_v43, -inf }
 0x90c   :  { %1732 = vmax.xlane.f32.xlu1 %v1731_v26  ;;  %1747 = vmax.xlane.f32.xlu2 %v1746_v49 }
 0x90f   :  { %v1712_v23 = vpop.xlane.xlu1 %1711 }
 0x910   :  { %v1758_v51 = vsub.f32 %v3811_v54, %v1712_v23 }
 0x911   :  { %1726 = vmax.xlane.f32.xlu0 %v1725_v33 }
 0x912   :  { %v1774_v17 = vmul.f32 1.442695, %v1758_v51 }
 0x913   :  { %v1688_v31 = vpop.f32.mrf.mxu1 }
 0x914   :  { %v3864_v50 = vmul.f32 0.35355338, %v1688_v31  ;;  %1738 = vmax.xlane.f32.xlu2 %v1737_v14  ;;  %2980 = vpow2.f32 %v1774_v17 }
 0x916   :  { %v1752_v53 = vsel %vm445_vm3, %v3864_v50, -inf }
 0x917   :  { %1753 = vmax.xlane.f32.xlu1 %v1752_v53  ;;  %v1715_v12 = vpop.xlane.xlu0 %1714 }
 0x918   :  { %v1759_v28 = vsub.f32 %v3816_v18, %v1715_v12 }
 0x91a   :  { %v1776_v55 = vmul.f32 1.442695, %v1759_v28  ;;  %v3878_v39 = vpop.eup %2980 }
 0x91b   :  { %v1691_v58 = vpop.f32.mrf.mxu1  ;;  %v1806_v62 = vsel %vm445_vm3, %v3878_v39, 0.0 }
 0x91c   :  { %v3871_v59 = vmul.f32 0.35355338, %v1691_v58  ;;  %2982 = vpow2.f32 %v1776_v55 }
 0x91e   :  { %v1755_v54 = vsel %vm445_vm3, %v3871_v59, -inf }
 0x91f   :  { %1723 = vmax.xlane.f32.xlu1 %v1722_v56  ;;  %1756 = vmax.xlane.f32.xlu2 %v1755_v54 }
 0x922   :  { %v3882_v0 = vpop.eup %2982 }
 0x923   :  { %v1809_v22 = vsel %vm445_vm3, %v3882_v0, 0.0 }
 0x927   :  { %1807 = vadd.xlane.f32.xlu1 %v1806_v62 }
 0x92f   :  { %1810 = vadd.xlane.f32.xlu1 %v1809_v22 }
 0x937   :  { %2867 = vrot.lane.b32.xlu2 %v3758_v9, %s3069_s27 }
 0x957   :  { %v1718_v18 = vpop.xlane.xlu2 %1717 }
 0x958   :  { %v1760_v36 = vsub.f32 %v3820_v60, %v1718_v18 }
 0x95a   :  { %v1778_v3 = vmul.f32 1.442695, %v1760_v36 }
 0x95c   :  { %2984 = vpow2.f32 %v1778_v3  ;;  %v1736_v5 = vpop.xlane.xlu0 %1735 }
 0x95d   :  { %v1766_v6 = vsub.f32 %v3824_v63, %v1736_v5 }
 0x95f   :  { %v1790_v8 = vmul.f32 1.442695, %v1766_v6  ;;  %v1721_v52 = vpop.xlane.xlu2 %1720 }
 0x960   :  { %v1761_v1 = vsub.f32 %v3828_v41, %v1721_v52 }
 0x961   :  { %2986 = vpow2.f32 %v1790_v8  ;;  %v1742_v7 = vpop.xlane.xlu1 %1741 }
 0x962   :  { %v3891_v11 = vpop.eup %2984  ;;  %v1780_v10 = vmul.f32 1.442695, %v1761_v1  ;;  %v1768_v15 = vsub.f32 %v3830_v13, %v1742_v7 }
 0x963   :  { %v1812_v9 = vsel %vm445_vm3, %v3891_v11, 0.0 }
 0x964   :  { %2988 = vpow2.f32 %v1780_v10  ;;  %1813 = vadd.xlane.f32.xlu0 %v1812_v9  ;;  %v1794_v60 = vmul.f32 1.442695, %v1768_v15 }
 0x966   :  { %2990 = vpow2.f32 %v1794_v60 }
 0x967   :  { %v3896_v20 = vpop.eup %2986 }
 0x968   :  { %v1830_v63 = vsel %vm445_vm3, %v3896_v20, 0.0 }
 0x969   :  { %1831 = vadd.xlane.f32.xlu2 %v1830_v63 }
 0x96a   :  { %v3900_v41 = vpop.eup %2988 }
 0x96b   :  { %v1815_v48 = vsel %vm445_vm3, %v3900_v41, 0.0 }
 0x96c   :  { %1816 = vadd.xlane.f32.xlu1 %v1815_v48  ;;  %v3904_v13 = vpop.eup %2990 }
 0x96d   :  { %v1836_v25 = vsel %vm445_vm3, %v3904_v13, 0.0 }
 0x96e   :  { %v1745_v46 = vpop.xlane.xlu0 %1744 }
 0x96f   :  { %v1769_v14 = vsub.f32 %v3836_v27, %v1745_v46 }
 0x971   :  { %v1796_v58 = vmul.f32 1.442695, %v1769_v14 }
 0x974   :  { %1837 = vadd.xlane.f32.xlu1 %v1836_v25 }
 0x977   :  { %v1730_v16 = vpop.xlane.xlu2 %1729 }
 0x978   :  { %v1764_v32 = vsub.f32 %v3840_v29, %v1730_v16 }
 0x97a   :  { %v1786_v35 = vmul.f32 1.442695, %v1764_v32 }
 0x97c   :  { %2992 = vpow2.f32 %v1786_v35  ;;  %v1751_v37 = vpop.xlane.xlu0 %1750 }
 0x97d   :  { %v1771_v26 = vsub.f32 %v3844_v40, %v1751_v37 }
 0x97f   :  { %v1733_v19 = vpop.xlane.xlu1 %1732  ;;  %v1748_v4 = vpop.xlane.xlu2 %1747  ;;  %v1800_v31 = vmul.f32 1.442695, %v1771_v26 }
 0x980   :  { %v1765_v21 = vsub.f32 %v3850_v43, %v1733_v19  ;;  %v1770_v5 = vsub.f32 %v3846_v24, %v1748_v4 }
 0x982   :  { %v3910_v42 = vpop.eup %2992  ;;  %v1788_v49 = vmul.f32 1.442695, %v1765_v21 }
 0x983   :  { %v1824_v33 = vsel %vm445_vm3, %v3910_v42, 0.0 }
 0x984   :  { %2994 = vpow2.f32 %v1788_v49  ;;  %1825 = vadd.xlane.f32.xlu0 %v1824_v33  ;;  %v1727_v23 = vpop.xlane.xlu0 %1726 }
 0x985   :  { %v1763_v29 = vsub.f32 %v3856_v44, %v1727_v23 }
 0x987   :  { %v1784_v51 = vmul.f32 1.442695, %v1763_v29  ;;  %v1739_v53 = vpop.xlane.xlu2 %1738 }
 0x988   :  { %v1767_v43 = vsub.f32 %v3858_v45, %v1739_v53 }
 0x989   :  { %2996 = vpow2.f32 %v1784_v51 }
 0x98a   :  { %v3918_v17 = vpop.eup %2994  ;;  %2998 = vpow2.f32 %v1800_v31  ;;  %v1792_v40 = vmul.f32 1.442695, %v1767_v43  ;;  %v1754_v12 = vpop.xlane.xlu1 %1753 }
 0x98b   :  { %v1827_v28 = vsel %vm445_vm3, %v3918_v17, 0.0  ;;  %v1772_v15 = vsub.f32 %v3864_v50, %v1754_v12 }
 0x98c   :  { %3000 = vpow2.f32 %v1792_v40  ;;  %1828 = vadd.xlane.f32.xlu0 %v1827_v28 }
 0x98d   :  { %3002 = vpow2.f32 %v1796_v58  ;;  %v1802_v25 = vmul.f32 1.442695, %v1772_v15 }
 0x98f   :  { %v3922_v44 = vpop.eup %2996 }
 0x990   :  { %v3924_v27 = vpop.eup %2998  ;;  %v1821_v45 = vsel %vm445_vm3, %v3922_v44, 0.0 }
 0x991   :  { %1822 = vadd.xlane.f32.xlu2 %v1821_v45  ;;  %v1845_v36 = vsel %vm445_vm3, %v3924_v27, 0.0 }
 0x992   :  { %v3928_v56 = vpop.eup %3000  ;;  %v1724_v54 = vpop.xlane.xlu1 %1723 }
 0x993   :  { %v1757_v55 = vpop.xlane.xlu2 %1756  ;;  %v1762_v62 = vsub.f32 %v3869_v57, %v1724_v54  ;;  %v1833_v18 = vsel %vm445_vm3, %v3928_v56, 0.0  ;;  %v3936_v3 = vpop.eup %3002 }
 0x994   :  { %v1773_v22 = vsub.f32 %v3871_v59, %v1757_v55  ;;  %1834 = vadd.xlane.f32.xlu1 %v1833_v18  ;;  %1846 = vadd.xlane.f32.xlu0 %v1845_v36  ;;  %v1839_v57 = vsel %vm445_vm3, %v3936_v3, 0.0  ;;  %v1798_v59 = vmul.f32 1.442695, %v1770_v5 }
 0x995   :  { %v1782_v6 = vmul.f32 1.442695, %v1762_v62 }
 0x996   :  { %v1804_v8 = vmul.f32 1.442695, %v1773_v22 }
 0x997   :  { %3004 = vpow2.f32 %v1782_v6 }
 0x998   :  { %3006 = vpow2.f32 %v1804_v8 }
 0x999   :  { %1840 = vadd.xlane.f32.xlu2 %v1839_v57 }
 0x99a   :  { %v1808_v52 = vpop.xlane.xlu1 %1807 }
 0x99b   :  { %v2868_v1 = vpop.permute.xlu2 %2867  ;;  %3008 = vrcp.f32 %v1808_v52 }
 0x99c   :  { %v2869_v7 = vunpack.i.l.bf16 %v2868_v1  ;;  %3010 = vpow2.f32 %v1798_v59  ;;  %v2870_v9 = vunpack.i.h.bf16 %v2868_v1 }
 0x99d   :  { %v3941_v10 = vpop.eup %3004 }
 0x99e   :  { %2122 = vmatpush.msra.mxu0 %v2869_v7  ;;  %v3944_v24 = vpop.eup %3006  ;;  %v1818_v60 = vsel %vm445_vm3, %v3941_v10, 0.0 }
 0x99f   :  { %1819 = vadd.xlane.f32.xlu1 %v1818_v60  ;;  %v1851_v63 = vsel %vm445_vm3, %v3944_v24, 0.0 }
 0x9a0   :  { %2123 = vmatpush.msra.mxu0 %v2870_v9 }
 0x9a1   :  { %v3009_v48 = vpop.eup %3008  ;;  %1852 = vadd.xlane.f32.xlu2 %v1851_v63 }
 0x9a2   :  { %v1870_v46 = vmul.f32 %v3009_v48, %v3878_v39  ;;  %v1811_v16 = vpop.xlane.xlu1 %1810  ;;  %v3951_v32 = vpop.eup %3010 }
 0x9a3   :  { %3012 = vrcp.f32 %v1811_v16  ;;  %v1842_v50 = vsel %vm445_vm3, %v3951_v32, 0.0 }
 0x9a4   :  { %2750 = vmatmul.msk.f32.vlgmr.msrb.gmra.mxu2 %vm445_vm3, %v1870_v46  ;;  %3014 = vpow2.f32 %v1802_v25 }
 0x9a7   :  { %1843 = vadd.xlane.f32.xlu1 %v1842_v50 }
 0x9a8   :  { %2877 = vrot.lane.b32.xlu0 %v3777_v34, %s3069_s27 }
 0x9a9   :  { %v3013_v35 = vpop.eup %3012 }
 0x9aa   :  { %v1871_v37 = vmul.f32 %v3013_v35, %v3882_v0  ;;  %v3959_v19 = vpop.eup %3014 }
 0x9ab   :  { %v1848_v39 = vsel %vm445_vm3, %v3959_v19, 0.0 }
 0x9ac   :  { %2751 = vmatmul.msk.f32.gmra.mxu2 %vm445_vm3, %v1871_v37 }
 0x9af   :  { %1849 = vadd.xlane.f32.xlu1 %v1848_v39 }
 0x9c8   :  { %2872 = vrot.lane.b32.xlu1 %v3777_v34, %s3070_s28 }
 0x9d7   :  { %v1814_v4 = vpop.xlane.xlu0 %1813 }
 0x9d8   :  { %3016 = vrcp.f32 %v1814_v4 }
 0x9dc   :  { %v1832_v21 = vpop.xlane.xlu2 %1831 }
 0x9dd   :  { %3018 = vrcp.f32 %v1832_v21 }
 0x9de   :  { %v3017_v26 = vpop.eup %3016 }
 0x9df   :  { %v1872_v49 = vmul.f32 %v3017_v26, %v3891_v11  ;;  %v1817_v33 = vpop.xlane.xlu1 %1816 }
 0x9e0   :  { %3020 = vrcp.f32 %v1817_v33 }
 0x9e1   :  { %2754 = vmatmul.msk.f32.vlgmr.msrb.gmra.mxu0 %vm445_vm3, %v1872_v49 }
 0x9e3   :  { %v3019_v0 = vpop.eup %3018 }
 0x9e4   :  { %v1878_v23 = vmul.f32 %v3019_v0, %v3896_v20  ;;  %v2229_v0 = vld [vmem:[%s4266_s1 + $0x78] sm:$0xff] }
 0x9e5   :  { %2256 = vmatpush.msrb.mxu2 %v2229_v0 }
 0x9e6   :  { %v3021_v29 = vpop.eup %3020  ;;  %2752 = vmatmul.msk.f32.vlgmr.msra.gmra.mxu3 %vm445_vm3, %v1878_v23  ;;  %v2228_v23 = vld [vmem:[%s4266_s1 + $0x70] sm:$0xff] }
 0x9e7   :  { %v1838_v31 = vpop.xlane.xlu1 %1837  ;;  %v1873_v34 = vmul.f32 %v3021_v29, %v3900_v41  ;;  %v2227_v29 = vld [vmem:[%s4266_s1 + $0x68] sm:$0xff]  ;;  %2257 = vmatpush.msrb.mxu2 %v2228_v23 }
 0x9e8   :  { %3022 = vrcp.f32 %v1838_v31  ;;  %v2226_v31 = vld [vmem:[%s4266_s1 + $0x60] sm:$0xff] }
 0x9e9   :  { %2755 = vmatmul.msk.f32.gmra.mxu0 %vm445_vm3, %v1873_v34  ;;  %2258 = vmatpush.msrb.mxu2 %v2227_v29 }
 0x9eb   :  { %2259 = vmatpush.msrb.mxu2 %v2226_v31 }
 0x9ee   :  { %v3023_v14 = vpop.eup %3022 }
 0x9ef   :  { %v1880_v51 = vmul.f32 %v3023_v14, %v3904_v13 }
 0x9f1   :  { %2756 = vmatmul.msk.f32.vlgmr.msra.gmra.mxu1 %vm445_vm3, %v1880_v51 }
 0x9f7   :  { %v1826_v11 = vpop.xlane.xlu0 %1825 }
 0x9f8   :  { %3024 = vrcp.f32 %v1826_v11 }
 0x9fe   :  { %v3025_v53 = vpop.eup %3024 }
 0x9ff   :  { %v1876_v43 = vmul.f32 %v3025_v53, %v3910_v42  ;;  %v1829_v20 = vpop.xlane.xlu0 %1828 }
 0xa00   :  { %3026 = vrcp.f32 %v1829_v20 }
 0xa01   :  { %2762 = vmatmul.msk.f32.vlgmr.msra.gmra.mxu0 %vm445_vm3, %v1876_v43 }
 0xa04   :  { %v1823_v40 = vpop.xlane.xlu2 %1822 }
 0xa06   :  { %v3027_v12 = vpop.eup %3026 }
 0xa07   :  { %v1835_v41 = vpop.xlane.xlu1 %1834  ;;  %v1877_v58 = vmul.f32 %v3027_v12, %v3918_v17  ;;  %v1847_v42 = vpop.xlane.xlu0 %1846 }
 0xa08   :  { %3028 = vrcp.f32 %v1835_v41 }
 0xa09   :  { %2763 = vmatmul.msk.f32.gmra.mxu0 %vm445_vm3, %v1877_v58 }
 0xa0c   :  { %v1841_v13 = vpop.xlane.xlu2 %1840 }
 0xa0d   :  { %3030 = vrcp.f32 %v1841_v13 }
 0xa0e   :  { %v3029_v28 = vpop.eup %3028 }
 0xa0f   :  { %v1879_v45 = vmul.f32 %v3029_v28, %v3928_v56 }
 0xa11   :  { %2753 = vmatmul.msk.f32.gmra.mxu3 %vm445_vm3, %v1879_v45 }
 0xa12   :  { %v1820_v54 = vpop.xlane.xlu1 %1819 }
 0xa13   :  { %v3031_v55 = vpop.eup %3030  ;;  %3032 = vrcp.f32 %v1820_v54 }
 0xa14   :  { %v1881_v62 = vmul.f32 %v3031_v55, %v3936_v3  ;;  %3034 = vrcp.f32 %v1823_v40  ;;  %v1853_v3 = vpop.xlane.xlu2 %1852 }
 0xa16   :  { %2757 = vmatmul.msk.f32.gmra.mxu1 %vm445_vm3, %v1881_v62 }
 0xa19   :  { %v3033_v22 = vpop.eup %3032 }
 0xa1a   :  { %v1874_v17 = vmul.f32 %v3033_v22, %v3941_v10  ;;  %v1844_v18 = vpop.xlane.xlu1 %1843  ;;  %v2878_v36 = vpop.permute.xlu0 %2877 }
 0xa1b   :  { %v2879_v5 = vunpack.i.l.bf16 %v2878_v36  ;;  %v2880_v56 = vunpack.i.h.bf16 %v2878_v36  ;;  %v3035_v6 = vpop.eup %3034 }
 0xa1c   :  { %2758 = vmatmul.msk.f32.vlgmr.msra.gmra.mxu2 %vm445_vm3, %v1874_v17  ;;  %v1875_v57 = vmul.f32 %v3035_v6, %v3922_v44  ;;  %v2890_v6 = vld [vmem:[%s4266_s1 + $0x186] ss:$0 sm:$0xff] }
 0xa1d   :  { %2157 = vmatpush.msrb.mxu1 %v2879_v5 }
 0xa1f   :  { %2158 = vmatpush.msrb.mxu1 %v2880_v56 }
 0xa22   :  { %v1850_v8 = vpop.xlane.xlu1 %1849 }
 0xa23   :  { %3036 = vrcp.f32 %v1850_v8 }
 0xa24   :  { %2759 = vmatmul.msk.f32.gmra.mxu2 %vm445_vm3, %v1875_v57  ;;  %3038 = vrcp.f32 %v1853_v3 }
 0xa25   :  { %3040 = vrcp.f32 %v1844_v18 }
 0xa26   :  { %3042 = vrcp.f32 %v1847_v42 }
 0xa27   :  { %v1915_v50 = vpop.f32.mrf.mxu2 }
 0xa29   :  { %v3037_v59 = vpop.eup %3036 }
 0xa2a   :  { %v1884_v52 = vmul.f32 %v3037_v59, %v3959_v19  ;;  %v3039_v1 = vpop.eup %3038 }
 0xa2b   :  { %v1885_v7 = vmul.f32 %v3039_v1, %v3944_v24  ;;  %v3041_v15 = vpop.eup %3040 }
 0xa2c   :  { %2764 = vmatmul.msk.f32.vlgmr.msrb.gmra.mxu1 %vm445_vm3, %v1884_v52  ;;  %v1882_v60 = vmul.f32 %v3041_v15, %v3951_v32  ;;  %v3043_v63 = vpop.eup %3042 }
 0xa2d   :  { %v1883_v48 = vmul.f32 %v3043_v63, %v3924_v27 }
 0xa2f   :  { %v1918_v35 = vpop.f32.mrf.mxu2 }
 0xa34   :  { %2765 = vmatmul.msk.f32.gmra.mxu1 %vm445_vm3, %v1885_v7 }
 0xa3a   :  { %v2873_v10 = vpop.permute.xlu1 %2872 }
 0xa3b   :  { %v2874_v9 = vunpack.i.l.bf16 %v2873_v10  ;;  %v2875_v44 = vunpack.i.h.bf16 %v2873_v10 }
 0xa3d   :  { %2087 = vmatpush.msrb.mxu3 %v2874_v9 }
 0xa3f   :  { %2088 = vmatpush.msrb.mxu3 %v2875_v44 }
 0xa40   :  { %2760 = vmatmul.msk.f32.vlgmr.msrb.gmra.mxu3 %vm445_vm3, %v1882_v60 }
 0xa48   :  { %2761 = vmatmul.msk.f32.gmra.mxu3 %vm445_vm3, %v1883_v48 }
 0xa5e   :  { %v1985_v24 = vpop.f32.mrf.mxu0 }
 0xa5f   :  { %2170 = vrot.lane.b32.xlu2 %v1985_v24, %s3072_s30 }
 0xa66   :  { %v1988_v46 = vpop.f32.mrf.mxu0 }
 0xa69   :  { %v1950_v39 = vpop.f32.mrf.mxu3 }
 0xa6e   :  { %v2020_v25 = vpop.f32.mrf.mxu1 }
 0xa6f   :  { %2174 = vrot.lane.b32.xlu2 %v2020_v25, %s3072_s30 }
 0xa7e   :  { %v2125_v16 = vpop.f32.mrf.mxu0 }
 0xa7f   :  { %2202 = vrot.lane.b32.xlu0 %v2125_v16, %s3073_s4 }
 0xa86   :  { %v2128_v19 = vpop.f32.mrf.mxu0 }
 0xa93   :  { %v2023_v32 = vpop.f32.mrf.mxu1 }
 0xa94   :  { %2176 = vrot.lane.b32.xlu2 %v2023_v32, %s3072_s30  ;;  %v1953_v21 = vpop.f32.mrf.mxu3 }
 0xa9f   :  { %v2055_v37 = vpop.f32.mrf.mxu2 }
 0xaa0   :  { %2186 = vrot.lane.b32.xlu1 %v2055_v37, %s3071_s29  ;;  %v2388_v37 = vld [vmem:[%s4267_s2 + $0x78] sm:$0xff] }
 0xaa1   :  { %2431 = vmatpush.msra.mxu3 %v2388_v37  ;;  %v2400_v37 = vld [vmem:[%s4266_s1 + $0x158] sm:$0xff] }
 0xaa7   :  { %v2058_v27 = vpop.f32.mrf.mxu2 }
 0xaa8   :  { %2172 = vrot.lane.b32.xlu1 %v1988_v46, %s3072_s30  ;;  %2188 = vrot.lane.b32.xlu0 %v2058_v27, %s3071_s29  ;;  %v2386_v27 = vld [vmem:[%s4267_s2 + $0x68] sm:$0xff] }
 0xaa9   :  { %v2160_v4 = vpop.f32.mrf.mxu1 }
 0xab0   :  { %2204 = vrot.lane.b32.xlu1 %v2128_v19, %s3073_s4 }
 0xab1   :  { %v2163_v26 = vpop.f32.mrf.mxu1 }
 0xab8   :  { %2206 = vrot.lane.b32.xlu1 %v2160_v4, %s3073_s4 }
 0xab9   :  { %v2171_v34 = vpop.permute.xlu2 %2170 }
 0xaba   :  { %v2214_v14 = vsel %vm126_vm2, %v1915_v50, %v2171_v34 }
 0xac0   :  { %2208 = vrot.lane.b32.xlu1 %v2163_v26, %s3073_s4 }
 0xac3   :  { %v2090_v49 = vpop.f32.mrf.mxu3 }
 0xac4   :  { %2190 = vrot.lane.b32.xlu0 %v2090_v49, %s3071_s29 }
 0xac9   :  { %v2175_v28 = vpop.permute.xlu2 %2174 }
 0xaca   :  { %v2216_v42 = vsel %vm126_vm2, %v1950_v39, %v2175_v28  ;;  %v2385_v39 = vld [vmem:[%s4267_s2 + $0x60] sm:$0xff] }
 0xacb   :  { %v2093_v33 = vpop.f32.mrf.mxu3 }
 0xacc   :  { %2192 = vrot.lane.b32.xlu0 %v2093_v33, %s3071_s29 }
 0xaee   :  { %v2177_v22 = vpop.permute.xlu2 %2176 }
 0xaef   :  { %v2217_v17 = vsel %vm126_vm2, %v1953_v21, %v2177_v22 }
 0xaf1   :  { %v2203_v11 = vpop.permute.xlu0 %2202 }
 0xb12   :  { %v2187_v51 = vpop.permute.xlu1 %2186 }
 0xb13   :  { %v2218_v53 = vsel %vm445_vm3, %v2214_v14, %v2187_v51 }
 0xb14   :  { %v2222_v43 = vsel %vm958_vm4, %v2218_v53, %v2203_v11 }
 0xb15   :  { %2766 = vmatmul.msk.f32.vlgmr.msrb.gmra.mxu2 %vm78_vm1, %v2222_v43 }
 0xb1a   :  { %v2173_v20 = vpop.permute.xlu1 %2172  ;;  %v2189_v12 = vpop.permute.xlu0 %2188 }
 0xb1b   :  { %v2215_v40 = vsel %vm126_vm2, %v1918_v35, %v2173_v20 }
 0xb1c   :  { %v2219_v41 = vsel %vm445_vm3, %v2215_v40, %v2189_v12 }
 0xb22   :  { %v2205_v58 = vpop.permute.xlu1 %2204 }
 0xb23   :  { %v2223_v13 = vsel %vm958_vm4, %v2219_v41, %v2205_v58 }
 0xb24   :  { %2767 = vmatmul.msk.f32.gmra.mxu2 %vm78_vm1, %v2223_v13  ;;  %v4089_v13 = vld [vmem:[%s4266_s1 + $0x187] ss:$0 sm:$0xff] }
 0xb2a   :  { %v2207_v45 = vpop.permute.xlu1 %2206 }
 0xb32   :  { %v2209_v36 = vpop.permute.xlu1 %2208 }
 0xb36   :  { %v2191_v54 = vpop.permute.xlu0 %2190 }
 0xb37   :  { %v2220_v55 = vsel %vm445_vm3, %v2216_v42, %v2191_v54  ;;  %v4094_v42 = vld [vmem:[%s4266_s1 + $0x188] ss:$0 sm:$0xff] }
 0xb38   :  { %v2224_v62 = vsel %vm958_vm4, %v2220_v55, %v2207_v45 }
 0xb39   :  { %2768 = vmatmul.msk.f32.gmra.mxu2 %vm78_vm1, %v2224_v62 }
 0xb3e   :  { %v2193_v18 = vpop.permute.xlu0 %2192 }
 0xb3f   :  { %v2221_v5 = vsel %vm445_vm3, %v2217_v17, %v2193_v18 }
 0xb40   :  { %v2225_v56 = vsel %vm958_vm4, %v2221_v5, %v2209_v36 }
 0xb41   :  { %2769 = vmatmul.msk.f32.gmra.mxu2 %vm78_vm1, %v2225_v56 }
 0xb98   :  { %v2261_v8 = vpop.f32.mrf.mxu2 }
 0xb99   :  { %v2262_v57 = vadd.f32 %v2890_v6, %v2261_v8 }
 0xb9b   :  { %v4038_v3 = vadd.f32 %v2262_v57, %v3698_v30 }
 0xb9d   :  { %v2279_v59 = vsel %vm78_vm1, %v4038_v3, 0.0  ;;  %v2295_v52 = vmul.f32 %v4038_v3, %v4038_v3 }
 0xb9e   :  { %2280 = vadd.xlane.f32.xlu2 %v2279_v59 }
 0xb9f   :  { %v2299_v1 = vsel %vm78_vm1, %v2295_v52, 0.0 }
 0xba0   :  { %2300 = vadd.xlane.f32.xlu0 %v2299_v1 }
 0xba7   :  { %v2264_v7 = vpop.f32.mrf.mxu2 }
 0xba8   :  { %v2265_v10 = vadd.f32 %v2890_v6, %v2264_v7 }
 0xbaa   :  { %v4046_v15 = vadd.f32 %v2265_v10, %v3704_v38 }
 0xbac   :  { %v2282_v9 = vsel %vm78_vm1, %v4046_v15, 0.0  ;;  %v2296_v30 = vmul.f32 %v4046_v15, %v4046_v15 }
 0xbad   :  { %2283 = vadd.xlane.f32.xlu1 %v2282_v9 }
 0xbae   :  { %v2302_v44 = vsel %vm78_vm1, %v2296_v30, 0.0 }
 0xbaf   :  { %2303 = vadd.xlane.f32.xlu2 %v2302_v44 }
 0xbbc   :  { %v2267_v60 = vpop.f32.mrf.mxu2 }
 0xbbd   :  { %v2268_v63 = vadd.f32 %v2890_v6, %v2267_v60  ;;  %v2404_v60 = vld [vmem:[%s4266_s1 + $0x178] sm:$0xff] }
 0xbbe   :  { %2454 = vmatpush.msrb.mxu0 %v2404_v60 }
 0xbbf   :  { %v4054_v48 = vadd.f32 %v2268_v63, %v3714_v2  ;;  %v2403_v63 = vld [vmem:[%s4266_s1 + $0x170] sm:$0xff] }
 0xbc0   :  { %2455 = vmatpush.msrb.mxu0 %v2403_v63 }
 0xbc1   :  { %v2285_v24 = vsel %vm78_vm1, %v4054_v48, 0.0  ;;  %v2297_v38 = vmul.f32 %v4054_v48, %v4054_v48 }
 0xbc2   :  { %2286 = vadd.xlane.f32.xlu0 %v2285_v24 }
 0xbc3   :  { %v2305_v25 = vsel %vm78_vm1, %v2297_v38, 0.0 }
 0xbc4   :  { %2306 = vadd.xlane.f32.xlu1 %v2305_v25  ;;  %v2270_v46 = vpop.f32.mrf.mxu2 }
 0xbc5   :  { %v2271_v16 = vadd.f32 %v2890_v6, %v2270_v46  ;;  %v2402_v46 = vld [vmem:[%s4266_s1 + $0x168] sm:$0xff] }
 0xbc6   :  { %2456 = vmatpush.msrb.mxu0 %v2402_v46 }
 0xbc7   :  { %v4062_v50 = vadd.f32 %v2271_v16, %v3720_v61  ;;  %v2387_v61 = vld [vmem:[%s4267_s2 + $0x70] sm:$0xff] }
 0xbc8   :  { %2432 = vmatpush.msra.mxu3 %v2387_v61 }
 0xbc9   :  { %v2288_v32 = vsel %vm78_vm1, %v4062_v50, 0.0  ;;  %v2298_v2 = vmul.f32 %v4062_v50, %v4062_v50 }
 0xbca   :  { %2289 = vadd.xlane.f32.xlu2 %v2288_v32  ;;  %2433 = vmatpush.msra.mxu3 %v2386_v27  ;;  %v2401_v32 = vld [vmem:[%s4266_s1 + $0x160] sm:$0xff]  ;;  %v2399_v27 = vld [vmem:[%s4266_s1 + $0x150] sm:$0xff] }
 0xbcb   :  { %v2308_v35 = vsel %vm78_vm1, %v2298_v2, 0.0  ;;  %2457 = vmatpush.msrb.mxu0 %v2401_v32 }
 0xbcc   :  { %2309 = vadd.xlane.f32.xlu0 %v2308_v35  ;;  %2434 = vmatpush.msra.mxu3 %v2385_v39  ;;  %v2398_v39 = vld [vmem:[%s4266_s1 + $0x148] sm:$0xff] }
 0xbcd   :  { %2458 = vmatpush.msrb.mxu0 %v2400_v37 }
 0xbcf   :  { %2459 = vmatpush.msrb.mxu0 %v2399_v27 }
 0xbd1   :  { %2460 = vmatpush.msrb.mxu0 %v2398_v39 }
 0xc11   :  { %v2281_v19 = vpop.xlane.xlu2 %2280 }
 0xc12   :  { %v2291_v4 = vmul.f32 %v2281_v19, %v3540_v47 }
 0xc13   :  { %v2301_v21 = vpop.xlane.xlu0 %2300 }
 0xc14   :  { %v2315_v26 = vmul.f32 %v2291_v4, %v2291_v4  ;;  %v2311_v49 = vmul.f32 %v2301_v21, %v3540_v47  ;;  %v2323_v58 = vsub.f32 %v4038_v3, %v2291_v4  ;;  %v2397_v21 = vld [vmem:[%s4266_s1 + $0x140] sm:$0xff] }
 0xc15   :  { %2461 = vmatpush.msrb.mxu0 %v2397_v21 }
 0xc16   :  { %v2319_v33 = vsub.f32 %v2311_v49, %v2315_v26 }
 0xc18   :  { %v2327_v0 = vadd.f32 1e-05, %v2319_v33  ;;  %v2396_v33 = vld [vmem:[%s4266_s1 + $0x138] sm:$0xff] }
 0xc19   :  { %2462 = vmatpush.msrb.mxu0 %v2396_v33  ;;  %v2597_v33 = vld [vmem:[%s4267_s2 + $0x90] sm:$0xff] }
 0xc1a   :  { %3044 = vrsqrt.f32 %v2327_v0  ;;  %vm2337_vm3 = vweird.f32 %v2327_v0 }
 0xc20   :  { %v3045_v23 = vpop.eup %3044  ;;  %v2284_v29 = vpop.xlane.xlu1 %2283 }
 0xc21   :  { %v2332_v31 = vmul.f32 %v3045_v23, %v2327_v0  ;;  %v2292_v34 = vmul.f32 %v2284_v29, %v3540_v47  ;;  %vm2338_vm2 = vweird.f32 %v3045_v23 }
 0xc22   :  { %v2304_v14 = vpop.xlane.xlu2 %2303  ;;  %vm2339_vm4 = vmor %vm2337_vm3, %vm2338_vm2 }
 0xc23   :  { %v2333_v51 = vmul.f32 %v3045_v23, %v2332_v31  ;;  %v2316_v11 = vmul.f32 %v2292_v34, %v2292_v34  ;;  %v2312_v53 = vmul.f32 %v2304_v14, %v3540_v47  ;;  %v2324_v59 = vsub.f32 %v4046_v15, %v2292_v34  ;;  %v2395_v31 = vld [vmem:[%s4266_s1 + $0x130] sm:$0xff] }
 0xc24   :  { %2463 = vmatpush.msrb.mxu0 %v2395_v31 }
 0xc25   :  { %v2334_v43 = vmul.f32 0.5, %v2333_v51  ;;  %v2320_v20 = vsub.f32 %v2312_v53, %v2316_v11  ;;  %v2394_v11 = vld [vmem:[%s4266_s1 + $0x128] sm:$0xff] }
 0xc26   :  { %2464 = vmatpush.msrb.mxu0 %v2394_v11 }
 0xc27   :  { %v2335_v40 = vsub.f32 1.5, %v2334_v43  ;;  %v2328_v12 = vadd.f32 1e-05, %v2320_v20 }
 0xc29   :  { %v2336_v41 = vmul.f32 %v3045_v23, %v2335_v40  ;;  %3046 = vrsqrt.f32 %v2328_v12  ;;  %vm2347_vm7 = vweird.f32 %v2328_v12 }
 0xc2b   :  { %v2340_v28 = vsel %vm2339_vm4, %v3045_v23, %v2336_v41 }
 0xc2c   :  { %v2371_v45 = vmul.f32 %v2340_v28, %v2323_v58 }
 0xc2e   :  { %v2376_v54 = vmul.f32 %v4089_v13, %v2371_v45 }
 0xc2f   :  { %v3047_v55 = vpop.eup %3046 }
 0xc30   :  { %v2342_v62 = vmul.f32 %v3047_v55, %v2328_v12  ;;  %v4098_v22 = vadd.f32 %v4094_v42, %v2376_v54  ;;  %vm2348_vm6 = vweird.f32 %v3047_v55  ;;  %v2392_v12 = vld [vmem:[%s4266_s1 + $0x118] sm:$0xff] }
 0xc31   :  { %vm2349_vm8 = vmor %vm2347_vm7, %vm2348_vm6 }
 0xc32   :  { %v2343_v17 = vmul.f32 %v3047_v55, %v2342_v62  ;;  %2770 = vmatmul.msk.f32.vlgmr.msra.gmra.mxu3 %vm78_vm1, %v4098_v22  ;;  %v2391_v62 = vld [vmem:[%s4266_s1 + $0x110] sm:$0xff] }
 0xc34   :  { %v2344_v18 = vmul.f32 0.5, %v2343_v17  ;;  %v2389_v17 = vld [vmem:[%s4266_s1 + $0x100] sm:$0xff] }
 0xc35   :  { %v2287_v36 = vpop.xlane.xlu0 %2286 }
 0xc36   :  { %v2345_v5 = vsub.f32 1.5, %v2344_v18  ;;  %v2293_v56 = vmul.f32 %v2287_v36, %v3540_v47 }
 0xc37   :  { %v2307_v6 = vpop.xlane.xlu1 %2306 }
 0xc38   :  { %v2346_v8 = vmul.f32 %v3047_v55, %v2345_v5  ;;  %v2317_v57 = vmul.f32 %v2293_v56, %v2293_v56  ;;  %v2313_v3 = vmul.f32 %v2307_v6, %v3540_v47  ;;  %v2325_v29 = vsub.f32 %v4054_v48, %v2293_v56  ;;  %v2393_v48 = vld [vmem:[%s4266_s1 + $0x120] sm:$0xff] }
 0xc39   :  { %2465 = vmatpush.msrb.mxu0 %v2393_v48 }
 0xc3a   :  { %v2321_v52 = vsub.f32 %v2313_v3, %v2317_v57  ;;  %v2350_v1 = vsel %vm2349_vm8, %v3047_v55, %v2346_v8 }
 0xc3b   :  { %v2372_v7 = vmul.f32 %v2350_v1, %v2324_v59  ;;  %2466 = vmatpush.msrb.mxu0 %v2392_v12 }
 0xc3c   :  { %v2329_v10 = vadd.f32 1e-05, %v2321_v52 }
 0xc3d   :  { %v2290_v9 = vpop.xlane.xlu2 %2289  ;;  %v2377_v30 = vmul.f32 %v4089_v13, %v2372_v7  ;;  %2467 = vmatpush.msrb.mxu0 %v2391_v62  ;;  %v2894_v7 = vld [vmem:[%s4266_s1 + $0x189] ss:$0 sm:$0xff] }
 0xc3e   :  { %3048 = vrsqrt.f32 %v2329_v10  ;;  %v2294_v44 = vmul.f32 %v2290_v9, %v3540_v47  ;;  %vm2357_vm10 = vweird.f32 %v2329_v10 }
 0xc3f   :  { %v2310_v15 = vpop.xlane.xlu0 %2309  ;;  %v4114_v24 = vadd.f32 %v4094_v42, %v2377_v30 }
 0xc40   :  { %v2318_v38 = vmul.f32 %v2294_v44, %v2294_v44  ;;  %v2314_v25 = vmul.f32 %v2310_v15, %v3540_v47  ;;  %v2326_v58 = vsub.f32 %v4062_v50, %v2294_v44  ;;  %v2390_v50 = vld [vmem:[%s4266_s1 + $0x108] sm:$0xff] }
 0xc41   :  { %2771 = vmatmul.msk.f32.gmra.mxu3 %vm78_vm1, %v4114_v24  ;;  %2468 = vmatpush.msrb.mxu0 %v2390_v50 }
 0xc42   :  { %v2322_v16 = vsub.f32 %v2314_v25, %v2318_v38 }
 0xc43   :  { %2469 = vmatpush.msrb.mxu0 %v2389_v17 }
 0xc44   :  { %v3049_v2 = vpop.eup %3048  ;;  %v2330_v35 = vadd.f32 1e-05, %v2322_v16 }
 0xc45   :  { %v2352_v61 = vmul.f32 %v3049_v2, %v2329_v10  ;;  %vm2358_vm9 = vweird.f32 %v3049_v2 }
 0xc46   :  { %3050 = vrsqrt.f32 %v2330_v35  ;;  %vm2359_vm11 = vmor %vm2357_vm10, %vm2358_vm9  ;;  %vm2367_vm13 = vweird.f32 %v2330_v35 }
 0xc47   :  { %v2353_v19 = vmul.f32 %v3049_v2, %v2352_v61 }
 0xc49   :  { %v2354_v4 = vmul.f32 0.5, %v2353_v19 }
 0xc4b   :  { %v2355_v26 = vsub.f32 1.5, %v2354_v4 }
 0xc4c   :  { %v3051_v49 = vpop.eup %3050 }
 0xc4d   :  { %v2356_v0 = vmul.f32 %v3049_v2, %v2355_v26  ;;  %v2362_v23 = vmul.f32 %v3051_v49, %v2330_v35  ;;  %vm2368_vm12 = vweird.f32 %v3051_v49 }
 0xc4e   :  { %vm2369_vm14 = vmor %vm2367_vm13, %vm2368_vm12 }
 0xc4f   :  { %v2363_v34 = vmul.f32 %v3051_v49, %v2362_v23  ;;  %v2360_v14 = vsel %vm2359_vm11, %v3049_v2, %v2356_v0  ;;  %v2596_v0 = vld [vmem:[%s4267_s2 + $0x88] sm:$0xff] }
 0xc50   :  { %v2373_v51 = vmul.f32 %v2360_v14, %v2325_v29  ;;  %v2595_v29 = vld [vmem:[%s4267_s2 + $0x80] sm:$0xff] }
 0xc51   :  { %v2364_v53 = vmul.f32 0.5, %v2363_v34 }
 0xc52   :  { %v2378_v43 = vmul.f32 %v4089_v13, %v2373_v51 }
 0xc53   :  { %v2365_v20 = vsub.f32 1.5, %v2364_v53 }
 0xc54   :  { %v2383_v40 = vadd.f32 %v4094_v42, %v2378_v43 }
 0xc55   :  { %v2366_v41 = vmul.f32 %v3051_v49, %v2365_v20 }
 0xc56   :  { %2772 = vmatmul.msk.f32.gmra.mxu3 %vm78_vm1, %v2383_v40 }
 0xc57   :  { %v2370_v28 = vsel %vm2369_vm14, %v3051_v49, %v2366_v41  ;;  %v2598_v49 = vld [vmem:[%s4267_s2 + $0x98] sm:$0xff] }
 0xc58   :  { %v2374_v45 = vmul.f32 %v2370_v28, %v2326_v58  ;;  %2625 = vmatpush.msra.mxu1 %v2598_v49 }
 0xc5a   :  { %v2379_v54 = vmul.f32 %v4089_v13, %v2374_v45  ;;  %v2893_v13 = vld [vmem:[%s4267_s2 + $0xa3] ss:$0 sm:$0xff]  ;;  %2626 = vmatpush.msra.mxu1 %v2597_v33 }
 0xc5c   :  { %v2384_v55 = vadd.f32 %v4094_v42, %v2379_v54  ;;  %2627 = vmatpush.msra.mxu1 %v2596_v0 }
 0xc5e   :  { %2773 = vmatmul.msk.f32.gmra.mxu3 %vm78_vm1, %v2384_v55  ;;  %2628 = vmatpush.msra.mxu1 %v2595_v29 }
 0xcb5   :  { %v2436_v42 = vpop.f32.mrf.mxu3 }
 0xcb6   :  { %v2437_v18 = vadd.f32 %v2893_v13, %v2436_v42 }
 0xcb8   :  { %v2448_v36 = vmax.f32 %v2437_v18, 0.0 }
 0xcba   :  { %2470 = vmatmul.f32.vlgmr.msrb.gmra.mxu0 %v2448_v36  ;;  %v4230_v36 = vld [vmem:[%s4266_s1 + $0x18b] ss:$0 sm:$0xff] }
 0xcc4   :  { %v2439_v5 = vpop.f32.mrf.mxu3 }
 0xcc5   :  { %v2440_v56 = vadd.f32 %v2893_v13, %v2439_v5 }
 0xcc7   :  { %v2449_v6 = vmax.f32 %v2440_v56, 0.0 }
 0xcc9   :  { %2473 = vmatmul.f32.gmra.mxu0 %v2449_v6 }
 0xcd9   :  { %v2442_v8 = vpop.f32.mrf.mxu3 }
 0xcda   :  { %v2443_v57 = vadd.f32 %v2893_v13, %v2442_v8 }
 0xcdc   :  { %v2450_v3 = vmax.f32 %v2443_v57, 0.0 }
 0xcde   :  { %2476 = vmatmul.f32.gmra.mxu0 %v2450_v3 }
 0xce1   :  { %v2445_v59 = vpop.f32.mrf.mxu3 }
 0xce2   :  { %v2446_v52 = vadd.f32 %v2893_v13, %v2445_v59  ;;  %v4225_v13 = vld [vmem:[%s4266_s1 + $0x18a] ss:$0 sm:$0xff] }
 0xce4   :  { %v2451_v1 = vmax.f32 %v2446_v52, 0.0 }
 0xce6   :  { %2479 = vmatmul.f32.gmra.mxu0 %v2451_v1 }
 0xd37   :  { %v2471_v10 = vpop.f32.mrf.mxu0 }
 0xd38   :  { %v2472_v9 = vadd.f32 %v2894_v7, %v2471_v10 }
 0xd3a   :  { %v4176_v30 = vadd.f32 %v2472_v9, %v4098_v22 }
 0xd3c   :  { %v2489_v44 = vsel %vm78_vm1, %v4176_v30, 0.0  ;;  %v2505_v60 = vmul.f32 %v4176_v30, %v4176_v30 }
 0xd3d   :  { %2490 = vadd.xlane.f32.xlu1 %v2489_v44 }
 0xd3e   :  { %v2509_v63 = vsel %vm78_vm1, %v2505_v60, 0.0 }
 0xd3f   :  { %2510 = vadd.xlane.f32.xlu2 %v2509_v63 }
 0xd46   :  { %v2474_v15 = vpop.f32.mrf.mxu0 }
 0xd47   :  { %v2475_v38 = vadd.f32 %v2894_v7, %v2474_v15 }
 0xd49   :  { %v4184_v25 = vadd.f32 %v2475_v38, %v4114_v24 }
 0xd4b   :  { %v2492_v46 = vsel %vm78_vm1, %v4184_v25, 0.0  ;;  %v2506_v22 = vmul.f32 %v4184_v25, %v4184_v25 }
 0xd4c   :  { %2493 = vadd.xlane.f32.xlu0 %v2492_v46 }
 0xd4d   :  { %v2512_v16 = vsel %vm78_vm1, %v2506_v22, 0.0 }
 0xd4e   :  { %2513 = vadd.xlane.f32.xlu1 %v2512_v16 }
 0xd5b   :  { %v2477_v32 = vpop.f32.mrf.mxu0 }
 0xd5c   :  { %v2478_v2 = vadd.f32 %v2894_v7, %v2477_v32 }
 0xd5e   :  { %v4191_v35 = vadd.f32 %v2478_v2, %v2383_v40 }
 0xd60   :  { %v2495_v37 = vsel %vm78_vm1, %v4191_v35, 0.0  ;;  %v2507_v24 = vmul.f32 %v4191_v35, %v4191_v35 }
 0xd61   :  { %2496 = vadd.xlane.f32.xlu2 %v2495_v37 }
 0xd62   :  { %v2515_v61 = vsel %vm78_vm1, %v2507_v24, 0.0 }
 0xd63   :  { %v2480_v27 = vpop.f32.mrf.mxu0  ;;  %2516 = vadd.xlane.f32.xlu0 %v2515_v61 }
 0xd64   :  { %v2481_v19 = vadd.f32 %v2894_v7, %v2480_v27 }
 0xd66   :  { %v4198_v39 = vadd.f32 %v2481_v19, %v2384_v55 }
 0xd68   :  { %v2498_v4 = vsel %vm78_vm1, %v4198_v39, 0.0  ;;  %v2508_v21 = vmul.f32 %v4198_v39, %v4198_v39 }
 0xd69   :  { %2499 = vadd.xlane.f32.xlu1 %v2498_v4 }
 0xd6a   :  { %v2518_v26 = vsel %vm78_vm1, %v2508_v21, 0.0 }
 0xd6b   :  { %2519 = vadd.xlane.f32.xlu2 %v2518_v26 }
 0xdb0   :  { %v2491_v23 = vpop.xlane.xlu1 %2490 }
 0xdb1   :  { %v2501_v31 = vmul.f32 %v2491_v23, %v3540_v47 }
 0xdb2   :  { %v2511_v34 = vpop.xlane.xlu2 %2510 }
 0xdb3   :  { %v2525_v14 = vmul.f32 %v2501_v31, %v2501_v31  ;;  %v2521_v51 = vmul.f32 %v2511_v34, %v3540_v47  ;;  %v2533_v17 = vsub.f32 %v4176_v30, %v2501_v31 }
 0xdb5   :  { %v2529_v11 = vsub.f32 %v2521_v51, %v2525_v14 }
 0xdb7   :  { %v2537_v53 = vadd.f32 1e-05, %v2529_v11 }
 0xdb9   :  { %3052 = vrsqrt.f32 %v2537_v53  ;;  %vm2547_vm0 = vweird.f32 %v2537_v53 }
 0xdbf   :  { %v3053_v43 = vpop.eup %3052  ;;  %v2494_v48 = vpop.xlane.xlu0 %2493 }
 0xdc0   :  { %v2542_v20 = vmul.f32 %v3053_v43, %v2537_v53  ;;  %v2502_v40 = vmul.f32 %v2494_v48, %v3540_v47  ;;  %vm2548_vm15 = vweird.f32 %v3053_v43 }
 0xdc1   :  { %v2514_v12 = vpop.xlane.xlu1 %2513  ;;  %vm2549_vm5 = vmor %vm2547_vm0, %vm2548_vm15 }
 0xdc2   :  { %v2543_v41 = vmul.f32 %v3053_v43, %v2542_v20  ;;  %v2526_v58 = vmul.f32 %v2502_v40, %v2502_v40  ;;  %v2522_v28 = vmul.f32 %v2514_v12, %v3540_v47  ;;  %v2534_v44 = vsub.f32 %v4184_v25, %v2502_v40  ;;  %v2897_v12 = vld [vmem:[%s4267_s2 + $0xa4] ss:$0 sm:$0xff] }
 0xdc4   :  { %v2544_v45 = vmul.f32 0.5, %v2543_v41  ;;  %v2530_v54 = vsub.f32 %v2522_v28, %v2526_v58 }
 0xdc6   :  { %v2545_v55 = vsub.f32 1.5, %v2544_v45  ;;  %v2538_v62 = vadd.f32 1e-05, %v2530_v54 }
 0xdc8   :  { %v2546_v50 = vmul.f32 %v3053_v43, %v2545_v55  ;;  %3054 = vrsqrt.f32 %v2538_v62  ;;  %vm2557_vm3 = vweird.f32 %v2538_v62 }
 0xdca   :  { %v2550_v42 = vsel %vm2549_vm5, %v3053_v43, %v2546_v50 }
 0xdcb   :  { %v2581_v18 = vmul.f32 %v2550_v42, %v2533_v17 }
 0xdcd   :  { %v2586_v5 = vmul.f32 %v4225_v13, %v2581_v18 }
 0xdce   :  { %v3055_v56 = vpop.eup %3054 }
 0xdcf   :  { %v2552_v6 = vmul.f32 %v3055_v56, %v2538_v62  ;;  %v2591_v8 = vadd.f32 %v4230_v36, %v2586_v5  ;;  %vm2558_vm2 = vweird.f32 %v3055_v56 }
 0xdd0   :  { %vm2559_vm4 = vmor %vm2557_vm3, %vm2558_vm2 }
 0xdd1   :  { %v2553_v57 = vmul.f32 %v3055_v56, %v2552_v6  ;;  %2774 = vmatmul.msk.f32.vlgmr.msra.gmra.mxu1 %vm78_vm1, %v2591_v8 }
 0xdd3   :  { %v2554_v3 = vmul.f32 0.5, %v2553_v57 }
 0xdd4   :  { %v2497_v59 = vpop.xlane.xlu2 %2496 }
 0xdd5   :  { %v2555_v52 = vsub.f32 1.5, %v2554_v3  ;;  %v2503_v1 = vmul.f32 %v2497_v59, %v3540_v47 }
 0xdd6   :  { %v2517_v7 = vpop.xlane.xlu0 %2516 }
 0xdd7   :  { %v2556_v10 = vmul.f32 %v3055_v56, %v2555_v52  ;;  %v2527_v9 = vmul.f32 %v2503_v1, %v2503_v1  ;;  %v2523_v30 = vmul.f32 %v2517_v7, %v3540_v47  ;;  %v2535_v23 = vsub.f32 %v4191_v35, %v2503_v1 }
 0xdd9   :  { %v2560_v60 = vsel %vm2559_vm4, %v3055_v56, %v2556_v10  ;;  %v2531_v63 = vsub.f32 %v2523_v30, %v2527_v9 }
 0xdda   :  { %v2582_v15 = vmul.f32 %v2560_v60, %v2534_v44 }
 0xddb   :  { %v2539_v38 = vadd.f32 1e-05, %v2531_v63 }
 0xddc   :  { %v2500_v46 = vpop.xlane.xlu1 %2499  ;;  %v2587_v22 = vmul.f32 %v4225_v13, %v2582_v15 }
 0xddd   :  { %3056 = vrsqrt.f32 %v2539_v38  ;;  %v2504_v16 = vmul.f32 %v2500_v46, %v3540_v47  ;;  %vm2567_vm7 = vweird.f32 %v2539_v38 }
 0xdde   :  { %v2520_v32 = vpop.xlane.xlu2 %2519  ;;  %v2592_v2 = vadd.f32 %v4230_v36, %v2587_v22 }
 0xddf   :  { %v2528_v37 = vmul.f32 %v2504_v16, %v2504_v16  ;;  %v2524_v24 = vmul.f32 %v2520_v32, %v3540_v47  ;;  %v2536_v43 = vsub.f32 %v4198_v39, %v2504_v16 }
 0xde0   :  { %2775 = vmatmul.msk.f32.gmra.mxu1 %vm78_vm1, %v2592_v2 }
 0xde1   :  { %v2532_v25 = vsub.f32 %v2524_v24, %v2528_v37 }
 0xde3   :  { %v3057_v61 = vpop.eup %3056  ;;  %v2540_v27 = vadd.f32 1e-05, %v2532_v25 }
 0xde4   :  { %v2562_v19 = vmul.f32 %v3057_v61, %v2539_v38  ;;  %vm2568_vm6 = vweird.f32 %v3057_v61 }
 0xde5   :  { %3058 = vrsqrt.f32 %v2540_v27  ;;  %vm2569_vm8 = vmor %vm2567_vm7, %vm2568_vm6  ;;  %vm2577_vm10 = vweird.f32 %v2540_v27 }
 0xde6   :  { %v2563_v4 = vmul.f32 %v3057_v61, %v2562_v19 }
 0xde8   :  { %v2564_v21 = vmul.f32 0.5, %v2563_v4 }
 0xdea   :  { %v2565_v26 = vsub.f32 1.5, %v2564_v21 }
 0xdeb   :  { %v3059_v49 = vpop.eup %3058 }
 0xdec   :  { %v2566_v33 = vmul.f32 %v3057_v61, %v2565_v26  ;;  %v2572_v0 = vmul.f32 %v3059_v49, %v2540_v27  ;;  %vm2578_vm9 = vweird.f32 %v3059_v49 }
 0xded   :  { %vm2579_vm11 = vmor %vm2577_vm10, %vm2578_vm9 }
 0xdee   :  { %v2570_v29 = vsel %vm2569_vm8, %v3057_v61, %v2566_v33  ;;  %v2573_v47 = vmul.f32 %v3059_v49, %v2572_v0 }
 0xdef   :  { %v2583_v31 = vmul.f32 %v2570_v29, %v2535_v23 }
 0xdf0   :  { %v2574_v34 = vmul.f32 0.5, %v2573_v47 }
 0xdf1   :  { %v2588_v14 = vmul.f32 %v4225_v13, %v2583_v31 }
 0xdf2   :  { %v2575_v51 = vsub.f32 1.5, %v2574_v34 }
 0xdf3   :  { %v2593_v11 = vadd.f32 %v4230_v36, %v2588_v14 }
 0xdf4   :  { %v2576_v53 = vmul.f32 %v3059_v49, %v2575_v51 }
 0xdf5   :  { %2776 = vmatmul.msk.f32.gmra.mxu1 %vm78_vm1, %v2593_v11 }
 0xdf6   :  { %v2580_v48 = vsel %vm2579_vm11, %v3059_v49, %v2576_v53 }
 0xdf7   :  { %v2584_v35 = vmul.f32 %v2580_v48, %v2536_v43 }
 0xdf9   :  { %v2589_v20 = vmul.f32 %v4225_v13, %v2584_v35 }
 0xdfb   :  { %v2594_v40 = vadd.f32 %v4230_v36, %v2589_v20 }
 0xdfd   :  { %2777 = vmatmul.msk.f32.gmra.mxu1 %vm78_vm1, %v2594_v40 }
 0xe4e   :  { %v2630_v41 = vpop.f32.mrf.mxu1 }
 0xe4f   :  { %v2631_v58 = vadd.f32 %v2897_v12, %v2630_v41 }
 0xe51   :  { %2642 = vst [vmem:[%s4269_s3] sm:$0xff] %v2631_v58 }
 0xe5d   :  { %v2633_v39 = vpop.f32.mrf.mxu1 }
 0xe5e   :  { %v2634_v28 = vadd.f32 %v2897_v12, %v2633_v39 }
 0xe60   :  { %2643 = vst [vmem:[%s4269_s3 + $0x8] sm:$0xff] %v2634_v28 }
 0xe72   :  { %v2636_v45 = vpop.f32.mrf.mxu1 }
 0xe73   :  { %v2637_v54 = vadd.f32 %v2897_v12, %v2636_v45 }
 0xe75   :  { %2644 = vst [vmem:[%s4269_s3 + $0x10] sm:$0xff] %v2637_v54 }
 0xe7a   :  { %v2639_v55 = vpop.f32.mrf.mxu1 }
 0xe7b   :  { %v2640_v62 = vadd.f32 %v2897_v12, %v2639_v55 }
 0xe7d   :  { %2645 = vst [vmem:[%s4269_s3 + $0x18] sm:$0xff] %v2640_v62 }

</bundles_post_ra>
